<compile_context>
chip_gen: v5e
topology: v5e:2x2
jax: 0.10.0
libtpu: 0.0.40
codegen_flags: <defaults>
</compile_context>

<pallas_src>
import functools

import jax
import jax.numpy as jnp
from jax import lax
from jax.experimental import pallas as pl
from jax.experimental.pallas import tpu as pltpu


# ------------------ fused QKV + attention + PGL-SUM regressor ------------------
def pgl_sum_kernel(t_valid, x_ref, wqkv_ref, wo_ref, lnp_ref, w1_ref, w2_ref,
                   b2_ref, scores_ref, att_ref, qkv_ref):
    eps = 1e-6
    i = pl.program_id(0)
    block_q = scores_ref.shape[1]        # query rows per grid step
    H = wo_ref.shape[0]                  # attention hidden size (output_size)
    t_pad = qkv_ref.shape[0]             # padded sequence length

    # ---- Q/K/V for the whole (padded) sequence, computed once into scratch ----
    # qkv_ref persists across grid steps; only grid step 0 fills it.
    @pl.when(i == 0)
    def _():
        qkv_ref[...] = jnp.dot(
            x_ref[...].astype(jnp.bfloat16), wqkv_ref[...],
            preferred_element_type=jnp.float32).astype(jnp.bfloat16)

    # ---- per-block Q, residual x slice, full K/V (resident) ----
    row0 = pl.multiple_of(i * block_q, block_q)
    xq = x_ref[pl.ds(row0, block_q), :]                      # (Bq, D) f32 residual
    q = qkv_ref[pl.ds(row0, block_q), pl.ds(0, H)]           # (Bq, H) bf16
    k = qkv_ref[:, H:2 * H]                                  # (Tp, H) bf16
    v = qkv_ref[:, 2 * H:3 * H]                              # (Tp, H) bf16

    # energies = Q @ K^T : contract over last dims of both operands (no K copy)
    energies = lax.dot_general(q, k, (((1,), (1,)), ((), ())),
                               preferred_element_type=jnp.float32)   # (Bq, Tp)

    # mask padded key columns (static decision: t_valid is a Python int)
    if t_valid < t_pad:
        col = lax.broadcasted_iota(jnp.int32, energies.shape, 1)
        energies = jnp.where(col < t_valid, energies, -1e30)

    # exact softmax over the full key range; EUP reciprocal + one Newton step
    m = jnp.max(energies, axis=-1, keepdims=True)
    e = jnp.exp(energies - m)
    denom = jnp.sum(e, axis=-1, keepdims=True)
    r = pl.reciprocal(denom, approx=True)
    r = r * (2.0 - denom * r)                                # refine: rows sum ~1
    att = e * r                                              # (Bq, Tp) f32
    att_ref[...] = att.astype(att_ref.dtype)

    # y = (att @ V) @ Wo + x   (bf16 MXU operands, f32 accumulation)
    y_head = jnp.dot(att.astype(jnp.bfloat16), v,
                     preferred_element_type=jnp.float32)     # (Bq, H)
    y = jnp.dot(y_head.astype(jnp.bfloat16), wo_ref[...],
                preferred_element_type=jnp.float32) + xq     # (Bq, D)

    # packed per-feature params: rows = [lny_w, lny_b, b1, lnl_w, lnl_b]
    lnp = lnp_ref[...]                                       # (5, D)
    lny_w, lny_b = lnp[0:1, :], lnp[1:2, :]
    b1 = lnp[2:3, :]
    lnl_w, lnl_b = lnp[3:4, :], lnp[4:5, :]

    # LayerNorm norm_y (biased variance, eps=1e-6)
    mu = jnp.mean(y, axis=-1, keepdims=True)
    yc = y - mu
    var = jnp.mean(yc * yc, axis=-1, keepdims=True)
    yn = yc * lax.rsqrt(var + eps) * lny_w + lny_b

    # linear_1 + ReLU
    h = jnp.dot(yn.astype(jnp.bfloat16), w1_ref[...],
                preferred_element_type=jnp.float32) + b1
    h = jnp.maximum(h, 0.0)

    # LayerNorm norm_linear
    mu2 = jnp.mean(h, axis=-1, keepdims=True)
    hc = h - mu2
    var2 = jnp.mean(hc * hc, axis=-1, keepdims=True)
    hn = hc * lax.rsqrt(var2 + eps) * lnl_w + lnl_b

    # linear_2: contract over D, produce a lane-dense (1, Bq) scores block
    s = lax.dot_general(w2_ref[...], hn.astype(jnp.bfloat16),
                        (((1,), (1,)), ((), ())),
                        preferred_element_type=jnp.float32)  # (1, Bq)
    scores_ref[...] = s + b2_ref[0]


def pgl_sum_forward(x, params, block_q=128, attn_dtype=jnp.bfloat16):
    """x: [T, D] float32. Returns (scores [1, T] f32, attn_weights [T, T]).

    block_q: 128 is ideal for v5e's 128x128 MXU and gives >=2 blocks (2-TC
    headroom) at T>=256; raise to 256 on v6e/v7x for large T to fill the
    256-wide MXU.  attn_dtype bf16 halves the dominant T*T HBM write.
    """
    T, D = x.shape
    H = params["wq"].shape[0]          # output_size (heads=1)
    bf16 = jnp.bfloat16

    # lane-dense scores output requires block_q % 128 == 0
    if block_q <= 0 or block_q % 128 != 0:
        block_q = 128
    block_q = min(block_q, 512)
    # pad T up to a multiple of block_q (padded keys masked, padded queries
    # sliced off) instead of falling back to a single giant block.
    t_pad = ((T + block_q - 1) // block_q) * block_q
    n_blocks = t_pad // block_q
    x_p = x if t_pad == T else jnp.pad(x, ((0, t_pad - T), (0, 0)))

    # pre-transpose nn.Linear weights (out, in) -> (in, out); fuse Q/K/V into
    # one (D, 3H) bf16 weight so the projection is a single MXU matmul.
    wqkv = jnp.concatenate(
        [params["wq"].T, params["wk"].T, params["wv"].T], axis=1).astype(bf16)
    wo_t = params["wo"].T.astype(bf16)                       # (H, D)
    w1_t = params["w1"].T.astype(bf16)                       # (D, D)
    w2 = params["w2"].astype(bf16)                           # (1, D)
    ln_pack = jnp.stack([params["lny_w"], params["lny_b"], params["b1"],
                         params["lnl_w"], params["lnl_b"]],
                        axis=0).astype(jnp.float32)          # (5, D)
    b2 = params["b2"].astype(jnp.float32).reshape(1)         # scalar -> SMEM

    # advisory cost hint for the XLA scheduler
    att_bytes = jnp.dtype(attn_dtype).itemsize
    flops = (2 * t_pad * D * 3 * H                            # fused QKV
             + 4 * t_pad * t_pad * H                          # QK^T and att@V
             + 2 * t_pad * H * D                              # out proj
             + 2 * t_pad * D * D                              # linear_1
             + 2 * t_pad * D)                                 # linear_2
    bytes_accessed = (t_pad * D * 4                           # x
                      + (4 * H * D + D * D + D) * 2 + 5 * D * 4  # weights
                      + t_pad * t_pad * att_bytes             # attn out
                      + t_pad * 4)                            # scores out
    cost = pl.CostEstimate(flops=int(flops),
                           transcendentals=int(t_pad * t_pad + 3 * t_pad),
                           bytes_accessed=int(bytes_accessed))

    cparams = pltpu.CompilerParams(
        # "arbitrary": the grid carries a dependency through the persistent
        # QKV scratch (filled once at step 0), so steps must run sequentially
        # on one core.  Default scoped-VMEM limit is kept (working set is
        # < 2 MiB at these sizes); re-derive per-generation for very large T.
        dimension_semantics=("arbitrary",))

    scores, att = pl.pallas_call(
        functools.partial(pgl_sum_kernel, T),
        grid=(n_blocks,),
        in_specs=[
            pl.BlockSpec((t_pad, D), lambda i: (0, 0)),      # full x, resident
            pl.BlockSpec((D, 3 * H), lambda i: (0, 0)),      # fused Wqkv^T
            pl.BlockSpec((H, D), lambda i: (0, 0)),          # Wo^T
            pl.BlockSpec((5, D), lambda i: (0, 0)),          # packed LN params + b1
            pl.BlockSpec((D, D), lambda i: (0, 0)),          # W1^T
            pl.BlockSpec((1, D), lambda i: (0, 0)),          # W2 (out=1, in=D)
            pl.BlockSpec(memory_space=pltpu.MemorySpace.SMEM),  # b2 scalar
        ],
        out_specs=(
            pl.BlockSpec((1, block_q), lambda i: (0, i)),    # lane-dense scores
            pl.BlockSpec((block_q, t_pad), lambda i: (i, 0)),  # attention weights
        ),
        out_shape=(
            jax.ShapeDtypeStruct((1, t_pad), jnp.float32),
            jax.ShapeDtypeStruct((t_pad, t_pad), attn_dtype),
        ),
        scratch_shapes=[pltpu.VMEM((t_pad, 3 * H), bf16)],   # persistent Q/K/V
        compiler_params=cparams,
        cost_estimate=cost,
    )(x_p, wqkv, wo_t, ln_pack, w1_t, w2, b2)

    if t_pad != T:
        scores = scores[:, :T]
        att = att[:T, :T]
    return scores, att


def make_params(key, input_size, output_size):
    """Deterministic parameter init (shapes follow the PyTorch module)."""
    ks = jax.random.split(key, 8)

    def lin(k, out_f, in_f):
        bound = 1.0 / jnp.sqrt(in_f)
        return jax.random.uniform(k, (out_f, in_f), jnp.float32, -bound, bound)

    D, H = input_size, output_size
    return {
        "wq": lin(ks[0], H, D),            # SelfAttention.Wq[0]
        "wk": lin(ks[1], H, D),            # SelfAttention.Wk[0]
        "wv": lin(ks[2], H, D),            # SelfAttention.Wv[0]
        "wo": lin(ks[3], D, H),            # SelfAttention.out
        "w1": lin(ks[4], D, D),            # linear_1.weight
        "b1": jax.random.uniform(ks[5], (D,), jnp.float32,
                                 -1.0 / jnp.sqrt(D), 1.0 / jnp.sqrt(D)),
        "w2": lin(ks[6], 1, D),            # linear_2.weight
        "b2": jax.random.uniform(ks[7], (1,), jnp.float32,
                                 -1.0 / jnp.sqrt(D), 1.0 / jnp.sqrt(D)),
        "lny_w": jnp.ones((D,), jnp.float32),   # nn.LayerNorm defaults
        "lny_b": jnp.zeros((D,), jnp.float32),
        "lnl_w": jnp.ones((D,), jnp.float32),
        "lnl_b": jnp.zeros((D,), jnp.float32),
    }


def pgl_sum_reference_f32(x, p):
    """Pure-f32 JAX reference of the PyTorch forward (eval mode)."""
    eps = 1e-6
    q = x @ p["wq"].T
    k = x @ p["wk"].T
    v = x @ p["wv"].T
    energies = q @ k.T
    att = jax.nn.softmax(energies, axis=-1)
    y = (att @ v) @ p["wo"].T + x
    mu = y.mean(-1, keepdims=True)
    var = ((y - mu) ** 2).mean(-1, keepdims=True)
    y = (y - mu) / jnp.sqrt(var + eps) * p["lny_w"] + p["lny_b"]
    h = jnp.maximum(y @ p["w1"].T + p["b1"], 0.0)
    mu2 = h.mean(-1, keepdims=True)
    var2 = ((h - mu2) ** 2).mean(-1, keepdims=True)
    h = (h - mu2) / jnp.sqrt(var2 + eps) * p["lnl_w"] + p["lnl_b"]
    s = h @ p["w2"].T + p["b2"]
    return s.reshape(1, -1), att


def pgl_sum_reference_bf16(x, p):
    """Reference emulating the kernel's bf16 matmul operands (f32 accumulation)."""
    bf, f32 = jnp.bfloat16, jnp.float32
    eps = 1e-6
    xb = x.astype(bf)
    q = jnp.dot(xb, p["wq"].T.astype(bf), preferred_element_type=f32).astype(bf)
    k = jnp.dot(xb, p["wk"].T.astype(bf), preferred_element_type=f32).astype(bf)
    v = jnp.dot(xb, p["wv"].T.astype(bf), preferred_element_type=f32).astype(bf)
    energies = lax.dot_general(q, k, (((1,), (1,)), ((), ())),
                               preferred_element_type=f32)
    m = energies.max(-1, keepdims=True)
    e = jnp.exp(energies - m)
    att = e / e.sum(-1, keepdims=True)
    y = jnp.dot(att.astype(bf), v, preferred_element_type=f32)
    y = jnp.dot(y.astype(bf), p["wo"].T.astype(bf), preferred_element_type=f32) + x
    mu = y.mean(-1, keepdims=True)
    var = ((y - mu) ** 2).mean(-1, keepdims=True)
    y = (y - mu) * lax.rsqrt(var + eps) * p["lny_w"] + p["lny_b"]
    h = jnp.dot(y.astype(bf), p["w1"].T.astype(bf),
                preferred_element_type=f32) + p["b1"]
    h = jnp.maximum(h, 0.0)
    mu2 = h.mean(-1, keepdims=True)
    var2 = ((h - mu2) ** 2).mean(-1, keepdims=True)
    h = (h - mu2) * lax.rsqrt(var2 + eps) * p["lnl_w"] + p["lnl_b"]
    s = lax.dot_general(p["w2"].astype(bf), h.astype(bf),
                        (((1,), (1,)), ((), ())),
                        preferred_element_type=f32) + p["b2"]
    return s, att


if __name__ == "__main__":
    # T frames, input_size = output_size = 128, heads = 1 (lane-aligned shapes)
    T, D = 256, 128
    key = jax.random.PRNGKey(0)
    kx, kp = jax.random.split(key)
    x = jax.random.normal(kx, (T, D), jnp.float32)
    params = make_params(kp, input_size=D, output_size=D)

    scores, attn = pgl_sum_forward(x, params, block_q=128)
    scores = jax.block_until_ready(scores)
    attn = jax.block_until_ready(attn)

    assert scores.shape == (1, T) and attn.shape == (T, T)
    attn_f32 = attn.astype(jnp.float32)

    # (1) Tight check against a reference emulating the kernel's bf16 matmul
    #     inputs (attn tolerance widened slightly for the bf16 output store).
    s_bf, a_bf = pgl_sum_reference_bf16(x, params)
    assert jnp.allclose(attn_f32, a_bf, atol=4e-3, rtol=3e-2)
    assert jnp.allclose(scores, s_bf, atol=5e-3, rtol=5e-2)

    # (2) Looser semantic check against the exact f32 PyTorch-equivalent forward
    #     (slack accounts for bf16 MXU operands; accumulation stays f32).
    s_f32, a_f32 = pgl_sum_reference_f32(x, params)
    assert jnp.allclose(attn_f32, a_f32, atol=2e-2, rtol=2e-1)
    assert jnp.allclose(scores, s_f32, atol=1e-1, rtol=1.5e-1)
    # softmax rows must sum to ~1 (structural check on the attention output)
    assert jnp.max(jnp.abs(attn_f32.sum(-1) - 1.0)) < 5e-3

    # (3) Ragged-T path: T not a multiple of block_q -> padding + key masking.
    T2 = 200
    x2 = jax.random.normal(jax.random.PRNGKey(1), (T2, D), jnp.float32)
    s2, a2 = pgl_sum_forward(x2, params, block_q=128)
    s2 = jax.block_until_ready(s2)
    a2 = jax.block_until_ready(a2)
    assert s2.shape == (1, T2) and a2.shape == (T2, T2)
    a2_f32 = a2.astype(jnp.float32)
    s2_ref, a2_ref = pgl_sum_reference_f32(x2, params)
    assert jnp.allclose(a2_f32, a2_ref, atol=2e-2, rtol=2e-1)
    assert jnp.allclose(s2, s2_ref, atol=1e-1, rtol=1.5e-1)
    assert jnp.max(jnp.abs(a2_f32.sum(-1) - 1.0)) < 5e-3

    print("KERNEL_OK")
</pallas_src>

<mosaic_0001>
module attributes {stable_mosaic.version = 11 : i64} {
  func.func @pgl_sum_kernel(%arg0: i32, %arg1: memref<256x128xf32, #tpu.memory_space<vmem>>, %arg2: memref<128x384xbf16, #tpu.memory_space<vmem>>, %arg3: memref<128x128xbf16, #tpu.memory_space<vmem>>, %arg4: memref<5x128xf32, #tpu.memory_space<vmem>>, %arg5: memref<128x128xbf16, #tpu.memory_space<vmem>>, %arg6: memref<1x128xbf16, #tpu.memory_space<vmem>>, %arg7: memref<1xf32, #tpu.memory_space<smem>>, %arg8: memref<1x128xf32, #tpu.memory_space<vmem>>, %arg9: memref<128x256xbf16, #tpu.memory_space<vmem>>, %arg10: memref<256x384xbf16, #tpu.memory_space<vmem>>) attributes {dimension_semantics = [#tpu.dimension_semantics<arbitrary>], iteration_bounds = array<i64: 2>, scalar_prefetch = 0 : i64, scratch_operands = 1 : i64, tpu.core_type = #tpu.core_type<tc>, window_params = [{pipeline_mode = #tpu.pipeline_mode<synchronous>, transform_indices = @transform_0, window_bounds = array<i64: 256, 128>}, {pipeline_mode = #tpu.pipeline_mode<synchronous>, transform_indices = @transform_1, window_bounds = array<i64: 128, 384>}, {pipeline_mode = #tpu.pipeline_mode<synchronous>, transform_indices = @transform_2, window_bounds = array<i64: 128, 128>}, {pipeline_mode = #tpu.pipeline_mode<synchronous>, transform_indices = @transform_3, window_bounds = array<i64: 5, 128>}, {pipeline_mode = #tpu.pipeline_mode<synchronous>, transform_indices = @transform_4, window_bounds = array<i64: 128, 128>}, {pipeline_mode = #tpu.pipeline_mode<synchronous>, transform_indices = @transform_5, window_bounds = array<i64: 1, 128>}, {transform_indices = @transform_6, window_bounds = array<i64: 1>}, {transform_indices = @transform_7, window_bounds = array<i64: 1, 128>}, {transform_indices = @transform_8, window_bounds = array<i64: 128, 256>}]} {
    %c0_i32 = arith.constant 0 : i32
    %0 = arith.cmpi eq, %arg0, %c0_i32 : i32
    %1 = arith.extui %0 : i1 to i32
    %c0_i32_0 = arith.constant 0 : i32
    %2 = arith.cmpi ne, %1, %c0_i32_0 : i32
    scf.if %2 {
      %c0_35 = arith.constant 0 : index
      %c0_36 = arith.constant 0 : index
      %94 = vector.load %arg1[%c0_35, %c0_36] : memref<256x128xf32, #tpu.memory_space<vmem>>, vector<256x128xf32>
      %95 = arith.truncf %94 : vector<256x128xf32> to vector<256x128xbf16>
      %c0_37 = arith.constant 0 : index
      %c0_38 = arith.constant 0 : index
      %96 = vector.load %arg2[%c0_37, %c0_38] : memref<128x384xbf16, #tpu.memory_space<vmem>>, vector<128x384xbf16>
      %cst_39 = arith.constant dense<0.000000e+00> : vector<256x384xf32>
      %97 = tpu.matmul %95, %96, %cst_39 {dimension_numbers = #tpu.dot_dimension_numbers<[1], [0], [0], [1], [0, 0, 1, 1], [], []>} : vector<256x128xbf16>, vector<128x384xbf16>, vector<256x384xf32> -> vector<256x384xf32>
      %98 = arith.truncf %97 : vector<256x384xf32> to vector<256x384xbf16>
      %c0_40 = arith.constant 0 : index
      %c0_41 = arith.constant 0 : index
      %99 = vector.load %arg10[%c0_40, %c0_41] : memref<256x384xbf16, #tpu.memory_space<vmem>>, vector<256x384xbf16>
      tpu.vector_store %arg10[%c0_40, %c0_41], %98 {strides = array<i32>} : memref<256x384xbf16, #tpu.memory_space<vmem>>, vector<256x384xbf16>,
    } else {
    }
    %c128_i32 = arith.constant 128 : i32
    %3 = arith.muli %arg0, %c128_i32 : i32
    %4 = tpu.assume_multiple %3, 128 : i32
    %5 = arith.index_cast %4 : i32 to index
    %c0 = arith.constant 0 : index
    %6 = vector.load %arg1[%5, %c0] : memref<256x128xf32, #tpu.memory_space<vmem>>, vector<128x128xf32>
    %7 = arith.index_cast %4 : i32 to index
    %c0_1 = arith.constant 0 : index
    %8 = vector.load %arg10[%7, %c0_1] : memref<256x384xbf16, #tpu.memory_space<vmem>>, vector<128x128xbf16>
    %c0_2 = arith.constant 0 : index
    %c128 = arith.constant 128 : index
    %9 = vector.load %arg10[%c0_2, %c128] : memref<256x384xbf16, #tpu.memory_space<vmem>>, vector<256x128xbf16>
    %c0_3 = arith.constant 0 : index
    %c256 = arith.constant 256 : index
    %10 = vector.load %arg10[%c0_3, %c256] : memref<256x384xbf16, #tpu.memory_space<vmem>>, vector<256x128xbf16>
    %cst = arith.constant dense<0.000000e+00> : vector<128x256xf32>
    %11 = tpu.matmul %8, %9, %cst {dimension_numbers = #tpu.dot_dimension_numbers<[1], [1], [0], [0], [0, 0, 1, 0], [], []>} : vector<128x128xbf16>, vector<256x128xbf16>, vector<128x256xf32> -> vector<128x256xf32>
    %cst_4 = arith.constant dense<0xFF800000> : vector<128xf32>
    %12 = vector.multi_reduction <maximumf>, %11, %cst_4 [1] : vector<128x256xf32> to vector<128xf32>
    %13 = vector.shape_cast %12 : vector<128xf32> to vector<128x1xf32>
    %14 = vector.broadcast %13 : vector<128x1xf32> to vector<128x256xf32>
    %15 = arith.subf %11, %14 : vector<128x256xf32>
    %16 = math.exp %15 : vector<128x256xf32>
    %cst_5 = arith.constant dense<0.000000e+00> : vector<128xf32>
    %17 = vector.multi_reduction <add>, %16, %cst_5 [1] : vector<128x256xf32> to vector<128xf32>
    %18 = vector.shape_cast %17 : vector<128xf32> to vector<128x1xf32>
    %19 = tpu.reciprocal %18 {approx = true} : vector<128x1xf32> -> vector<128x1xf32>
    %20 = arith.mulf %18, %19 : vector<128x1xf32>
    %cst_6 = arith.constant 2.000000e+00 : f32
    %21 = vector.broadcast %cst_6 : f32 to vector<128x1xf32>
    %22 = arith.subf %21, %20 : vector<128x1xf32>
    %23 = arith.mulf %19, %22 : vector<128x1xf32>
    %24 = vector.broadcast %23 : vector<128x1xf32> to vector<128x256xf32>
    %25 = arith.mulf %16, %24 : vector<128x256xf32>
    %26 = arith.truncf %25 : vector<128x256xf32> to vector<128x256xbf16>
    %c0_7 = arith.constant 0 : index
    %c0_8 = arith.constant 0 : index
    %27 = vector.load %arg9[%c0_7, %c0_8] : memref<128x256xbf16, #tpu.memory_space<vmem>>, vector<128x256xbf16>
    tpu.vector_store %arg9[%c0_7, %c0_8], %26 {strides = array<i32>} : memref<128x256xbf16, #tpu.memory_space<vmem>>, vector<128x256xbf16>,
    %28 = arith.truncf %25 : vector<128x256xf32> to vector<128x256xbf16>
    %cst_9 = arith.constant dense<0.000000e+00> : vector<128x128xf32>
    %29 = tpu.matmul %28, %10, %cst_9 {dimension_numbers = #tpu.dot_dimension_numbers<[1], [0], [0], [1], [0, 0, 1, 1], [], []>} : vector<128x256xbf16>, vector<256x128xbf16>, vector<128x128xf32> -> vector<128x128xf32>
    %30 = arith.truncf %29 : vector<128x128xf32> to vector<128x128xbf16>
    %c0_10 = arith.constant 0 : index
    %c0_11 = arith.constant 0 : index
    %31 = vector.load %arg3[%c0_10, %c0_11] : memref<128x128xbf16, #tpu.memory_space<vmem>>, vector<128x128xbf16>
    %cst_12 = arith.constant dense<0.000000e+00> : vector<128x128xf32>
    %32 = tpu.matmul %30, %31, %cst_12 {dimension_numbers = #tpu.dot_dimension_numbers<[1], [0], [0], [1], [0, 0, 1, 1], [], []>} : vector<128x128xbf16>, vector<128x128xbf16>, vector<128x128xf32> -> vector<128x128xf32>
    %33 = arith.addf %32, %6 : vector<128x128xf32>
    %c0_13 = arith.constant 0 : index
    %c0_14 = arith.constant 0 : index
    %34 = vector.load %arg4[%c0_13, %c0_14] : memref<5x128xf32, #tpu.memory_space<vmem>>, vector<5x128xf32>
    %35 = vector.extract_strided_slice %34 {offsets = [0, 0], sizes = [1, 128], strides = [1, 1]} : vector<5x128xf32> to vector<1x128xf32>
    %36 = vector.extract_strided_slice %34 {offsets = [1, 0], sizes = [1, 128], strides = [1, 1]} : vector<5x128xf32> to vector<1x128xf32>
    %37 = vector.extract_strided_slice %34 {offsets = [2, 0], sizes = [1, 128], strides = [1, 1]} : vector<5x128xf32> to vector<1x128xf32>
    %38 = vector.extract_strided_slice %34 {offsets = [3, 0], sizes = [1, 128], strides = [1, 1]} : vector<5x128xf32> to vector<1x128xf32>
    %39 = vector.extract_strided_slice %34 {offsets = [4, 0], sizes = [1, 128], strides = [1, 1]} : vector<5x128xf32> to vector<1x128xf32>
    %cst_15 = arith.constant dense<0.000000e+00> : vector<128xf32>
    %40 = vector.multi_reduction <add>, %33, %cst_15 [1] : vector<128x128xf32> to vector<128xf32>
    %41 = vector.shape_cast %40 : vector<128xf32> to vector<128x1xf32>
    %cst_16 = arith.constant 1.280000e+02 : f32
    %42 = vector.broadcast %cst_16 : f32 to vector<128x1xf32>
    %43 = arith.divf %41, %42 : vector<128x1xf32>
    %44 = vector.broadcast %43 : vector<128x1xf32> to vector<128x128xf32>
    %45 = arith.subf %33, %44 : vector<128x128xf32>
    %46 = arith.mulf %45, %45 : vector<128x128xf32>
    %cst_17 = arith.constant dense<0.000000e+00> : vector<128xf32>
    %47 = vector.multi_reduction <add>, %46, %cst_17 [1] : vector<128x128xf32> to vector<128xf32>
    %48 = vector.shape_cast %47 : vector<128xf32> to vector<128x1xf32>
    %cst_18 = arith.constant 1.280000e+02 : f32
    %49 = vector.broadcast %cst_18 : f32 to vector<128x1xf32>
    %50 = arith.divf %48, %49 : vector<128x1xf32>
    %cst_19 = arith.constant 9.99999997E-7 : f32
    %51 = vector.broadcast %cst_19 : f32 to vector<128x1xf32>
    %52 = arith.addf %50, %51 : vector<128x1xf32>
    %53 = math.rsqrt %52 : vector<128x1xf32>
    %54 = vector.broadcast %53 : vector<128x1xf32> to vector<128x128xf32>
    %55 = arith.mulf %45, %54 : vector<128x128xf32>
    %56 = vector.broadcast %35 : vector<1x128xf32> to vector<128x128xf32>
    %57 = arith.mulf %55, %56 : vector<128x128xf32>
    %58 = vector.broadcast %36 : vector<1x128xf32> to vector<128x128xf32>
    %59 = arith.addf %57, %58 : vector<128x128xf32>
    %60 = arith.truncf %59 : vector<128x128xf32> to vector<128x128xbf16>
    %c0_20 = arith.constant 0 : index
    %c0_21 = arith.constant 0 : index
    %61 = vector.load %arg5[%c0_20, %c0_21] : memref<128x128xbf16, #tpu.memory_space<vmem>>, vector<128x128xbf16>
    %cst_22 = arith.constant dense<0.000000e+00> : vector<128x128xf32>
    %62 = tpu.matmul %60, %61, %cst_22 {dimension_numbers = #tpu.dot_dimension_numbers<[1], [0], [0], [1], [0, 0, 1, 1], [], []>} : vector<128x128xbf16>, vector<128x128xbf16>, vector<128x128xf32> -> vector<128x128xf32>
    %63 = vector.broadcast %37 : vector<1x128xf32> to vector<128x128xf32>
    %64 = arith.addf %62, %63 : vector<128x128xf32>
    %cst_23 = arith.constant 0.000000e+00 : f32
    %65 = vector.broadcast %cst_23 : f32 to vector<128x128xf32>
    %66 = arith.maximumf %64, %65 : vector<128x128xf32>
    %cst_24 = arith.constant dense<0.000000e+00> : vector<128xf32>
    %67 = vector.multi_reduction <add>, %66, %cst_24 [1] : vector<128x128xf32> to vector<128xf32>
    %68 = vector.shape_cast %67 : vector<128xf32> to vector<128x1xf32>
    %cst_25 = arith.constant 1.280000e+02 : f32
    %69 = vector.broadcast %cst_25 : f32 to vector<128x1xf32>
    %70 = arith.divf %68, %69 : vector<128x1xf32>
    %71 = vector.broadcast %70 : vector<128x1xf32> to vector<128x128xf32>
    %72 = arith.subf %66, %71 : vector<128x128xf32>
    %73 = arith.mulf %72, %72 : vector<128x128xf32>
    %cst_26 = arith.constant dense<0.000000e+00> : vector<128xf32>
    %74 = vector.multi_reduction <add>, %73, %cst_26 [1] : vector<128x128xf32> to vector<128xf32>
    %75 = vector.shape_cast %74 : vector<128xf32> to vector<128x1xf32>
    %cst_27 = arith.constant 1.280000e+02 : f32
    %76 = vector.broadcast %cst_27 : f32 to vector<128x1xf32>
    %77 = arith.divf %75, %76 : vector<128x1xf32>
    %cst_28 = arith.constant 9.99999997E-7 : f32
    %78 = vector.broadcast %cst_28 : f32 to vector<128x1xf32>
    %79 = arith.addf %77, %78 : vector<128x1xf32>
    %80 = math.rsqrt %79 : vector<128x1xf32>
    %81 = vector.broadcast %80 : vector<128x1xf32> to vector<128x128xf32>
    %82 = arith.mulf %72, %81 : vector<128x128xf32>
    %83 = vector.broadcast %38 : vector<1x128xf32> to vector<128x128xf32>
    %84 = arith.mulf %82, %83 : vector<128x128xf32>
    %85 = vector.broadcast %39 : vector<1x128xf32> to vector<128x128xf32>
    %86 = arith.addf %84, %85 : vector<128x128xf32>
    %c0_29 = arith.constant 0 : index
    %c0_30 = arith.constant 0 : index
    %87 = vector.load %arg6[%c0_29, %c0_30] : memref<1x128xbf16, #tpu.memory_space<vmem>>, vector<1x128xbf16>
    %88 = arith.truncf %86 : vector<128x128xf32> to vector<128x128xbf16>
    %cst_31 = arith.constant dense<0.000000e+00> : vector<1x128xf32>
    %89 = tpu.matmul %87, %88, %cst_31 {dimension_numbers = #tpu.dot_dimension_numbers<[1], [1], [0], [0], [0, 0, 1, 0], [], []>} : vector<1x128xbf16>, vector<128x128xbf16>, vector<1x128xf32> -> vector<1x128xf32>
    %c0_32 = arith.constant 0 : index
    %90 = memref.load %arg7[%c0_32] : memref<1xf32, #tpu.memory_space<smem>>
    %91 = vector.broadcast %90 : f32 to vector<1x128xf32>
    %92 = arith.addf %89, %91 : vector<1x128xf32>
    %c0_33 = arith.constant 0 : index
    %c0_34 = arith.constant 0 : index
    %93 = vector.load %arg8[%c0_33, %c0_34] : memref<1x128xf32, #tpu.memory_space<vmem>>, vector<1x128xf32>
    tpu.vector_store %arg8[%c0_33, %c0_34], %92 {strides = array<i32>} : memref<1x128xf32, #tpu.memory_space<vmem>>, vector<1x128xf32>,
    return
  }
  func.func @transform_0(%arg0: i32) -> (i32, i32) {
    %c0_i32 = arith.constant 0 : i32
    %c0_i32_0 = arith.constant 0 : i32
    %c0_i32_1 = arith.constant 0 : i32
    return %c0_i32, %c0_i32_0 : i32, i32
  }
  func.func @transform_1(%arg0: i32) -> (i32, i32) {
    %c0_i32 = arith.constant 0 : i32
    %c0_i32_0 = arith.constant 0 : i32
    %c0_i32_1 = arith.constant 0 : i32
    return %c0_i32, %c0_i32_0 : i32, i32
  }
  func.func @transform_2(%arg0: i32) -> (i32, i32) {
    %c0_i32 = arith.constant 0 : i32
    %c0_i32_0 = arith.constant 0 : i32
    %c0_i32_1 = arith.constant 0 : i32
    return %c0_i32, %c0_i32_0 : i32, i32
  }
  func.func @transform_3(%arg0: i32) -> (i32, i32) {
    %c0_i32 = arith.constant 0 : i32
    %c0_i32_0 = arith.constant 0 : i32
    %c0_i32_1 = arith.constant 0 : i32
    return %c0_i32, %c0_i32_0 : i32, i32
  }
  func.func @transform_4(%arg0: i32) -> (i32, i32) {
    %c0_i32 = arith.constant 0 : i32
    %c0_i32_0 = arith.constant 0 : i32
    %c0_i32_1 = arith.constant 0 : i32
    return %c0_i32, %c0_i32_0 : i32, i32
  }
  func.func @transform_5(%arg0: i32) -> (i32, i32) {
    %c0_i32 = arith.constant 0 : i32
    %c0_i32_0 = arith.constant 0 : i32
    %c0_i32_1 = arith.constant 0 : i32
    return %c0_i32, %c0_i32_0 : i32, i32
  }
  func.func @transform_6(%arg0: i32) -> i32 {
    %c0_i32 = arith.constant 0 : i32
    %c0_i32_0 = arith.constant 0 : i32
    return %c0_i32 : i32
  }
  func.func @transform_7(%arg0: i32) -> (i32, i32) {
    %c0_i32 = arith.constant 0 : i32
    %c0_i32_0 = arith.constant 0 : i32
    return %c0_i32, %arg0 : i32, i32
  }
  func.func @transform_8(%arg0: i32) -> (i32, i32) {
    %c0_i32 = arith.constant 0 : i32
    %c0_i32_0 = arith.constant 0 : i32
    return %arg0, %c0_i32 : i32, i32
  }
}

</mosaic_0001>

<bundles_post_ra>
// kernel: tpu_custom_call.1
= control target key start
LH: loop header
LB: loop body
LE: loop exit
PB: predicated region body
PF: predicated region fallthrough
CT: control target
= control target key end

     0   :  { %s5327_s0 = inlined_call_operand.hbm [shape: f32[256,128], index: 0, kind: input, shape index: {}]   ;;  %s5328_s1 = inlined_call_operand.hbm [shape: bf16[128,384], index: 1, kind: input, shape index: {}]   ;;  %s5329_s2 = inlined_call_operand.hbm [shape: bf16[128,128], index: 2, kind: input, shape index: {}]   ;;  %s5330_s3 = inlined_call_operand.hbm [shape: f32[5,128], index: 3, kind: input, shape index: {}]   ;;  %s5331_s4 = inlined_call_operand.hbm [shape: bf16[128,128], index: 4, kind: input, shape index: {}]   ;;  %s5332_s5 = inlined_call_operand.vmem [shape: bf16[1,128], index: 5, kind: input, shape index: {}]   ;;  %s5333_s6 = inlined_call_operand.<no memory space> [shape: f32[1], index: 6, kind: input, shape index: {}]   ;;  %s5334_s7 = inlined_call_operand.hbm [shape: f32[1,256], index: 7, kind: output, shape index: {0}]   ;;  %s5335_s8 = inlined_call_operand.hbm [shape: bf16[256,256], index: 8, kind: output, shape index: {1}]  }
   0x1   :  { %5336 = sst [smem:[#allocation22_spill]] %s5328_s1 }
   0x2   :  { %5337 = sst [smem:[#allocation23_spill]] %s5330_s3 }
   0x3   :  { %14 = sst [smem:[#allocation3]] %s5333_s6 }
   0x4   :  { %15 = vsyncpa [#allocation5], 0 }
   0x5   :  { %16 = vsyncpa [#allocation8], 0 }
   0x6   :  { %17 = vsyncpa [#allocation11], 0 }
   0x7   :  { %18 = vsyncpa [#allocation6], 0 }
   0x8   :  { %20 = vsyncpa [#allocation6 + $0x1], 0 }
   0x9   :  { %21 = vsyncpa [#allocation15], 0 }
   0xa   :  { %23 = vsyncpa [#allocation15 + $0x1], 0  ;;  %s4133_s29 = smov 0   ;;  %s4135_s30 = smov 0  }
   0xb   :  { %s4137_s9 = smov 0   ;;  %s4139_s10 = smov 0  }
   0xc LB: > { %s4154_s6 = sadd.s32 4294967295, %s4069_s10   ;;  %s3089_s11 = sadd.s32 4294967294, %s4069_s10   ;;  %s4069_s10 = sphi %s4139_s10, %s5363_s10   ;;  %s4065_s9 = sphi %s4137_s9, %s5362_s9   ;;  %s4061_s30 = sphi %s4135_s30, %s5361_s30   ;;  %s4057_s29 = sphi %s4133_s29, %s5360_s29  }
   0xd   : > { %s4158_s12 = sadd.s32 1, %s4069_s10   ;;  %s183_s13 = sadd.s32 1, %s4065_s9 }
   0xe   : > { %s180_s14 = ssub.s32 %s4069_s10, %s4158_s12  ;;  %p193_p0 = scmp.ne.s32.totalorder %s4065_s9, %s4061_s30 }
   0xf   : > { %p181_p1 = scmp.eq.s32.totalorder %s180_s14, 0  ;;  %p194_p2 = scmp.eq.s32.totalorder %s4154_s6, 1 }
  0x10   : > { %p199_p3 = scmp.ne.s32.totalorder %s4061_s30, %s4057_s29  ;;  %p200_p4 = scmp.eq.s32.totalorder %s3089_s11, 1 }
  0x11   : > { %s4169_s15 = scalar_select %p181_p1, %s4065_s9, %s183_s13  }
  0x12   : > { %p4171_p5 = por %p194_p2, %p193_p0  ;;  %p4175_p6 = por %p200_p4, %p199_p3 }
  0x13   : > { %5338 = sst [smem:[#allocation21_spill]] %s4169_s15  ;;  %p3090_p7 = scmp.ge.s32.totalorder %s4069_s10, 1 }
  0x14   : > { %p233_p8 = scmp.lt.s32.totalorder %s4069_s10, 3  ;;  %p3091_p9 = scmp.ne.s32.totalorder %s4154_s6, 0 }
  0x15   : > { %p3594_p10 = scmp.eq.s32.totalorder %s4154_s6, 0  ;;  %s5342_s1 = sld [smem:[#allocation22_spill]] }
  0x16   : > { %p4183_p11 = pnand %p3090_p7, %p233_p8  ;;  %s4071_s22 = smov [#allocation7]  }
  0x17   : > { %s260_s23 = sshll.u32 %s4071_s22, 4  ;;  %s5344_s3 = sld [smem:[#allocation23_spill]]  ;;  %s261_s23 = int_to_ptr.vmem [resolvable:$true] %s260_s23 }
  0x18   : > { %p3571_p12 = pneg %p4183_p11  ;;  %s4072_s28 = smov 192  }
  0x19   : > { %s4073_s11 = smov 12   ;;  %s4074_s13 = smov [#allocation10]  }
  0x1a   : > { %p4194_p13 = pnand %p3594_p10, %p3571_p12  ;;  %s289_s14 = sshll.u32 %s4074_s13, 4  ;;  %s290_s14 = int_to_ptr.vmem [resolvable:$true] %s289_s14 }
  0x1b   : > { %s258_s21 = sshll.u32 %s5342_s1, 4  ;;  %s244_s22 = sshll.u32 %s5327_s0, 4  ;;  %s259_s21 = int_to_ptr.hbm [resolvable:$true] %s258_s21  ;;  %s245_s22 = int_to_ptr.hbm [resolvable:$true] %s244_s22 }
  0x1c   : > { %3577 = dma.hbm_to_vmem [thread:$0]  (!%p4194_p13), %s259_s21, 3072, %s261_s23, [#allocation8], %s4072_s28, %s4072_s28, %s4073_s11  }
  0x1d   : > { %s287_s27 = sshll.u32 %s5344_s3, 4  ;;  %s4075_s25 = smov [#allocation4]   ;;  %s288_s27 = int_to_ptr.hbm [resolvable:$true] %s287_s27 }
  0x1e   : > { %3583 = dma.hbm_to_vmem [thread:$0]  (!%p4194_p13), %s288_s27, 128, %s290_s14, [#allocation11]  }
  0x1f   : > { %s246_s26 = sshll.u32 %s4075_s25, 4  ;;  %s272_s15 = sshll.u32 %s5329_s2, 4  ;;  %s247_s26 = int_to_ptr.vmem [resolvable:$true] %s246_s26  ;;  %s273_s15 = int_to_ptr.hbm [resolvable:$true] %s272_s15 }
  0x20   : > { %s4076_s21 = smov 128   ;;  %s4077_s23 = smov 8  }
  0x21   : > { %3574 = dma.hbm_to_vmem [thread:$0]  (!%p4194_p13), %s245_s22, 4096, %s247_s26, [#allocation5], %s4076_s21, %s4076_s21, %s4077_s23  }
  0x22   : > { %s4078_s28 = smov [#allocation9]   ;;  %s4079_s13 = smov 64  }
  0x23   : > { %s274_s11 = sshll.u32 %s4078_s28, 4  ;;  %s4080_s19 = smov 4   ;;  %s275_s11 = int_to_ptr.vmem [resolvable:$true] %s274_s11 }
  0x24   : > { %3580 = dma.hbm_to_vmem [thread:$0]  (!%p4194_p13), %s273_s15, 1024, %s275_s11, [#allocation8], %s4079_s13, %s4079_s13, %s4080_s19  }
  0x25   : > { %s298_s20 = sshll.u32 %s5331_s4, 4  ;;  %s4081_s1 = smov [#allocation12]   ;;  %s299_s20 = int_to_ptr.hbm [resolvable:$true] %s298_s20 }
  0x26   : > { %s300_s3 = sshll.u32 %s4081_s1, 4  ;;  %322 = sbr.rel (%p4183_p11) target bundleno = 2433 (0x981), region = 48  ;;  %s301_s3 = int_to_ptr.vmem [resolvable:$true] %s300_s3 }
  0x27   : > { %3586 = dma.hbm_to_vmem [thread:$0]  (!%p4194_p13), %s299_s20, 1024, %s301_s3, [#allocation11], %s4079_s13, %s4079_s13, %s4080_s19  }
  0x2b   : > { %4036 = dma.done.wait (%p3594_p10), [#allocation5], 4096  }
  0x2c   : > { %4038 = vsyncadd (%p3594_p10), [#allocation5], 4294963200 }
  0x2d   : > { %4040 = dma.done.wait (%p3594_p10), [#allocation8], 4096  }
  0x2e   : > { %4042 = vsyncadd (%p3594_p10), [#allocation8], 4294963200 }
  0x2f   : > { %4044 = dma.done.wait (%p3594_p10), [#allocation11], 1152  }
  0x30   : > { %4046 = vsyncadd (%p3594_p10), [#allocation11], 4294966144  ;;  %s4235_s15 = sand.u32 1, %s4061_s30   ;;  %380 = sbr.rel (%p3091_p9) target bundleno = 408 (0x198), region = 72 }
  0x31   : > { %s3102_s18 = sshll.u32 %s4235_s15, 7  ;;  %s368_s24 = scalar_lea.vmem [#allocation13], %s4235_s15 }
  0x32   : > { %s4239_s22 = scalar_lea.vmem [#allocation14], %s3102_s18 }
  0x35   : > { %v3190_v0 = vld [vmem:[#allocation7 + $0xa8] sm:$0xf]  ;;  %v3454_v1 = vld [vmem:[#allocation7 + $0xb0] sm:$0xf0]  ;;  %v3453_v2 = vld [vmem:[#allocation7 + $0xac] sm:$0xf] }
  0x36   : > { %v3191_v3 = vor.u32 %v3454_v1, %v3190_v0  ;;  %v3192_v4 = vld [vmem:[#allocation7 + $0xb4] sm:$0xf0]  ;;  %v3198_v5 = vld [vmem:[#allocation7 + $0xb0] sm:$0xf]  ;;  %v3455_v6 = vld [vmem:[#allocation7 + $0xb8] sm:$0xf0] }
  0x37   : > { %v4243_v7 = vor.u32 %v3453_v2, %v3192_v4  ;;  %v4245_v8 = vor.u32 %v3455_v6, %v3198_v5  ;;  %v3178_v9 = vld [vmem:[#allocation7 + $0x90] sm:$0xf]  ;;  %v3451_v10 = vld [vmem:[#allocation7 + $0x98] sm:$0xf0]  ;;  %v3450_v11 = vld [vmem:[#allocation7 + $0x94] sm:$0xf] }
  0x38   : > { %589 = vmatpush.bf16.msra.mxu0 %v3191_v3  ;;  %3515 = vmatpush.bf16.msra.mxu3 %v3191_v3  ;;  %v3179_v12 = vor.u32 %v3451_v10, %v3178_v9  ;;  %v3180_v13 = vld [vmem:[#allocation7 + $0x9c] sm:$0xf0]  ;;  %v3186_v14 = vld [vmem:[#allocation7 + $0x98] sm:$0xf]  ;;  %v3452_v15 = vld [vmem:[#allocation7 + $0xa0] sm:$0xf0] }
  0x39   : > { %678 = vmatpush.bf16.msra.mxu1 %v4243_v7  ;;  %767 = vmatpush.bf16.msra.mxu2 %v4245_v8  ;;  %v4249_v16 = vor.u32 %v3450_v11, %v3180_v13  ;;  %v4251_v17 = vor.u32 %v3452_v15, %v3186_v14  ;;  %v3166_v18 = vld [vmem:[#allocation7 + $0x78] sm:$0xf]  ;;  %v3448_v19 = vld [vmem:[#allocation7 + $0x80] sm:$0xf0]  ;;  %v3447_v20 = vld [vmem:[#allocation7 + $0x7c] sm:$0xf] }
  0x3a   : > { %v3168_v21 = vld [vmem:[#allocation7 + $0x84] sm:$0xf0]  ;;  %v3174_v22 = vld [vmem:[#allocation7 + $0x80] sm:$0xf]  ;;  %v3449_v23 = vld [vmem:[#allocation7 + $0x88] sm:$0xf0]  ;;  %v3167_v24 = vor.u32 %v3448_v19, %v3166_v18 }
  0x3b   : > { %v4255_v25 = vor.u32 %v3447_v20, %v3168_v21  ;;  %v4257_v26 = vor.u32 %v3449_v23, %v3174_v22  ;;  %v3154_v27 = vld [vmem:[#allocation7 + $0x60] sm:$0xf]  ;;  %v3445_v28 = vld [vmem:[#allocation7 + $0x68] sm:$0xf0]  ;;  %v3444_v29 = vld [vmem:[#allocation7 + $0x64] sm:$0xf] }
  0x3c   : > { %590 = vmatpush.bf16.msra.mxu0 %v3179_v12  ;;  %3516 = vmatpush.bf16.msra.mxu3 %v3179_v12  ;;  %v3156_v30 = vld [vmem:[#allocation7 + $0x6c] sm:$0xf0]  ;;  %v3162_v31 = vld [vmem:[#allocation7 + $0x68] sm:$0xf]  ;;  %v3446_v32 = vld [vmem:[#allocation7 + $0x70] sm:$0xf0]  ;;  %v3155_v33 = vor.u32 %v3445_v28, %v3154_v27 }
  0x3d   : > { %679 = vmatpush.bf16.msra.mxu1 %v4249_v16  ;;  %768 = vmatpush.bf16.msra.mxu2 %v4251_v17  ;;  %v4261_v34 = vor.u32 %v3444_v29, %v3156_v30  ;;  %v4263_v35 = vor.u32 %v3446_v32, %v3162_v31  ;;  %v3142_v36 = vld [vmem:[#allocation7 + $0x48] sm:$0xf]  ;;  %v3442_v37 = vld [vmem:[#allocation7 + $0x50] sm:$0xf0]  ;;  %v3441_v38 = vld [vmem:[#allocation7 + $0x4c] sm:$0xf] }
  0x3e   : > { %v3144_v39 = vld [vmem:[#allocation7 + $0x54] sm:$0xf0]  ;;  %v3150_v40 = vld [vmem:[#allocation7 + $0x50] sm:$0xf]  ;;  %v3443_v41 = vld [vmem:[#allocation7 + $0x58] sm:$0xf0]  ;;  %v3143_v42 = vor.u32 %v3442_v37, %v3142_v36 }
  0x3f   : > { %v4267_v43 = vor.u32 %v3441_v38, %v3144_v39  ;;  %v4269_v44 = vor.u32 %v3443_v41, %v3150_v40  ;;  %v3130_v45 = vld [vmem:[#allocation7 + $0x30] sm:$0xf]  ;;  %v3439_v46 = vld [vmem:[#allocation7 + $0x38] sm:$0xf0]  ;;  %v3438_v47 = vld [vmem:[#allocation7 + $0x34] sm:$0xf] }
  0x40   : > { %591 = vmatpush.bf16.msra.mxu0 %v3167_v24  ;;  %3517 = vmatpush.bf16.msra.mxu3 %v3167_v24  ;;  %v3132_v48 = vld [vmem:[#allocation7 + $0x3c] sm:$0xf0]  ;;  %v3138_v49 = vld [vmem:[#allocation7 + $0x38] sm:$0xf]  ;;  %v3440_v50 = vld [vmem:[#allocation7 + $0x40] sm:$0xf0]  ;;  %v3131_v51 = vor.u32 %v3439_v46, %v3130_v45 }
  0x41   : > { %680 = vmatpush.bf16.msra.mxu1 %v4255_v25  ;;  %769 = vmatpush.bf16.msra.mxu2 %v4257_v26  ;;  %v3135_v52 = vor.u32 %v3438_v47, %v3132_v48  ;;  %v4273_v53 = vor.u32 %v3440_v50, %v3138_v49  ;;  %v3118_v54 = vld [vmem:[#allocation7 + $0x18] sm:$0xf]  ;;  %v3436_v55 = vld [vmem:[#allocation7 + $0x20] sm:$0xf0]  ;;  %v3435_v56 = vld [vmem:[#allocation7 + $0x1c] sm:$0xf] }
  0x42   : > { %v3120_v57 = vld [vmem:[#allocation7 + $0x24] sm:$0xf0]  ;;  %v3126_v58 = vld [vmem:[#allocation7 + $0x20] sm:$0xf]  ;;  %v3437_v59 = vld [vmem:[#allocation7 + $0x28] sm:$0xf0]  ;;  %v3119_v60 = vor.u32 %v3436_v55, %v3118_v54 }
  0x43   : > { %v3123_v61 = vor.u32 %v3435_v56, %v3120_v57  ;;  %v4276_v62 = vor.u32 %v3437_v59, %v3126_v58  ;;  %v3106_v63 = vld [vmem:[#allocation7] sm:$0xf]  ;;  %v3433_v0 = vld [vmem:[#allocation7 + $0x8] sm:$0xf0]  ;;  %v3432_v1 = vld [vmem:[#allocation7 + $0x4] sm:$0xf] }
  0x44   : > { %592 = vmatpush.bf16.msra.mxu0 %v3155_v33  ;;  %3518 = vmatpush.bf16.msra.mxu3 %v3155_v33  ;;  %v3108_v2 = vld [vmem:[#allocation7 + $0xc] sm:$0xf0]  ;;  %v3114_v3 = vld [vmem:[#allocation7 + $0x8] sm:$0xf]  ;;  %v3434_v4 = vld [vmem:[#allocation7 + $0x10] sm:$0xf0]  ;;  %v3107_v6 = vor.u32 %v3433_v0, %v3106_v63 }
  0x45   : > { %681 = vmatpush.bf16.msra.mxu1 %v4261_v34  ;;  %770 = vmatpush.bf16.msra.mxu2 %v4263_v35  ;;  %v381_v5 = vld [vmem:[#allocation4] sm:$0xff]  ;;  %v382_v9 = vld [vmem:[#allocation4 + $0x8] sm:$0xff]  ;;  %v3111_v12 = vor.u32 %v3432_v1, %v3108_v2  ;;  %v3115_v13 = vor.u32 %v3434_v4, %v3114_v3  ;;  %v383_v18 = vld [vmem:[#allocation4 + $0x10] sm:$0xff] }
  0x46   : > { %v405_v10 = vld [vmem:[#allocation4 + $0xc0] sm:$0xff]  ;;  %v406_v11 = vld [vmem:[#allocation4 + $0xc8] sm:$0xff]  ;;  %v413_v14 = vpack.c.bf16 %v382_v9, %v381_v5  ;;  %v384_v19 = vld [vmem:[#allocation4 + $0x18] sm:$0xff] }
  0x47   : > { %v4279_v15 = vpack.c.bf16 %v406_v11, %v405_v10  ;;  %v407_v20 = vld [vmem:[#allocation4 + $0xd0] sm:$0xff]  ;;  %v408_v21 = vld [vmem:[#allocation4 + $0xd8] sm:$0xff]  ;;  %v414_v22 = vpack.c.bf16 %v384_v19, %v383_v18  ;;  %v409_v24 = vld [vmem:[#allocation4 + $0xe0] sm:$0xff] }
  0x48   : > { %593 = vmatpush.bf16.msra.mxu0 %v3143_v42  ;;  %3519 = vmatpush.bf16.msra.mxu3 %v3143_v42  ;;  %v4286_v23 = vpack.c.bf16 %v408_v21, %v407_v20  ;;  %v387_v29 = vld [vmem:[#allocation4 + $0x30] sm:$0xff]  ;;  %v388_v30 = vld [vmem:[#allocation4 + $0x38] sm:$0xff]  ;;  %v393_v38 = vld [vmem:[#allocation4 + $0x60] sm:$0xff] }
  0x49   : > { %682 = vmatpush.bf16.msra.mxu1 %v4267_v43  ;;  %771 = vmatpush.bf16.msra.mxu2 %v4269_v44  ;;  %v411_v31 = vld [vmem:[#allocation4 + $0xf0] sm:$0xff]  ;;  %v412_v32 = vld [vmem:[#allocation4 + $0xf8] sm:$0xff]  ;;  %v416_v33 = vpack.c.bf16 %v388_v30, %v387_v29  ;;  %v394_v39 = vld [vmem:[#allocation4 + $0x68] sm:$0xff] }
  0x4a   : > { %v392_v36 = vld [vmem:[#allocation4 + $0x58] sm:$0xff]  ;;  %v419_v40 = vpack.c.bf16 %v394_v39, %v393_v38  ;;  %v395_v41 = vld [vmem:[#allocation4 + $0x70] sm:$0xff]  ;;  %v398_v45 = vld [vmem:[#allocation4 + $0x88] sm:$0xff] }
  0x4b   : > { %v396_v42 = vld [vmem:[#allocation4 + $0x78] sm:$0xff]  ;;  %v399_v56 = vld [vmem:[#allocation4 + $0x90] sm:$0xff]  ;;  %v401_v9 = vld [vmem:[#allocation4 + $0xa0] sm:$0xff] }
  0x4c   : > { %594 = vmatpush.bf16.msra.mxu0 %v3131_v51  ;;  %3520 = vmatpush.bf16.msra.mxu3 %v3131_v51  ;;  %v400_v57 = vld [vmem:[#allocation4 + $0x98] sm:$0xff]  ;;  %v402_v10 = vld [vmem:[#allocation4 + $0xa8] sm:$0xff] }
  0x4d   : > { %683 = vmatpush.bf16.msra.mxu1 %v3135_v52  ;;  %772 = vmatpush.bf16.msra.mxu2 %v4273_v53 }
  0x50   : > { %595 = vmatpush.bf16.msra.mxu0 %v3119_v60  ;;  %3521 = vmatpush.bf16.msra.mxu3 %v3119_v60  ;;  %v422_v60 = vpack.c.bf16 %v400_v57, %v399_v56 }
  0x51   : > { %684 = vmatpush.bf16.msra.mxu1 %v3123_v61  ;;  %773 = vmatpush.bf16.msra.mxu2 %v4276_v62 }
  0x54   : > { %596 = vmatpush.bf16.msra.mxu0 %v3107_v6  ;;  %3522 = vmatpush.bf16.msra.mxu3 %v3107_v6 }
  0x55   : > { %685 = vmatpush.bf16.msra.mxu1 %v3111_v12  ;;  %774 = vmatpush.bf16.msra.mxu2 %v3115_v13 }
  0x57   : > { %597 = vmatmul.bf16.vlgmr.msra.gmra.mxu0 %v413_v14  ;;  %657 = vmatmul.bf16.vlgmr.msra.gmra.mxu3 %v4279_v15 }
  0x58   : > { %3523 = vmatpush.bf16.msrb.mxu3 %v4243_v7  ;;  %686 = vmatmul.bf16.vlgmr.msra.gmra.mxu1 %v413_v14  ;;  %v385_v7 = vld [vmem:[#allocation4 + $0x20] sm:$0xff] }
  0x59   : > { %775 = vmatmul.bf16.vlgmr.msra.gmra.mxu2 %v413_v14 }
  0x5c   : > { %3524 = vmatpush.bf16.msrb.mxu3 %v4249_v16  ;;  %v386_v16 = vld [vmem:[#allocation4 + $0x28] sm:$0xff] }
  0x5d   : > { %v415_v27 = vpack.c.bf16 %v386_v16, %v385_v7 }
  0x60   : > { %3525 = vmatpush.bf16.msrb.mxu3 %v4255_v25  ;;  %v410_v25 = vld [vmem:[#allocation4 + $0xe8] sm:$0xff] }
  0x61   : > { %v4290_v28 = vpack.c.bf16 %v410_v25, %v409_v24  ;;  %v403_v24 = vld [vmem:[#allocation4 + $0xb0] sm:$0xff]  ;;  %v404_v25 = vld [vmem:[#allocation4 + $0xb8] sm:$0xff] }
  0x62   : > { %v424_v30 = vpack.c.bf16 %v404_v25, %v403_v24 }
  0x64   : > { %3526 = vmatpush.bf16.msrb.mxu3 %v4261_v34  ;;  %v4297_v34 = vpack.c.bf16 %v412_v32, %v411_v31 }
  0x67   : > { %602 = vmatmul.bf16.gmra.mxu0 %v414_v22  ;;  %662 = vmatmul.bf16.gmra.mxu3 %v4286_v23 }
  0x68   : > { %3527 = vmatpush.bf16.msrb.mxu3 %v4267_v43  ;;  %691 = vmatmul.bf16.gmra.mxu1 %v414_v22  ;;  %v420_v43 = vpack.c.bf16 %v396_v42, %v395_v41 }
  0x69   : > { %780 = vmatmul.bf16.gmra.mxu2 %v414_v22 }
  0x6c   : > { %3528 = vmatpush.bf16.msrb.mxu3 %v3135_v52 }
  0x70   : > { %3529 = vmatpush.bf16.msrb.mxu3 %v3123_v61 }
  0x74   : > { %3530 = vmatpush.bf16.msrb.mxu3 %v3111_v12 }
  0x77   : > { %607 = vmatmul.bf16.gmra.mxu0 %v415_v27  ;;  %667 = vmatmul.bf16.gmra.mxu3 %v4290_v28 }
  0x78   : > { %3531 = vmatpush.bf16.msra.mxu3 %v4245_v8  ;;  %696 = vmatmul.bf16.gmra.mxu1 %v415_v27  ;;  %v389_v8 = vld [vmem:[#allocation4 + $0x40] sm:$0xff] }
  0x79   : > { %785 = vmatmul.bf16.gmra.mxu2 %v415_v27 }
  0x7c   : > { %3532 = vmatpush.bf16.msra.mxu3 %v4251_v17  ;;  %v390_v17 = vld [vmem:[#allocation4 + $0x48] sm:$0xff] }
  0x80   : > { %3533 = vmatpush.bf16.msra.mxu3 %v4257_v26  ;;  %v417_v26 = vpack.c.bf16 %v390_v17, %v389_v8 }
  0x84   : > { %3534 = vmatpush.bf16.msra.mxu3 %v4263_v35  ;;  %v391_v35 = vld [vmem:[#allocation4 + $0x50] sm:$0xff] }
  0x85   : > { %v418_v37 = vpack.c.bf16 %v392_v36, %v391_v35 }
  0x87   : > { %612 = vmatmul.bf16.gmra.mxu0 %v416_v33  ;;  %672 = vmatmul.bf16.gmra.mxu3 %v4297_v34 }
  0x88   : > { %3535 = vmatpush.bf16.msra.mxu3 %v4269_v44  ;;  %701 = vmatmul.bf16.gmra.mxu1 %v416_v33  ;;  %v397_v44 = vld [vmem:[#allocation4 + $0x80] sm:$0xff] }
  0x89   : > { %790 = vmatmul.bf16.gmra.mxu2 %v416_v33  ;;  %v421_v46 = vpack.c.bf16 %v398_v45, %v397_v44 }
  0x8c   : > { %3536 = vmatpush.bf16.msra.mxu3 %v4273_v53 }
  0x90   : > { %3537 = vmatpush.bf16.msra.mxu3 %v4276_v62 }
  0x94   : > { %3538 = vmatpush.bf16.msra.mxu3 %v3115_v13  ;;  %v423_v13 = vpack.c.bf16 %v402_v10, %v401_v9 }
  0x97   : > { %617 = vmatmul.bf16.gmra.mxu0 %v417_v26  ;;  %746 = vmatmul.bf16.vlgmr.msrb.gmra.mxu3 %v4279_v15 }
  0x98   : > { %706 = vmatmul.bf16.gmra.mxu1 %v417_v26 }
  0x99   : > { %795 = vmatmul.bf16.gmra.mxu2 %v417_v26 }
  0xa7   : > { %622 = vmatmul.bf16.gmra.mxu0 %v418_v37  ;;  %751 = vmatmul.bf16.gmra.mxu3 %v4286_v23 }
  0xa8   : > { %711 = vmatmul.bf16.gmra.mxu1 %v418_v37 }
  0xa9   : > { %800 = vmatmul.bf16.gmra.mxu2 %v418_v37 }
  0xb7   : > { %627 = vmatmul.bf16.gmra.mxu0 %v419_v40  ;;  %756 = vmatmul.bf16.gmra.mxu3 %v4290_v28 }
  0xb8   : > { %716 = vmatmul.bf16.gmra.mxu1 %v419_v40 }
  0xb9   : > { %805 = vmatmul.bf16.gmra.mxu2 %v419_v40 }
  0xc7   : > { %632 = vmatmul.bf16.gmra.mxu0 %v420_v43  ;;  %761 = vmatmul.bf16.gmra.mxu3 %v4297_v34 }
  0xc8   : > { %721 = vmatmul.bf16.gmra.mxu1 %v420_v43 }
  0xc9   : > { %810 = vmatmul.bf16.gmra.mxu2 %v420_v43 }
  0xd4   : > { %v598_v47 = vpop.f32.mrf.mxu0 }
  0xd5   : > { %v687_v48 = vpop.f32.mrf.mxu1 }
  0xd6   : > { %v856_v49 = vpack.c.bf16 %v687_v48, %v598_v47 }
  0xd7   : > { %637 = vmatmul.bf16.gmra.mxu0 %v421_v46  ;;  %835 = vmatmul.bf16.vlgmr.msra.gmra.mxu3 %v4279_v15 }
  0xd8   : > { %920 = vst [vmem:[#allocation2] sm:$0xff] %v856_v49  ;;  %726 = vmatmul.bf16.gmra.mxu1 %v421_v46 }
  0xd9   : > { %815 = vmatmul.bf16.gmra.mxu2 %v421_v46 }
  0xda   : > { %v4308_v50 = vpop.f32.mrf.mxu3 }
  0xdc   : > { %v776_v51 = vpop.f32.mrf.mxu2  ;;  %v600_v53 = vpop.f32.mrf.mxu0 }
  0xdd   : > { %v857_v52 = vpack.c.bf16 %v776_v51, %v776_v51  ;;  %v689_v54 = vpop.f32.mrf.mxu1 }
  0xde   : > { %v858_v55 = vpack.c.bf16 %v689_v54, %v600_v53 }
  0xdf   : > { %921 = vst [vmem:[#allocation2 + $0x8] sm:$0xf] %v857_v52 }
  0xe0   : > { %922 = vst [vmem:[#allocation2 + $0xc] sm:$0xff] %v858_v55 }
  0xe2   : > { %v4310_v58 = vpop.f32.mrf.mxu3 }
  0xe4   : > { %v778_v59 = vpop.f32.mrf.mxu2  ;;  %v603_v62 = vpop.f32.mrf.mxu0 }
  0xe5   : > { %v859_v61 = vpack.c.bf16 %v778_v59, %v778_v59  ;;  %v692_v63 = vpop.f32.mrf.mxu1 }
  0xe6   : > { %v860_v0 = vpack.c.bf16 %v692_v63, %v603_v62 }
  0xe7   : > { %923 = vst [vmem:[#allocation2 + $0x14] sm:$0xf] %v859_v61  ;;  %642 = vmatmul.bf16.gmra.mxu0 %v422_v60  ;;  %840 = vmatmul.bf16.gmra.mxu3 %v4286_v23 }
  0xe8   : > { %924 = vst [vmem:[#allocation2 + $0x18] sm:$0xff] %v860_v0  ;;  %731 = vmatmul.bf16.gmra.mxu1 %v422_v60 }
  0xe9   : > { %820 = vmatmul.bf16.gmra.mxu2 %v422_v60 }
  0xea   : > { %v4313_v1 = vpop.f32.mrf.mxu3 }
  0xec   : > { %v781_v2 = vpop.f32.mrf.mxu2  ;;  %v605_v4 = vpop.f32.mrf.mxu0 }
  0xed   : > { %v861_v3 = vpack.c.bf16 %v781_v2, %v781_v2  ;;  %v694_v5 = vpop.f32.mrf.mxu1 }
  0xee   : > { %v862_v6 = vpack.c.bf16 %v694_v5, %v605_v4 }
  0xef   : > { %925 = vst [vmem:[#allocation2 + $0x20] sm:$0xf] %v861_v3 }
  0xf0   : > { %926 = vst [vmem:[#allocation2 + $0x24] sm:$0xff] %v862_v6 }
  0xf2   : > { %v4315_v11 = vpop.f32.mrf.mxu3 }
  0xf4   : > { %v783_v12 = vpop.f32.mrf.mxu2  ;;  %v608_v15 = vpop.f32.mrf.mxu0 }
  0xf5   : > { %v863_v14 = vpack.c.bf16 %v783_v12, %v783_v12  ;;  %v697_v18 = vpop.f32.mrf.mxu1 }
  0xf6   : > { %v864_v19 = vpack.c.bf16 %v697_v18, %v608_v15 }
  0xf7   : > { %927 = vst [vmem:[#allocation2 + $0x2c] sm:$0xf] %v863_v14  ;;  %647 = vmatmul.bf16.gmra.mxu0 %v423_v13  ;;  %845 = vmatmul.bf16.gmra.mxu3 %v4290_v28 }
  0xf8   : > { %928 = vst [vmem:[#allocation2 + $0x30] sm:$0xff] %v864_v19  ;;  %736 = vmatmul.bf16.gmra.mxu1 %v423_v13 }
  0xf9   : > { %825 = vmatmul.bf16.gmra.mxu2 %v423_v13 }
  0xfa   : > { %v4318_v20 = vpop.f32.mrf.mxu3 }
  0xfc   : > { %v786_v21 = vpop.f32.mrf.mxu2  ;;  %v610_v23 = vpop.f32.mrf.mxu0 }
  0xfd   : > { %v865_v22 = vpack.c.bf16 %v786_v21, %v786_v21  ;;  %v699_v7 = vpop.f32.mrf.mxu1 }
  0xfe   : > { %v866_v16 = vpack.c.bf16 %v699_v7, %v610_v23 }
  0xff   : > { %929 = vst [vmem:[#allocation2 + $0x38] sm:$0xf] %v865_v22 }
 0x100   : > { %930 = vst [vmem:[#allocation2 + $0x3c] sm:$0xff] %v866_v16 }
 0x102   : > { %v4320_v27 = vpop.f32.mrf.mxu3 }
 0x104   : > { %v788_v29 = vpop.f32.mrf.mxu2  ;;  %v613_v28 = vpop.f32.mrf.mxu0 }
 0x105   : > { %v867_v31 = vpack.c.bf16 %v788_v29, %v788_v29  ;;  %v702_v32 = vpop.f32.mrf.mxu1 }
 0x106   : > { %v868_v33 = vpack.c.bf16 %v702_v32, %v613_v28 }
 0x107   : > { %931 = vst [vmem:[#allocation2 + $0x44] sm:$0xf] %v867_v31  ;;  %652 = vmatmul.bf16.gmra.mxu0 %v424_v30  ;;  %850 = vmatmul.bf16.gmra.mxu3 %v4297_v34 }
 0x108   : > { %932 = vst [vmem:[#allocation2 + $0x48] sm:$0xff] %v868_v33  ;;  %741 = vmatmul.bf16.gmra.mxu1 %v424_v30 }
 0x109   : > { %830 = vmatmul.bf16.gmra.mxu2 %v424_v30 }
 0x10a   : > { %v4323_v8 = vpop.f32.mrf.mxu3 }
 0x10c   : > { %v791_v17 = vpop.f32.mrf.mxu2  ;;  %v615_v35 = vpop.f32.mrf.mxu0 }
 0x10d   : > { %v869_v26 = vpack.c.bf16 %v791_v17, %v791_v17  ;;  %v704_v36 = vpop.f32.mrf.mxu1 }
 0x10e   : > { %v870_v37 = vpack.c.bf16 %v704_v36, %v615_v35 }
 0x10f   : > { %933 = vst [vmem:[#allocation2 + $0x50] sm:$0xf] %v869_v26 }
 0x110   : > { %934 = vst [vmem:[#allocation2 + $0x54] sm:$0xff] %v870_v37 }
 0x112   : > { %v4325_v38 = vpop.f32.mrf.mxu3 }
 0x114   : > { %v793_v39 = vpop.f32.mrf.mxu2  ;;  %v618_v41 = vpop.f32.mrf.mxu0 }
 0x115   : > { %v871_v40 = vpack.c.bf16 %v793_v39, %v793_v39  ;;  %v707_v42 = vpop.f32.mrf.mxu1 }
 0x116   : > { %v872_v34 = vpack.c.bf16 %v707_v42, %v618_v41 }
 0x117   : > { %935 = vst [vmem:[#allocation2 + $0x5c] sm:$0xf] %v871_v40 }
 0x118   : > { %936 = vst [vmem:[#allocation2 + $0x60] sm:$0xff] %v872_v34 }
 0x11a   : > { %v747_v43 = vpop.f32.mrf.mxu3 }
 0x11b   : > { %v904_v44 = vpack.c.bf16 %v747_v43, %v4308_v50 }
 0x11c   : > { %v796_v45 = vpop.f32.mrf.mxu2  ;;  %v620_v47 = vpop.f32.mrf.mxu0 }
 0x11d   : > { %v873_v46 = vpack.c.bf16 %v796_v45, %v796_v45  ;;  %968 = vst [vmem:[#allocation2 + $0x120] sm:$0xff] %v904_v44  ;;  %v709_v48 = vpop.f32.mrf.mxu1 }
 0x11e   : > { %v874_v49 = vpack.c.bf16 %v709_v48, %v620_v47 }
 0x11f   : > { %937 = vst [vmem:[#allocation2 + $0x68] sm:$0xf] %v873_v46 }
 0x120   : > { %938 = vst [vmem:[#allocation2 + $0x6c] sm:$0xff] %v874_v49 }
 0x122   : > { %v749_v51 = vpop.f32.mrf.mxu3 }
 0x123   : > { %v906_v52 = vpack.c.bf16 %v749_v51, %v4310_v58 }
 0x124   : > { %v798_v53 = vpop.f32.mrf.mxu2  ;;  %v623_v55 = vpop.f32.mrf.mxu0 }
 0x125   : > { %v875_v54 = vpack.c.bf16 %v798_v53, %v798_v53  ;;  %970 = vst [vmem:[#allocation2 + $0x12c] sm:$0xff] %v906_v52  ;;  %v712_v56 = vpop.f32.mrf.mxu1 }
 0x126   : > { %v876_v57 = vpack.c.bf16 %v712_v56, %v623_v55 }
 0x127   : > { %939 = vst [vmem:[#allocation2 + $0x74] sm:$0xf] %v875_v54 }
 0x128   : > { %940 = vst [vmem:[#allocation2 + $0x78] sm:$0xff] %v876_v57 }
 0x12a   : > { %v752_v50 = vpop.f32.mrf.mxu3 }
 0x12b   : > { %v908_v59 = vpack.c.bf16 %v752_v50, %v4313_v1 }
 0x12c   : > { %v801_v60 = vpop.f32.mrf.mxu2  ;;  %v625_v62 = vpop.f32.mrf.mxu0 }
 0x12d   : > { %v877_v61 = vpack.c.bf16 %v801_v60, %v801_v60  ;;  %972 = vst [vmem:[#allocation2 + $0x138] sm:$0xff] %v908_v59  ;;  %v714_v63 = vpop.f32.mrf.mxu1 }
 0x12e   : > { %v878_v0 = vpack.c.bf16 %v714_v63, %v625_v62 }
 0x12f   : > { %941 = vst [vmem:[#allocation2 + $0x80] sm:$0xf] %v877_v61 }
 0x130   : > { %942 = vst [vmem:[#allocation2 + $0x84] sm:$0xff] %v878_v0 }
 0x132   : > { %v754_v58 = vpop.f32.mrf.mxu3 }
 0x133   : > { %v910_v2 = vpack.c.bf16 %v754_v58, %v4315_v11 }
 0x134   : > { %v803_v3 = vpop.f32.mrf.mxu2  ;;  %v628_v5 = vpop.f32.mrf.mxu0 }
 0x135   : > { %v879_v4 = vpack.c.bf16 %v803_v3, %v803_v3  ;;  %974 = vst [vmem:[#allocation2 + $0x144] sm:$0xff] %v910_v2  ;;  %v717_v6 = vpop.f32.mrf.mxu1 }
 0x136   : > { %v880_v9 = vpack.c.bf16 %v717_v6, %v628_v5 }
 0x137   : > { %943 = vst [vmem:[#allocation2 + $0x8c] sm:$0xf] %v879_v4 }
 0x138   : > { %944 = vst [vmem:[#allocation2 + $0x90] sm:$0xff] %v880_v9 }
 0x13a   : > { %v757_v1 = vpop.f32.mrf.mxu3 }
 0x13b   : > { %v912_v10 = vpack.c.bf16 %v757_v1, %v4318_v20 }
 0x13c   : > { %v806_v12 = vpop.f32.mrf.mxu2  ;;  %v630_v14 = vpop.f32.mrf.mxu0 }
 0x13d   : > { %v881_v13 = vpack.c.bf16 %v806_v12, %v806_v12  ;;  %976 = vst [vmem:[#allocation2 + $0x150] sm:$0xff] %v912_v10  ;;  %v719_v15 = vpop.f32.mrf.mxu1 }
 0x13e   : > { %v882_v18 = vpack.c.bf16 %v719_v15, %v630_v14 }
 0x13f   : > { %945 = vst [vmem:[#allocation2 + $0x98] sm:$0xf] %v881_v13 }
 0x140   : > { %946 = vst [vmem:[#allocation2 + $0x9c] sm:$0xff] %v882_v18 }
 0x142   : > { %v759_v11 = vpop.f32.mrf.mxu3 }
 0x143   : > { %v914_v19 = vpack.c.bf16 %v759_v11, %v4320_v27 }
 0x144   : > { %v808_v21 = vpop.f32.mrf.mxu2  ;;  %v633_v23 = vpop.f32.mrf.mxu0 }
 0x145   : > { %v883_v22 = vpack.c.bf16 %v808_v21, %v808_v21  ;;  %978 = vst [vmem:[#allocation2 + $0x15c] sm:$0xff] %v914_v19  ;;  %v722_v7 = vpop.f32.mrf.mxu1 }
 0x146   : > { %v884_v16 = vpack.c.bf16 %v722_v7, %v633_v23 }
 0x147   : > { %947 = vst [vmem:[#allocation2 + $0xa4] sm:$0xf] %v883_v22 }
 0x148   : > { %948 = vst [vmem:[#allocation2 + $0xa8] sm:$0xff] %v884_v16 }
 0x14a   : > { %v762_v20 = vpop.f32.mrf.mxu3 }
 0x14b   : > { %v916_v24 = vpack.c.bf16 %v762_v20, %v4323_v8 }
 0x14c   : > { %v811_v25 = vpop.f32.mrf.mxu2  ;;  %v635_v30 = vpop.f32.mrf.mxu0 }
 0x14d   : > { %v885_v29 = vpack.c.bf16 %v811_v25, %v811_v25  ;;  %980 = vst [vmem:[#allocation2 + $0x168] sm:$0xff] %v916_v24  ;;  %v724_v31 = vpop.f32.mrf.mxu1 }
 0x14e   : > { %v886_v28 = vpack.c.bf16 %v724_v31, %v635_v30 }
 0x14f   : > { %949 = vst [vmem:[#allocation2 + $0xb0] sm:$0xf] %v885_v29 }
 0x150   : > { %950 = vst [vmem:[#allocation2 + $0xb4] sm:$0xff] %v886_v28 }
 0x152   : > { %v764_v27 = vpop.f32.mrf.mxu3 }
 0x153   : > { %v918_v32 = vpack.c.bf16 %v764_v27, %v4325_v38 }
 0x154   : > { %v813_v33 = vpop.f32.mrf.mxu2  ;;  %v638_v26 = vpop.f32.mrf.mxu0 }
 0x155   : > { %v887_v17 = vpack.c.bf16 %v813_v33, %v813_v33  ;;  %982 = vst [vmem:[#allocation2 + $0x174] sm:$0xff] %v918_v32  ;;  %v727_v35 = vpop.f32.mrf.mxu1 }
 0x156   : > { %v888_v36 = vpack.c.bf16 %v727_v35, %v638_v26 }
 0x157   : > { %951 = vst [vmem:[#allocation2 + $0xbc] sm:$0xf] %v887_v17 }
 0x158   : > { %952 = vst [vmem:[#allocation2 + $0xc0] sm:$0xff] %v888_v36 }
 0x15a   : > { %v836_v8 = vpop.f32.mrf.mxu3 }
 0x15b   : > { %v905_v39 = vpack.c.bf16 %v836_v8, %v836_v8 }
 0x15c   : > { %v816_v37 = vpop.f32.mrf.mxu2  ;;  %v640_v41 = vpop.f32.mrf.mxu0 }
 0x15d   : > { %v889_v40 = vpack.c.bf16 %v816_v37, %v816_v37  ;;  %969 = vst [vmem:[#allocation2 + $0x128] sm:$0xf] %v905_v39  ;;  %v729_v42 = vpop.f32.mrf.mxu1 }
 0x15e   : > { %v890_v34 = vpack.c.bf16 %v729_v42, %v640_v41 }
 0x15f   : > { %953 = vst [vmem:[#allocation2 + $0xc8] sm:$0xf] %v889_v40 }
 0x160   : > { %954 = vst [vmem:[#allocation2 + $0xcc] sm:$0xff] %v890_v34 }
 0x162   : > { %v838_v43 = vpop.f32.mrf.mxu3 }
 0x163   : > { %v907_v44 = vpack.c.bf16 %v838_v43, %v838_v43 }
 0x164   : > { %v818_v38 = vpop.f32.mrf.mxu2  ;;  %v643_v46 = vpop.f32.mrf.mxu0 }
 0x165   : > { %v891_v45 = vpack.c.bf16 %v818_v38, %v818_v38  ;;  %971 = vst [vmem:[#allocation2 + $0x134] sm:$0xf] %v907_v44  ;;  %v732_v47 = vpop.f32.mrf.mxu1 }
 0x166   : > { %v892_v48 = vpack.c.bf16 %v732_v47, %v643_v46 }
 0x167   : > { %955 = vst [vmem:[#allocation2 + $0xd4] sm:$0xf] %v891_v45 }
 0x168   : > { %956 = vst [vmem:[#allocation2 + $0xd8] sm:$0xff] %v892_v48 }
 0x16a   : > { %v841_v49 = vpop.f32.mrf.mxu3 }
 0x16b   : > { %v909_v52 = vpack.c.bf16 %v841_v49, %v841_v49 }
 0x16c   : > { %v821_v51 = vpop.f32.mrf.mxu2  ;;  %v645_v54 = vpop.f32.mrf.mxu0 }
 0x16d   : > { %v893_v53 = vpack.c.bf16 %v821_v51, %v821_v51  ;;  %973 = vst [vmem:[#allocation2 + $0x140] sm:$0xf] %v909_v52  ;;  %v734_v55 = vpop.f32.mrf.mxu1 }
 0x16e   : > { %v894_v56 = vpack.c.bf16 %v734_v55, %v645_v54 }
 0x16f   : > { %957 = vst [vmem:[#allocation2 + $0xe0] sm:$0xf] %v893_v53 }
 0x170   : > { %958 = vst [vmem:[#allocation2 + $0xe4] sm:$0xff] %v894_v56 }
 0x172   : > { %v843_v57 = vpop.f32.mrf.mxu3 }
 0x173   : > { %v911_v59 = vpack.c.bf16 %v843_v57, %v843_v57 }
 0x174   : > { %v823_v50 = vpop.f32.mrf.mxu2  ;;  %v648_v61 = vpop.f32.mrf.mxu0 }
 0x175   : > { %v895_v60 = vpack.c.bf16 %v823_v50, %v823_v50  ;;  %975 = vst [vmem:[#allocation2 + $0x14c] sm:$0xf] %v911_v59  ;;  %v737_v62 = vpop.f32.mrf.mxu1 }
 0x176   : > { %v896_v63 = vpack.c.bf16 %v737_v62, %v648_v61 }
 0x177   : > { %959 = vst [vmem:[#allocation2 + $0xec] sm:$0xf] %v895_v60 }
 0x178   : > { %960 = vst [vmem:[#allocation2 + $0xf0] sm:$0xff] %v896_v63 }
 0x17a   : > { %v846_v0 = vpop.f32.mrf.mxu3 }
 0x17b   : > { %v913_v2 = vpack.c.bf16 %v846_v0, %v846_v0 }
 0x17c   : > { %v826_v58 = vpop.f32.mrf.mxu2  ;;  %v650_v4 = vpop.f32.mrf.mxu0 }
 0x17d   : > { %v897_v3 = vpack.c.bf16 %v826_v58, %v826_v58  ;;  %977 = vst [vmem:[#allocation2 + $0x158] sm:$0xf] %v913_v2  ;;  %v739_v5 = vpop.f32.mrf.mxu1 }
 0x17e   : > { %v898_v6 = vpack.c.bf16 %v739_v5, %v650_v4 }
 0x17f   : > { %961 = vst [vmem:[#allocation2 + $0xf8] sm:$0xf] %v897_v3 }
 0x180   : > { %962 = vst [vmem:[#allocation2 + $0xfc] sm:$0xff] %v898_v6 }
 0x182   : > { %v848_v9 = vpop.f32.mrf.mxu3 }
 0x183   : > { %v915_v10 = vpack.c.bf16 %v848_v9, %v848_v9 }
 0x184   : > { %v828_v1 = vpop.f32.mrf.mxu2  ;;  %v653_v13 = vpop.f32.mrf.mxu0 }
 0x185   : > { %v899_v12 = vpack.c.bf16 %v828_v1, %v828_v1  ;;  %979 = vst [vmem:[#allocation2 + $0x164] sm:$0xf] %v915_v10  ;;  %v742_v14 = vpop.f32.mrf.mxu1 }
 0x186   : > { %v900_v15 = vpack.c.bf16 %v742_v14, %v653_v13 }
 0x187   : > { %963 = vst [vmem:[#allocation2 + $0x104] sm:$0xf] %v899_v12 }
 0x188   : > { %964 = vst [vmem:[#allocation2 + $0x108] sm:$0xff] %v900_v15 }
 0x18a   : > { %v851_v18 = vpop.f32.mrf.mxu3 }
 0x18b   : > { %v917_v19 = vpack.c.bf16 %v851_v18, %v851_v18 }
 0x18c   : > { %v831_v11 = vpop.f32.mrf.mxu2  ;;  %v655_v22 = vpop.f32.mrf.mxu0 }
 0x18d   : > { %v901_v21 = vpack.c.bf16 %v831_v11, %v831_v11  ;;  %981 = vst [vmem:[#allocation2 + $0x170] sm:$0xf] %v917_v19  ;;  %v744_v23 = vpop.f32.mrf.mxu1 }
 0x18e   : > { %v902_v7 = vpack.c.bf16 %v744_v23, %v655_v22 }
 0x18f   : > { %965 = vst [vmem:[#allocation2 + $0x110] sm:$0xf] %v901_v21 }
 0x190   : > { %966 = vst [vmem:[#allocation2 + $0x114] sm:$0xff] %v902_v7 }
 0x192   : > { %v853_v16 = vpop.f32.mrf.mxu3 }
 0x193   : > { %v919_v24 = vpack.c.bf16 %v853_v16, %v853_v16 }
 0x194   : > { %v833_v20 = vpop.f32.mrf.mxu2 }
 0x195   : > { %v903_v25 = vpack.c.bf16 %v833_v20, %v833_v20  ;;  %983 = vst [vmem:[#allocation2 + $0x17c] sm:$0xf] %v919_v24 }
 0x197   : > { %967 = vst [vmem:[#allocation2 + $0x11c] sm:$0xf] %v903_v25 }
 0x198 PF: > { %v3264_v29 = vld [vmem:[#allocation2 + $0xac] sm:$0xf]  ;;  %v3472_v30 = vld [vmem:[#allocation2 + $0xb4] sm:$0xf0]  ;;  %v3260_v33 = vld [vmem:[#allocation2 + $0x94] sm:$0xf] }
 0x199   : > { %v3296_v31 = vld [vmem:[#allocation2 + $0x16c] sm:$0xf]  ;;  %v3265_v28 = vor.u32 %v3472_v30, %v3264_v29  ;;  %v3480_v27 = vld [vmem:[#allocation2 + $0x174] sm:$0xf0]  ;;  %v3471_v17 = vld [vmem:[#allocation2 + $0x9c] sm:$0xf0] }
 0x19a   : > { %v3297_v32 = vor.u32 %v3480_v27, %v3296_v31  ;;  %v3292_v26 = vld [vmem:[#allocation2 + $0x154] sm:$0xf]  ;;  %v3479_v35 = vld [vmem:[#allocation2 + $0x15c] sm:$0xf0]  ;;  %v3261_v36 = vor.u32 %v3471_v17, %v3260_v33  ;;  %v3256_v37 = vld [vmem:[#allocation2 + $0x7c] sm:$0xf] }
 0x19b   : > { %1231 = vmatpush.bf16.xpose.msra.mxu0 %v3265_v28  ;;  %v3293_v8 = vor.u32 %v3479_v35, %v3292_v26  ;;  %v3470_v39 = vld [vmem:[#allocation2 + $0x84] sm:$0xf0]  ;;  %v3288_v40 = vld [vmem:[#allocation2 + $0x13c] sm:$0xf]  ;;  %v3252_v43 = vld [vmem:[#allocation2 + $0x64] sm:$0xf] }
 0x19c   : > { %1280 = vmatpush.bf16.xpose.msra.mxu1 %v3297_v32  ;;  %v3478_v41 = vld [vmem:[#allocation2 + $0x144] sm:$0xf0]  ;;  %v3257_v42 = vor.u32 %v3470_v39, %v3256_v37  ;;  %v3469_v38 = vld [vmem:[#allocation2 + $0x6c] sm:$0xf0]  ;;  %v3284_v44 = vld [vmem:[#allocation2 + $0x124] sm:$0xf] }
 0x19d   : > { %v3289_v34 = vor.u32 %v3478_v41, %v3288_v40  ;;  %v3477_v45 = vld [vmem:[#allocation2 + $0x12c] sm:$0xf0]  ;;  %v3253_v46 = vor.u32 %v3469_v38, %v3252_v43  ;;  %v3248_v48 = vld [vmem:[#allocation2 + $0x4c] sm:$0xf]  ;;  %v3468_v49 = vld [vmem:[#allocation2 + $0x54] sm:$0xf0] }
 0x19e   : > { %v3285_v47 = vor.u32 %v3477_v45, %v3284_v44  ;;  %v3280_v51 = vld [vmem:[#allocation2 + $0x10c] sm:$0xf]  ;;  %v3476_v52 = vld [vmem:[#allocation2 + $0x114] sm:$0xf0]  ;;  %v3249_v53 = vor.u32 %v3468_v49, %v3248_v48  ;;  %v3244_v55 = vld [vmem:[#allocation2 + $0x34] sm:$0xf] }
 0x19f   : > { %v3281_v54 = vor.u32 %v3476_v52, %v3280_v51  ;;  %v3467_v56 = vld [vmem:[#allocation2 + $0x3c] sm:$0xf0]  ;;  %v3276_v57 = vld [vmem:[#allocation2 + $0xf4] sm:$0xf]  ;;  %v3240_v61 = vld [vmem:[#allocation2 + $0x1c] sm:$0xf] }
 0x1a0   : > { %v3475_v50 = vld [vmem:[#allocation2 + $0xfc] sm:$0xf0]  ;;  %v3245_v59 = vor.u32 %v3467_v56, %v3244_v55  ;;  %v3466_v62 = vld [vmem:[#allocation2 + $0x24] sm:$0xf0]  ;;  %v3272_v63 = vld [vmem:[#allocation2 + $0xdc] sm:$0xf] }
 0x1a1   : > { %v3277_v60 = vor.u32 %v3475_v50, %v3276_v57  ;;  %v3474_v0 = vld [vmem:[#allocation2 + $0xe4] sm:$0xf0]  ;;  %s4336_s25 = sshll.u32 %s4154_s6, 7  ;;  %v3241_v58 = vor.u32 %v3466_v62, %v3240_v61  ;;  %v3236_v3 = vld [vmem:[#allocation2 + $0x4] sm:$0xf]  ;;  %s2954_s1 = sshll.u32 %s4239_s22, 4  ;;  %s2955_s1 = int_to_ptr.vmem [resolvable:$true] %s2954_s1 }
 0x1a2   : > { %v3273_v2 = vor.u32 %v3474_v0, %v3272_v63  ;;  %s1002_s26 = sshra.s32 %s4336_s25, 3  ;;  %v3465_v4 = vld [vmem:[#allocation2 + $0xc] sm:$0xf0]  ;;  %v3268_v5 = vld [vmem:[#allocation2 + $0xc4] sm:$0xf]  ;;  %s4606_s28 = scalar_lea.vmem [#allocation4], %s4336_s25 }
 0x1a3   : > { %1232 = vmatpush.bf16.xpose.msra.mxu0 %v3261_v36  ;;  %s3456_s21 = smul.u32 12, %s1002_s26  ;;  %v3473_v6 = vld [vmem:[#allocation2 + $0xcc] sm:$0xf0]  ;;  %v3237_v9 = vor.u32 %v3465_v4, %v3236_v3  ;;  %s2953_s14 = scalar_lea.hbm %s5335_s8, %s4336_s25 }
 0x1a4   : > { %1281 = vmatpush.bf16.xpose.msra.mxu1 %v3293_v8  ;;  %v3269_v1 = vor.u32 %v3473_v6, %v3268_v5  ;;  %s2956_s20 = sshll.u32 %s2953_s14, 4  ;;  %s2928_s3 = scalar_lea.sflag [#allocation15], %s4235_s15  ;;  %s2957_s20 = int_to_ptr.hbm [resolvable:$true] %s2956_s20 }
 0x1a5   : > { %s4339_s23 = scalar_lea.vmem [#allocation2], %s3456_s21  ;;  %s3977_s18 = sshra.s32 %s2957_s20, 4  ;;  %s3978_s18 = int_to_ptr.hbm [resolvable:$true] %s3977_s18 }
 0x1a6   : > { %v3204_v10 = vld [vmem:[%s4339_s23] sm:$0xf]  ;;  %v3457_v12 = vld [vmem:[%s4339_s23 + $0x8] sm:$0xf0]  ;;  %v3208_v14 = vld [vmem:[%s4339_s23 + $0x18] sm:$0xf]  ;;  %p3984_p3 = scmp.lt.s32.totalorder %s3978_s18, %s5335_s8 }
 0x1a7   : > { %v3205_v13 = vor.u32 %v3457_v12, %v3204_v10  ;;  %v3458_v15 = vld [vmem:[%s4339_s23 + $0x20] sm:$0xf0]  ;;  %v3212_v11 = vld [vmem:[%s4339_s23 + $0x30] sm:$0xf]  ;;  %v3459_v19 = vld [vmem:[%s4339_s23 + $0x38] sm:$0xf0] }
 0x1a8   : > { %v3209_v18 = vor.u32 %v3458_v15, %v3208_v14  ;;  %v3213_v21 = vor.u32 %v3459_v19, %v3212_v11  ;;  %v3216_v22 = vld [vmem:[%s4339_s23 + $0x48] sm:$0xf]  ;;  %v3460_v23 = vld [vmem:[%s4339_s23 + $0x50] sm:$0xf0]  ;;  %v3220_v16 = vld [vmem:[%s4339_s23 + $0x60] sm:$0xf] }
 0x1a9   : > { %v3217_v7 = vor.u32 %v3460_v23, %v3216_v22  ;;  %v3461_v20 = vld [vmem:[%s4339_s23 + $0x68] sm:$0xf0]  ;;  %v3224_v25 = vld [vmem:[%s4339_s23 + $0x78] sm:$0xf]  ;;  %v3462_v29 = vld [vmem:[%s4339_s23 + $0x80] sm:$0xf0] }
 0x1aa   : > { %v3221_v24 = vor.u32 %v3461_v20, %v3220_v16  ;;  %v3225_v30 = vor.u32 %v3462_v29, %v3224_v25  ;;  %v3228_v31 = vld [vmem:[%s4339_s23 + $0x90] sm:$0xf]  ;;  %v3463_v28 = vld [vmem:[%s4339_s23 + $0x98] sm:$0xf0]  ;;  %v3232_v8 = vld [vmem:[%s4339_s23 + $0xa8] sm:$0xf] }
 0x1ab   : > { %1233 = vmatpush.bf16.xpose.msra.mxu0 %v3257_v42  ;;  %v3229_v27 = vor.u32 %v3463_v28, %v3228_v31  ;;  %v3464_v37 = vld [vmem:[%s4339_s23 + $0xb0] sm:$0xf0]  ;;  %s3979_s26 = scalar_lea.hbm %s3978_s18, 128 }
 0x1ac   : > { %1282 = vmatpush.bf16.xpose.msra.mxu1 %v3289_v34  ;;  %v3233_v39 = vor.u32 %v3464_v37, %v3232_v8  ;;  %p3980_p0 = scmp.ne.s32.totalorder %s3978_s18, %s3979_s26 }
 0x1ae   : > { %p3981_p1 = pnand %p3980_p0, %p4171_p5 }
 0x1b0   : > { %p3982_p2 = pneg %p3981_p1 }
 0x1b3   : > { %1234 = vmatpush.bf16.xpose.msra.mxu0 %v3253_v46 }
 0x1b4   : > { %1283 = vmatpush.bf16.xpose.msra.mxu1 %v3285_v47 }
 0x1bb   : > { %1235 = vmatpush.bf16.xpose.msra.mxu0 %v3249_v53 }
 0x1bc   : > { %1284 = vmatpush.bf16.xpose.msra.mxu1 %v3281_v54 }
 0x1c3   : > { %1236 = vmatpush.bf16.xpose.msra.mxu0 %v3245_v59 }
 0x1c4   : > { %1285 = vmatpush.bf16.xpose.msra.mxu1 %v3277_v60 }
 0x1cb   : > { %1237 = vmatpush.bf16.xpose.msra.mxu0 %v3241_v58 }
 0x1cc   : > { %1286 = vmatpush.bf16.xpose.msra.mxu1 %v3273_v2 }
 0x1d3   : > { %1238 = vmatpush.bf16.xpose.msra.mxu0 %v3237_v9 }
 0x1d4   : > { %1287 = vmatpush.bf16.xpose.msra.mxu1 %v3269_v1 }
 0x1da   : > { %1239 = vmatmul.bf16.vlgmr.msra.gmra.mxu0 %v3205_v13 }
 0x1db   : > { %1288 = vmatmul.bf16.vlgmr.msra.gmra.mxu1 %v3205_v13 }
 0x1ea   : > { %1244 = vmatmul.bf16.gmra.mxu0 %v3209_v18 }
 0x1eb   : > { %1293 = vmatmul.bf16.gmra.mxu1 %v3209_v18 }
 0x1fa   : > { %1249 = vmatmul.bf16.gmra.mxu0 %v3213_v21 }
 0x1fb   : > { %1298 = vmatmul.bf16.gmra.mxu1 %v3213_v21 }
 0x20a   : > { %1254 = vmatmul.bf16.gmra.mxu0 %v3217_v7 }
 0x20b   : > { %1303 = vmatmul.bf16.gmra.mxu1 %v3217_v7 }
 0x21a   : > { %1259 = vmatmul.bf16.gmra.mxu0 %v3221_v24 }
 0x21b   : > { %1308 = vmatmul.bf16.gmra.mxu1 %v3221_v24 }
 0x22a   : > { %1264 = vmatmul.bf16.gmra.mxu0 %v3225_v30 }
 0x22b   : > { %1313 = vmatmul.bf16.gmra.mxu1 %v3225_v30 }
 0x23a   : > { %1269 = vmatmul.bf16.gmra.mxu0 %v3229_v27 }
 0x23b   : > { %1318 = vmatmul.bf16.gmra.mxu1 %v3229_v27 }
 0x24a   : > { %1274 = vmatmul.bf16.gmra.mxu0 %v3233_v39 }
 0x24b   : > { %1323 = vmatmul.bf16.gmra.mxu1 %v3233_v39 }
 0x257   : > { %v1240_v32 = vpop.f32.mrf.mxu0 }
 0x258   : > { %v1289_v33 = vpop.f32.mrf.mxu1 }
 0x259   : > { %v1329_v17 = vmax.f32 %v1240_v32, %v1289_v33 }
 0x25b   : > { %1330 = vmax.xlane.f32.xlu0 %v1329_v17 }
 0x25f   : > { %v1242_v26 = vpop.f32.mrf.mxu0 }
 0x260   : > { %v1291_v35 = vpop.f32.mrf.mxu1 }
 0x261   : > { %v1332_v36 = vmax.f32 %v1242_v26, %v1291_v35 }
 0x263   : > { %1333 = vmax.xlane.f32.xlu0 %v1332_v36 }
 0x267   : > { %v1245_v40 = vpop.f32.mrf.mxu0 }
 0x268   : > { %v1294_v41 = vpop.f32.mrf.mxu1 }
 0x269   : > { %v1335_v42 = vmax.f32 %v1245_v40, %v1294_v41 }
 0x26b   : > { %1336 = vmax.xlane.f32.xlu1 %v1335_v42 }
 0x26f   : > { %v4357_v34 = vpop.f32.mrf.mxu0 }
 0x270   : > { %v4359_v43 = vpop.f32.mrf.mxu1 }
 0x271   : > { %v1338_v38 = vmax.f32 %v4357_v34, %v4359_v43 }
 0x273   : > { %1339 = vmax.xlane.f32.xlu1 %v1338_v38 }
 0x277   : > { %v4363_v44 = vpop.f32.mrf.mxu0 }
 0x278   : > { %v4365_v45 = vpop.f32.mrf.mxu1 }
 0x279   : > { %v1341_v46 = vmax.f32 %v4363_v44, %v4365_v45 }
 0x27b   : > { %1342 = vmax.xlane.f32.xlu2 %v1341_v46 }
 0x27f   : > { %v4369_v47 = vpop.f32.mrf.mxu0 }
 0x280   : > { %v4371_v48 = vpop.f32.mrf.mxu1 }
 0x281   : > { %v1344_v49 = vmax.f32 %v4369_v47, %v4371_v48 }
 0x283   : > { %1345 = vmax.xlane.f32.xlu2 %v1344_v49 }
 0x287   : > { %v4375_v51 = vpop.f32.mrf.mxu0 }
 0x288   : > { %v4377_v52 = vpop.f32.mrf.mxu1 }
 0x289   : > { %v1347_v53 = vmax.f32 %v4375_v51, %v4377_v52 }
 0x28b   : > { %1348 = vmax.xlane.f32.xlu0 %v1347_v53 }
 0x28f   : > { %v4381_v54 = vpop.f32.mrf.mxu0 }
 0x290   : > { %v4383_v55 = vpop.f32.mrf.mxu1 }
 0x291   : > { %v1350_v56 = vmax.f32 %v4381_v54, %v4383_v55 }
 0x293   : > { %1351 = vmax.xlane.f32.xlu1 %v1350_v56 }
 0x297   : > { %v4387_v57 = vpop.f32.mrf.mxu0 }
 0x298   : > { %v4389_v50 = vpop.f32.mrf.mxu1 }
 0x299   : > { %v1353_v59 = vmax.f32 %v4387_v57, %v4389_v50 }
 0x29b   : > { %1354 = vmax.xlane.f32.xlu1 %v1353_v59 }
 0x29f   : > { %v4393_v58 = vpop.f32.mrf.mxu0 }
 0x2a0   : > { %v4395_v2 = vpop.f32.mrf.mxu1 }
 0x2a1   : > { %v1356_v16 = vmax.f32 %v4393_v58, %v4395_v2 }
 0x2a7   : > { %v4403_v13 = vpop.f32.mrf.mxu0 }
 0x2a8   : > { %v4405_v15 = vpop.f32.mrf.mxu1 }
 0x2af   : > { %v4417_v29 = vpop.f32.mrf.mxu0 }
 0x2b0   : > { %v4419_v30 = vpop.f32.mrf.mxu1 }
 0x2b8   : > { %v4437_v42 = vpop.f32.mrf.mxu1 }
 0x2ce   : > { %v1331_v60 = vpop.xlane.xlu0 %1330 }
 0x2cf   : > { %v1377_v61 = vsub.f32 %v1240_v32, %v1331_v60  ;;  %v1378_v62 = vsub.f32 %v1289_v33, %v1331_v60  ;;  %v1359_v32 = vmax.f32 %v4403_v13, %v4405_v15 }
 0x2d1   : > { %v1409_v63 = vmul.f32 1.442695, %v1377_v61  ;;  %v1411_v0 = vmul.f32 1.442695, %v1378_v62  ;;  %v4455_v62 = vpop.f32.mrf.mxu1 }
 0x2d3   : > { %3651 = vpow2.f32 %v1409_v63  ;;  %v3324_v63 = vld [vmem:[#allocation2 + $0x98] sm:$0xf] }
 0x2d4   : > { %3653 = vpow2.f32 %v1411_v0 }
 0x2d6   : > { %v1334_v3 = vpop.xlane.xlu0 %1333 }
 0x2d7   : > { %v1379_v4 = vsub.f32 %v1242_v26, %v1334_v3  ;;  %v1380_v5 = vsub.f32 %v1291_v35, %v1334_v3 }
 0x2d9   : > { %v4397_v6 = vpop.eup %3651  ;;  %v1413_v9 = vmul.f32 1.442695, %v1379_v4  ;;  %v1415_v1 = vmul.f32 1.442695, %v1380_v5  ;;  %v3487_v4 = vld [vmem:[#allocation2 + $0xa0] sm:$0xf0] }
 0x2da   : > { %v4399_v10 = vpop.eup %3653 }
 0x2db   : > { %3655 = vpow2.f32 %v1413_v9  ;;  %v1473_v12 = vadd.f32 %v4399_v10, %v4397_v6 }
 0x2dc   : > { %3657 = vpow2.f32 %v1415_v1  ;;  %v3360_v1 = vld [vmem:[#allocation2 + $0x170] sm:$0xf] }
 0x2dd   : > { %1474 = vadd.xlane.f32.xlu2 %v1473_v12  ;;  %v3496_v12 = vld [vmem:[#allocation2 + $0x178] sm:$0xf0] }
 0x2de   : > { %v1337_v14 = vpop.xlane.xlu1 %1336 }
 0x2df   : > { %v1381_v18 = vsub.f32 %v1245_v40, %v1337_v14  ;;  %v1382_v11 = vsub.f32 %v1294_v41, %v1337_v14  ;;  %v4433_v40 = vpop.f32.mrf.mxu0  ;;  %v3325_v14 = vor.u32 %v3487_v4, %v3324_v63  ;;  %v3356_v63 = vld [vmem:[#allocation2 + $0x158] sm:$0xf]  ;;  %v3352_v4 = vld [vmem:[#allocation2 + $0x140] sm:$0xf] }
 0x2e0   : > { %v1365_v56 = vmax.f32 %v4433_v40, %v4437_v42 }
 0x2e1   : > { %v4407_v19 = vpop.eup %3655  ;;  %v1417_v21 = vmul.f32 1.442695, %v1381_v18  ;;  %v1419_v22 = vmul.f32 1.442695, %v1382_v11  ;;  %v3320_v18 = vld [vmem:[#allocation2 + $0x80] sm:$0xf]  ;;  %v3361_v11 = vor.u32 %v3496_v12, %v3360_v1 }
 0x2e2   : > { %v4409_v23 = vpop.eup %3657  ;;  %v3316_v1 = vld [vmem:[#allocation2 + $0x68] sm:$0xf]  ;;  %v3485_v12 = vld [vmem:[#allocation2 + $0x70] sm:$0xf0] }
 0x2e3   : > { %3659 = vpow2.f32 %v1417_v21  ;;  %v1476_v7 = vadd.f32 %v4409_v23, %v4407_v19  ;;  %1874 = vmatpush.bf16.msra.mxu3 %v3361_v11  ;;  %v3493_v11 = vld [vmem:[#allocation2 + $0x130] sm:$0xf0] }
 0x2e4   : > { %3661 = vpow2.f32 %v1419_v22 }
 0x2e5   : > { %1477 = vadd.xlane.f32.xlu0 %v1476_v7  ;;  %1357 = vmax.xlane.f32.xlu2 %v1356_v16  ;;  %v3486_v16 = vld [vmem:[#allocation2 + $0x88] sm:$0xf0] }
 0x2e6   : > { %v1340_v20 = vpop.xlane.xlu1 %1339 }
 0x2e7   : > { %v1383_v24 = vsub.f32 %v4357_v34, %v1340_v20  ;;  %v1384_v25 = vsub.f32 %v4359_v43, %v1340_v20  ;;  %v1362_v43 = vmax.f32 %v4417_v29, %v4419_v30  ;;  %v4451_v60 = vpop.f32.mrf.mxu0 }
 0x2e9   : > { %v4421_v31 = vpop.eup %3659  ;;  %v1421_v28 = vmul.f32 1.442695, %v1383_v24  ;;  %v1423_v27 = vmul.f32 1.442695, %v1384_v25  ;;  %v3321_v24 = vor.u32 %v3486_v16, %v3320_v18  ;;  %v3317_v18 = vor.u32 %v3485_v12, %v3316_v1  ;;  %v3484_v16 = vld [vmem:[#allocation2 + $0x58] sm:$0xf0] }
 0x2ea   : > { %v4425_v33 = vpop.eup %3661 }
 0x2eb   : > { %3663 = vpow2.f32 %v1421_v28  ;;  %v1479_v17 = vadd.f32 %v4425_v33, %v4421_v31  ;;  %v4469_v28 = vpop.f32.mrf.mxu1 }
 0x2ec   : > { %3665 = vpow2.f32 %v1423_v27 }
 0x2ed   : > { %1480 = vadd.xlane.f32.xlu0 %v1479_v17  ;;  %1360 = vmax.xlane.f32.xlu2 %v1359_v32 }
 0x2ee   : > { %v1343_v26 = vpop.xlane.xlu2 %1342 }
 0x2ef   : > { %v1385_v35 = vsub.f32 %v4363_v44, %v1343_v26  ;;  %v1386_v36 = vsub.f32 %v4365_v45, %v1343_v26  ;;  %v4467_v25 = vpop.f32.mrf.mxu0 }
 0x2f1   : > { %v4431_v8 = vpop.eup %3663  ;;  %v1425_v37 = vmul.f32 1.442695, %v1385_v35  ;;  %v1427_v39 = vmul.f32 1.442695, %v1386_v36 }
 0x2f2   : > { %v4435_v41 = vpop.eup %3665 }
 0x2f3   : > { %3667 = vpow2.f32 %v1425_v37  ;;  %v1482_v34 = vadd.f32 %v4435_v41, %v4431_v8  ;;  %v1371_v37 = vmax.f32 %v4467_v25, %v4469_v28 }
 0x2f4   : > { %3669 = vpow2.f32 %v1427_v39 }
 0x2f5   : > { %1483 = vadd.xlane.f32.xlu1 %v1482_v34  ;;  %1363 = vmax.xlane.f32.xlu0 %v1362_v43 }
 0x2f6   : > { %v1346_v38 = vpop.xlane.xlu2 %1345 }
 0x2f7   : > { %v1387_v44 = vsub.f32 %v4369_v47, %v1346_v38  ;;  %v1388_v45 = vsub.f32 %v4371_v48, %v1346_v38  ;;  %v3328_v47 = vld [vmem:[#allocation2 + $0xb0] sm:$0xf]  ;;  %v3488_v48 = vld [vmem:[#allocation2 + $0xb8] sm:$0xf0]  ;;  %v4483_v38 = vpop.f32.mrf.mxu0 }
 0x2f8   : > { %v3329_v3 = vor.u32 %v3488_v48, %v3328_v47 }
 0x2f9   : > { %v4445_v46 = vpop.eup %3667  ;;  %v1429_v49 = vmul.f32 1.442695, %v1387_v44  ;;  %v1431_v53 = vmul.f32 1.442695, %v1388_v45  ;;  %v4485_v44 = vpop.f32.mrf.mxu1 }
 0x2fa   : > { %v4449_v59 = vpop.eup %3669  ;;  %1825 = vmatpush.bf16.msrb.mxu1 %v3329_v3  ;;  %3539 = vmatpush.bf16.msra.mxu2 %v3329_v3  ;;  %v1374_v47 = vmax.f32 %v4483_v38, %v4485_v44 }
 0x2fb   : > { %3671 = vpow2.f32 %v1429_v49  ;;  %v1485_v61 = vadd.f32 %v4449_v59, %v4445_v46 }
 0x2fc   : > { %3673 = vpow2.f32 %v1431_v53 }
 0x2fd   : > { %1486 = vadd.xlane.f32.xlu1 %v1485_v61  ;;  %1366 = vmax.xlane.f32.xlu0 %v1365_v56 }
 0x2fe   : > { %v1349_v0 = vpop.xlane.xlu0 %1348  ;;  %1826 = vmatpush.bf16.msrb.mxu1 %v3325_v14  ;;  %3540 = vmatpush.bf16.msra.mxu2 %v3325_v14  ;;  %v3348_v14 = vld [vmem:[#allocation2 + $0x128] sm:$0xf] }
 0x2ff   : > { %v1389_v5 = vsub.f32 %v4375_v51, %v1349_v0  ;;  %v1390_v9 = vsub.f32 %v4377_v52, %v1349_v0  ;;  %v1368_v52 = vmax.f32 %v4451_v60, %v4455_v62  ;;  %v3495_v0 = vld [vmem:[#allocation2 + $0x160] sm:$0xf0] }
 0x300   : > { %v3357_v3 = vor.u32 %v3495_v0, %v3356_v63  ;;  %v3332_v63 = vld [vmem:[#allocation2 + $0xc8] sm:$0xf] }
 0x301   : > { %v4459_v21 = vpop.eup %3671  ;;  %v1433_v22 = vmul.f32 1.442695, %v1389_v5  ;;  %v1435_v7 = vmul.f32 1.442695, %v1390_v9  ;;  %v3494_v5 = vld [vmem:[#allocation2 + $0x148] sm:$0xf0] }
 0x302   : > { %v4461_v20 = vpop.eup %3673  ;;  %1827 = vmatpush.bf16.msrb.mxu1 %v3321_v24  ;;  %3541 = vmatpush.bf16.msra.mxu2 %v3321_v24  ;;  %v3353_v9 = vor.u32 %v3494_v5, %v3352_v4  ;;  %v3492_v24 = vld [vmem:[#allocation2 + $0x118] sm:$0xf0] }
 0x303   : > { %3675 = vpow2.f32 %v1433_v22  ;;  %v1488_v51 = vadd.f32 %v4461_v20, %v4459_v21  ;;  %1875 = vmatpush.bf16.msra.mxu3 %v3357_v3  ;;  %v3349_v22 = vor.u32 %v3493_v11, %v3348_v14  ;;  %v3489_v3 = vld [vmem:[#allocation2 + $0xd0] sm:$0xf0] }
 0x304   : > { %3677 = vpow2.f32 %v1435_v7  ;;  %v3312_v7 = vld [vmem:[#allocation2 + $0x50] sm:$0xf]  ;;  %v3333_v4 = vor.u32 %v3489_v3, %v3332_v63 }
 0x305   : > { %1489 = vadd.xlane.f32.xlu2 %v1488_v51  ;;  %1369 = vmax.xlane.f32.xlu1 %v1368_v52  ;;  %v3344_v51 = vld [vmem:[#allocation2 + $0x110] sm:$0xf]  ;;  %v3313_v52 = vor.u32 %v3484_v16, %v3312_v7 }
 0x306   : > { %v1352_v27 = vpop.xlane.xlu1 %1351  ;;  %1828 = vmatpush.bf16.msrb.mxu1 %v3317_v18  ;;  %3542 = vmatpush.bf16.msra.mxu2 %v3317_v18 }
 0x307   : > { %v1391_v32 = vsub.f32 %v4381_v54, %v1352_v27  ;;  %v1392_v17 = vsub.f32 %v4383_v55, %v1352_v27  ;;  %1876 = vmatpush.bf16.msra.mxu3 %v3353_v9  ;;  %v3345_v27 = vor.u32 %v3492_v24, %v3344_v51 }
 0x309   : > { %v4473_v26 = vpop.eup %3675  ;;  %v1437_v35 = vmul.f32 1.442695, %v1391_v32  ;;  %v1439_v36 = vmul.f32 1.442695, %v1392_v17  ;;  %v3308_v32 = vld [vmem:[#allocation2 + $0x38] sm:$0xf] }
 0x30a   : > { %v4477_v39 = vpop.eup %3677  ;;  %1829 = vmatpush.bf16.msrb.mxu1 %v3313_v52  ;;  %3543 = vmatpush.bf16.msra.mxu2 %v3313_v52  ;;  %v3483_v17 = vld [vmem:[#allocation2 + $0x40] sm:$0xf0] }
 0x30b   : > { %3679 = vpow2.f32 %v1437_v35  ;;  %v1491_v34 = vadd.f32 %v4477_v39, %v4473_v26  ;;  %1877 = vmatpush.bf16.msra.mxu3 %v3349_v22  ;;  %v3340_v35 = vld [vmem:[#allocation2 + $0xf8] sm:$0xf] }
 0x30c   : > { %3681 = vpow2.f32 %v1439_v36  ;;  %v3309_v36 = vor.u32 %v3483_v17, %v3308_v32 }
 0x30d   : > { %1492 = vadd.xlane.f32.xlu2 %v1491_v34  ;;  %1372 = vmax.xlane.f32.xlu1 %v1371_v37  ;;  %v3491_v37 = vld [vmem:[#allocation2 + $0x100] sm:$0xf0] }
 0x30e   : > { %v1355_v54 = vpop.xlane.xlu1 %1354  ;;  %v3341_v34 = vor.u32 %v3491_v37, %v3340_v35  ;;  %1830 = vmatpush.bf16.msrb.mxu1 %v3309_v36  ;;  %3544 = vmatpush.bf16.msra.mxu2 %v3309_v36 }
 0x30f   : > { %v1393_v55 = vsub.f32 %v4387_v57, %v1355_v54  ;;  %v1394_v43 = vsub.f32 %v4389_v50, %v1355_v54  ;;  %1878 = vmatpush.bf16.msra.mxu3 %v3345_v27  ;;  %v3304_v54 = vld [vmem:[#allocation2 + $0x20] sm:$0xf] }
 0x311   : > { %v4487_v45 = vpop.eup %3679  ;;  %v1441_v49 = vmul.f32 1.442695, %v1393_v55  ;;  %v1443_v53 = vmul.f32 1.442695, %v1394_v43  ;;  %v3482_v55 = vld [vmem:[#allocation2 + $0x28] sm:$0xf0] }
 0x312   : > { %v4489_v56 = vpop.eup %3681  ;;  %v3336_v43 = vld [vmem:[#allocation2 + $0xe0] sm:$0xf] }
 0x313   : > { %3683 = vpow2.f32 %v1441_v49  ;;  %v1494_v61 = vadd.f32 %v4489_v56, %v4487_v45  ;;  %1879 = vmatpush.bf16.msra.mxu3 %v3341_v34  ;;  %v3305_v49 = vor.u32 %v3482_v55, %v3304_v54 }
 0x314   : > { %3685 = vpow2.f32 %v1443_v53  ;;  %v3490_v53 = vld [vmem:[#allocation2 + $0xe8] sm:$0xf0] }
 0x315   : > { %1495 = vadd.xlane.f32.xlu0 %v1494_v61  ;;  %1375 = vmax.xlane.f32.xlu2 %v1374_v47  ;;  %v3337_v61 = vor.u32 %v3490_v53, %v3336_v43  ;;  %v3300_v47 = vld [vmem:[#allocation2 + $0x8] sm:$0xf] }
 0x316   : > { %1831 = vmatpush.bf16.msrb.mxu1 %v3305_v49  ;;  %3545 = vmatpush.bf16.msra.mxu2 %v3305_v49 }
 0x317   : > { %1880 = vmatpush.bf16.msra.mxu3 %v3337_v61 }
 0x319   : > { %v4495_v57 = vpop.eup %3683 }
 0x31a   : > { %v4497_v50 = vpop.eup %3685 }
 0x31b   : > { %v1497_v48 = vadd.f32 %v4497_v50, %v4495_v57  ;;  %1881 = vmatpush.bf16.msra.mxu3 %v3333_v4 }
 0x31d   : > { %1498 = vadd.xlane.f32.xlu0 %v1497_v48  ;;  %v3481_v48 = vld [vmem:[#allocation2 + $0x10] sm:$0xf0] }
 0x31e   : > { %v3301_v0 = vor.u32 %v3481_v48, %v3300_v47 }
 0x320   : > { %1832 = vmatpush.bf16.msrb.mxu1 %v3301_v0  ;;  %3546 = vmatpush.bf16.msra.mxu2 %v3301_v0 }
 0x350   : > { %v1475_v5 = vpop.xlane.xlu2 %1474 }
 0x351   : > { %3687 = vrcp.f32 %v1475_v5 }
 0x357   : > { %v3688_v9 = vpop.eup %3687 }
 0x358   : > { %v1537_v1 = vmul.f32 %v3688_v9, %v1475_v5  ;;  %v1478_v12 = vpop.xlane.xlu0 %1477  ;;  %v1358_v14 = vpop.xlane.xlu2 %1357 }
 0x359   : > { %3689 = vrcp.f32 %v1478_v12  ;;  %v1395_v18 = vsub.f32 %v4393_v58, %v1358_v14  ;;  %v1396_v11 = vsub.f32 %v4395_v2, %v1358_v14 }
 0x35a   : > { %v1553_v22 = vsub.f32 2.0, %v1537_v1 }
 0x35b   : > { %v1445_v7 = vmul.f32 1.442695, %v1395_v18  ;;  %v1447_v16 = vmul.f32 1.442695, %v1396_v11 }
 0x35c   : > { %v1569_v51 = vmul.f32 %v3688_v9, %v1553_v22 }
 0x35d   : > { %3691 = vpow2.f32 %v1445_v7 }
 0x35e   : > { %v1585_v52 = vmul.f32 %v4397_v6, %v1569_v51  ;;  %v1586_v24 = vmul.f32 %v4399_v10, %v1569_v51  ;;  %3693 = vpow2.f32 %v1447_v16 }
 0x35f   : > { %v3690_v27 = vpop.eup %3689 }
 0x360   : > { %v1617_v32 = vpack.c.bf16 %v1586_v24, %v1585_v52  ;;  %v1538_v17 = vmul.f32 %v3690_v27, %v1478_v12  ;;  %v1481_v35 = vpop.xlane.xlu0 %1480  ;;  %v1361_v36 = vpop.xlane.xlu2 %1360 }
 0x361   : > { %3695 = vrcp.f32 %v1481_v35  ;;  %v1397_v58 = vsub.f32 %v4403_v13, %v1361_v36  ;;  %v1398_v2 = vsub.f32 %v4405_v15, %v1361_v36 }
 0x362   : > { %1633 = vst [vmem:[%s4239_s22] sm:$0xff] %v1617_v32  ;;  %v1554_v37 = vsub.f32 2.0, %v1538_v17  ;;  %v1665_v3 = vunpack.c.l.b16 %v1617_v32  ;;  %v1666_v9 = vunpack.c.h.b16 %v1617_v32 }
 0x363   : > { %v4508_v34 = vpop.eup %3691  ;;  %v1449_v54 = vmul.f32 1.442695, %v1397_v58  ;;  %v1451_v55 = vmul.f32 1.442695, %v1398_v2 }
 0x364   : > { %v4510_v6 = vpop.eup %3693  ;;  %v1570_v10 = vmul.f32 %v3690_v27, %v1554_v37 }
 0x365   : > { %3697 = vpow2.f32 %v1449_v54  ;;  %v1500_v43 = vadd.f32 %v4510_v6, %v4508_v34 }
 0x366   : > { %v1587_v49 = vmul.f32 %v4407_v19, %v1570_v10  ;;  %v1588_v13 = vmul.f32 %v4409_v23, %v1570_v10  ;;  %3699 = vpow2.f32 %v1451_v55 }
 0x367   : > { %v3696_v15 = vpop.eup %3695  ;;  %1501 = vadd.xlane.f32.xlu1 %v1500_v43 }
 0x368   : > { %v1618_v53 = vpack.c.bf16 %v1588_v13, %v1587_v49  ;;  %v1539_v61 = vmul.f32 %v3696_v15, %v1481_v35  ;;  %v1484_v47 = vpop.xlane.xlu1 %1483  ;;  %v1364_v48 = vpop.xlane.xlu0 %1363 }
 0x369   : > { %3701 = vrcp.f32 %v1484_v47  ;;  %v1399_v63 = vsub.f32 %v4417_v29, %v1364_v48  ;;  %v1400_v0 = vsub.f32 %v4419_v30, %v1364_v48 }
 0x36a   : > { %1634 = vst [vmem:[%s4239_s22 + $0x8] sm:$0xff] %v1618_v53  ;;  %v1555_v4 = vsub.f32 2.0, %v1539_v61  ;;  %v1667_v5 = vunpack.c.l.b16 %v1618_v53  ;;  %v1668_v19 = vunpack.c.h.b16 %v1618_v53 }
 0x36b   : > { %v4519_v1 = vpop.eup %3697  ;;  %v1453_v23 = vmul.f32 1.442695, %v1399_v63  ;;  %v1455_v12 = vmul.f32 1.442695, %v1400_v0 }
 0x36c   : > { %v4521_v14 = vpop.eup %3699  ;;  %v1571_v18 = vmul.f32 %v3696_v15, %v1555_v4  ;;  %v1697_v11 = vpack.c.b16 %v1667_v5, %v1665_v3  ;;  %v1698_v22 = vpack.c.b16 %v1668_v19, %v1666_v9 }
 0x36d   : > { %3703 = vpow2.f32 %v1453_v23  ;;  %v1503_v29 = vadd.f32 %v4521_v14, %v4519_v1  ;;  %v3504_v23 = vld [vmem:[#allocation9 + $0x38] sm:$0xff] }
 0x36e   : > { %v1589_v30 = vmul.f32 %v4421_v31, %v1571_v18  ;;  %v1590_v7 = vmul.f32 %v4425_v33, %v1571_v18  ;;  %3705 = vpow2.f32 %v1455_v12  ;;  %1833 = vmatmul.bf16.vlgmr.msrb.gmra.mxu1 %v1697_v11  ;;  %1882 = vmatmul.bf16.vlgmr.msra.gmra.mxu3 %v1698_v22 }
 0x36f   : > { %v3702_v16 = vpop.eup %3701  ;;  %1504 = vadd.xlane.f32.xlu2 %v1503_v29  ;;  %1995 = vmatpush.bf16.msrb.mxu2 %v3504_v23 }
 0x370   : > { %v1540_v51 = vmul.f32 %v3702_v16, %v1484_v47  ;;  %v1487_v52 = vpop.xlane.xlu1 %1486  ;;  %v1367_v24 = vpop.xlane.xlu0 %1366  ;;  %v1619_v27 = vpack.c.bf16 %v1590_v7, %v1589_v30 }
 0x371   : > { %3707 = vrcp.f32 %v1487_v52  ;;  %v1401_v32 = vsub.f32 %v4433_v40, %v1367_v24  ;;  %v1402_v17 = vsub.f32 %v4437_v42, %v1367_v24 }
 0x372   : > { %v1556_v35 = vsub.f32 2.0, %v1540_v51  ;;  %1635 = vst [vmem:[%s4239_s22 + $0x10] sm:$0xff] %v1619_v27  ;;  %v1669_v53 = vunpack.c.l.b16 %v1619_v27  ;;  %v1670_v48 = vunpack.c.h.b16 %v1619_v27 }
 0x373   : > { %v4530_v36 = vpop.eup %3703  ;;  %v1457_v31 = vmul.f32 1.442695, %v1401_v32  ;;  %v1459_v33 = vmul.f32 1.442695, %v1402_v17 }
 0x374   : > { %v4532_v58 = vpop.eup %3705  ;;  %v1572_v2 = vmul.f32 %v3702_v16, %v1556_v35 }
 0x375   : > { %3709 = vpow2.f32 %v1457_v31  ;;  %v1506_v37 = vadd.f32 %v4532_v58, %v4530_v36 }
 0x376   : > { %v1591_v54 = vmul.f32 %v4431_v8, %v1572_v2  ;;  %v1592_v40 = vmul.f32 %v4435_v41, %v1572_v2  ;;  %3711 = vpow2.f32 %v1459_v33 }
 0x377   : > { %v3708_v42 = vpop.eup %3707  ;;  %1507 = vadd.xlane.f32.xlu0 %v1506_v37 }
 0x378   : > { %v1541_v55 = vmul.f32 %v3708_v42, %v1487_v52  ;;  %v1490_v10 = vpop.xlane.xlu2 %1489  ;;  %v1370_v43 = vpop.xlane.xlu1 %1369  ;;  %v1620_v49 = vpack.c.bf16 %v1592_v40, %v1591_v54 }
 0x379   : > { %3713 = vrcp.f32 %v1490_v10  ;;  %v1403_v13 = vsub.f32 %v4451_v60, %v1370_v43  ;;  %v1404_v15 = vsub.f32 %v4455_v62, %v1370_v43 }
 0x37a   : > { %v1557_v61 = vsub.f32 2.0, %v1541_v55  ;;  %1636 = vst [vmem:[%s4239_s22 + $0x18] sm:$0xff] %v1620_v49  ;;  %v1671_v47 = vunpack.c.l.b16 %v1620_v49  ;;  %v1672_v8 = vunpack.c.h.b16 %v1620_v49 }
 0x37b   : > { %v4541_v63 = vpop.eup %3709  ;;  %v1461_v41 = vmul.f32 1.442695, %v1403_v13  ;;  %v1463_v0 = vmul.f32 1.442695, %v1404_v15 }
 0x37c   : > { %v4543_v3 = vpop.eup %3711  ;;  %v1573_v4 = vmul.f32 %v3708_v42, %v1557_v61  ;;  %v1699_v5 = vpack.c.b16 %v1671_v47, %v1669_v53  ;;  %v1700_v9 = vpack.c.b16 %v1672_v8, %v1670_v48 }
 0x37d   : > { %3715 = vpow2.f32 %v1461_v41  ;;  %v1509_v60 = vadd.f32 %v4543_v3, %v4541_v63 }
 0x37e   : > { %v1593_v62 = vmul.f32 %v4445_v46, %v1573_v4  ;;  %v1594_v19 = vmul.f32 %v4449_v59, %v1573_v4  ;;  %3717 = vpow2.f32 %v1463_v0  ;;  %1838 = vmatmul.bf16.gmra.mxu1 %v1699_v5  ;;  %1887 = vmatmul.bf16.gmra.mxu3 %v1700_v9 }
 0x37f   : > { %v3714_v12 = vpop.eup %3713  ;;  %1510 = vadd.xlane.f32.xlu1 %v1509_v60 }
 0x380   : > { %v1542_v18 = vmul.f32 %v3714_v12, %v1490_v10  ;;  %v1493_v11 = vpop.xlane.xlu2 %1492  ;;  %v1373_v22 = vpop.xlane.xlu1 %1372  ;;  %v1621_v29 = vpack.c.bf16 %v1594_v19, %v1593_v62 }
 0x381   : > { %3719 = vrcp.f32 %v1493_v11  ;;  %v1405_v30 = vsub.f32 %v4467_v25, %v1373_v22  ;;  %v1406_v7 = vsub.f32 %v4469_v28, %v1373_v22 }
 0x382   : > { %v1558_v46 = vsub.f32 2.0, %v1542_v18  ;;  %1637 = vst [vmem:[%s4239_s22 + $0x20] sm:$0xff] %v1621_v29  ;;  %v1673_v54 = vunpack.c.l.b16 %v1621_v29  ;;  %v1674_v55 = vunpack.c.h.b16 %v1621_v29 }
 0x383   : > { %v4552_v59 = vpop.eup %3715  ;;  %v1465_v16 = vmul.f32 1.442695, %v1405_v30  ;;  %v1467_v51 = vmul.f32 1.442695, %v1406_v7 }
 0x384   : > { %v4554_v52 = vpop.eup %3717  ;;  %v1574_v24 = vmul.f32 %v3714_v12, %v1558_v46 }
 0x385   : > { %3721 = vpow2.f32 %v1465_v16  ;;  %v1512_v27 = vadd.f32 %v4554_v52, %v4552_v59 }
 0x386   : > { %v1595_v32 = vmul.f32 %v4459_v21, %v1574_v24  ;;  %v1596_v25 = vmul.f32 %v4461_v20, %v1574_v24  ;;  %3723 = vpow2.f32 %v1467_v51  ;;  %v3503_v51 = vld [vmem:[#allocation9 + $0x30] sm:$0xff]  ;;  %v3502_v24 = vld [vmem:[#allocation9 + $0x28] sm:$0xff] }
 0x387   : > { %v3720_v28 = vpop.eup %3719  ;;  %1513 = vadd.xlane.f32.xlu2 %v1512_v27  ;;  %1996 = vmatpush.bf16.msrb.mxu2 %v3503_v51 }
 0x388   : > { %v1543_v17 = vmul.f32 %v3720_v28, %v1493_v11  ;;  %v1496_v35 = vpop.xlane.xlu0 %1495  ;;  %v1376_v31 = vpop.xlane.xlu2 %1375  ;;  %v1622_v33 = vpack.c.bf16 %v1596_v25, %v1595_v32 }
 0x389   : > { %3725 = vrcp.f32 %v1496_v35  ;;  %v1407_v2 = vsub.f32 %v4483_v38, %v1376_v31  ;;  %v1408_v37 = vsub.f32 %v4485_v44, %v1376_v31  ;;  %v3501_v31 = vld [vmem:[#allocation9 + $0x20] sm:$0xff] }
 0x38a   : > { %v1559_v40 = vsub.f32 2.0, %v1543_v17  ;;  %1638 = vst [vmem:[%s4239_s22 + $0x28] sm:$0xff] %v1622_v33  ;;  %v1675_v42 = vunpack.c.l.b16 %v1622_v33  ;;  %v1676_v21 = vunpack.c.h.b16 %v1622_v33 }
 0x38b   : > { %v4563_v10 = vpop.eup %3721  ;;  %v1469_v20 = vmul.f32 1.442695, %v1407_v2  ;;  %v1471_v43 = vmul.f32 1.442695, %v1408_v37  ;;  %1997 = vmatpush.bf16.msrb.mxu2 %v3502_v24 }
 0x38c   : > { %v4565_v49 = vpop.eup %3723  ;;  %v1575_v13 = vmul.f32 %v3720_v28, %v1559_v40  ;;  %v1701_v15 = vpack.c.b16 %v1675_v42, %v1673_v54  ;;  %v1702_v53 = vpack.c.b16 %v1676_v21, %v1674_v55 }
 0x38d   : > { %3727 = vpow2.f32 %v1469_v20  ;;  %v1515_v38 = vadd.f32 %v4565_v49, %v4563_v10 }
 0x38e   : > { %v1597_v44 = vmul.f32 %v4473_v26, %v1575_v13  ;;  %v1598_v61 = vmul.f32 %v4477_v39, %v1575_v13  ;;  %3729 = vpow2.f32 %v1471_v43  ;;  %1843 = vmatmul.bf16.vlgmr.msra.gmra.mxu2 %v1701_v15  ;;  %1892 = vmatmul.bf16.gmra.mxu3 %v1702_v53  ;;  %v3500_v53 = vld [vmem:[#allocation9 + $0x18] sm:$0xff] }
 0x38f   : > { %v3726_v47 = vpop.eup %3725  ;;  %1516 = vadd.xlane.f32.xlu0 %v1515_v38  ;;  %1998 = vmatpush.bf16.msrb.mxu2 %v3501_v31 }
 0x390   : > { %v1544_v48 = vmul.f32 %v3726_v47, %v1496_v35  ;;  %v1499_v8 = vpop.xlane.xlu0 %1498  ;;  %v1623_v41 = vpack.c.bf16 %v1598_v61, %v1597_v44 }
 0x391   : > { %3731 = vrcp.f32 %v1499_v8 }
 0x392   : > { %v1560_v0 = vsub.f32 2.0, %v1544_v48  ;;  %1639 = vst [vmem:[%s4239_s22 + $0x30] sm:$0xff] %v1623_v41  ;;  %v1677_v12 = vunpack.c.l.b16 %v1623_v41  ;;  %v1678_v22 = vunpack.c.h.b16 %v1623_v41 }
 0x393   : > { %v4572_v4 = vpop.eup %3727  ;;  %1999 = vmatpush.bf16.msrb.mxu2 %v3500_v53 }
 0x394   : > { %v4574_v5 = vpop.eup %3729  ;;  %v1576_v9 = vmul.f32 %v3726_v47, %v1560_v0 }
 0x395   : > { %v1518_v26 = vadd.f32 %v4574_v5, %v4572_v4 }
 0x396   : > { %v1599_v39 = vmul.f32 %v4487_v45, %v1576_v9  ;;  %v1600_v60 = vmul.f32 %v4489_v56, %v1576_v9 }
 0x397   : > { %v3732_v62 = vpop.eup %3731  ;;  %1519 = vadd.xlane.f32.xlu1 %v1518_v26 }
 0x398   : > { %v1545_v19 = vmul.f32 %v3732_v62, %v1499_v8  ;;  %v1624_v23 = vpack.c.bf16 %v1600_v60, %v1599_v39 }
 0x39a   : > { %v1561_v18 = vsub.f32 2.0, %v1545_v19  ;;  %1640 = vst [vmem:[%s4239_s22 + $0x38] sm:$0xff] %v1624_v23  ;;  %v1679_v11 = vunpack.c.l.b16 %v1624_v23  ;;  %v1680_v29 = vunpack.c.h.b16 %v1624_v23 }
 0x39c   : > { %v1577_v30 = vmul.f32 %v3732_v62, %v1561_v18  ;;  %v1703_v7 = vpack.c.b16 %v1679_v11, %v1677_v12  ;;  %v1704_v46 = vpack.c.b16 %v1680_v29, %v1678_v22  ;;  %v3498_v29 = vld [vmem:[#allocation9 + $0x8] sm:$0xff] }
 0x39e   : > { %v1601_v16 = vmul.f32 %v4495_v57, %v1577_v30  ;;  %v1602_v45 = vmul.f32 %v4497_v50, %v1577_v30  ;;  %1848 = vmatmul.bf16.gmra.mxu2 %v1703_v7  ;;  %1897 = vmatmul.bf16.gmra.mxu3 %v1704_v46 }
 0x3a0   : > { %v1625_v56 = vpack.c.bf16 %v1602_v45, %v1601_v16 }
 0x3a2   : > { %1641 = vst [vmem:[%s4239_s22 + $0x40] sm:$0xff] %v1625_v56  ;;  %v1681_v40 = vunpack.c.l.b16 %v1625_v56  ;;  %v1682_v21 = vunpack.c.h.b16 %v1625_v56 }
 0x3da   : > { %v1502_v27 = vpop.xlane.xlu1 %1501 }
 0x3db   : > { %3733 = vrcp.f32 %v1502_v27 }
 0x3e1   : > { %v3734_v32 = vpop.eup %3733 }
 0x3e2   : > { %v1546_v25 = vmul.f32 %v3734_v32, %v1502_v27  ;;  %v1505_v28 = vpop.xlane.xlu2 %1504 }
 0x3e3   : > { %3735 = vrcp.f32 %v1505_v28 }
 0x3e4   : > { %v1562_v17 = vsub.f32 2.0, %v1546_v25  ;;  %v3497_v25 = vld [vmem:[#allocation9] sm:$0xff] }
 0x3e6   : > { %v1578_v35 = vmul.f32 %v3734_v32, %v1562_v17 }
 0x3e8   : > { %v1603_v57 = vmul.f32 %v4508_v34, %v1578_v35  ;;  %v1604_v50 = vmul.f32 %v4510_v6, %v1578_v35 }
 0x3e9   : > { %v3736_v33 = vpop.eup %3735 }
 0x3ea   : > { %v1547_v2 = vmul.f32 %v3736_v33, %v1505_v28  ;;  %v1508_v37 = vpop.xlane.xlu0 %1507  ;;  %v1626_v54 = vpack.c.bf16 %v1604_v50, %v1603_v57 }
 0x3eb   : > { %3737 = vrcp.f32 %v1508_v37 }
 0x3ec   : > { %v1563_v42 = vsub.f32 2.0, %v1547_v2  ;;  %1642 = vst [vmem:[%s4239_s22 + $0x48] sm:$0xff] %v1626_v54  ;;  %v1683_v55 = vunpack.c.l.b16 %v1626_v54  ;;  %v1684_v20 = vunpack.c.h.b16 %v1626_v54 }
 0x3ee   : > { %v1579_v43 = vmul.f32 %v3736_v33, %v1563_v42  ;;  %v1705_v13 = vpack.c.b16 %v1683_v55, %v1681_v40  ;;  %v1706_v15 = vpack.c.b16 %v1684_v20, %v1682_v21 }
 0x3f0   : > { %v1605_v34 = vmul.f32 %v4519_v1, %v1579_v43  ;;  %v1606_v6 = vmul.f32 %v4521_v14, %v1579_v43  ;;  %1853 = vmatmul.bf16.gmra.mxu2 %v1705_v13  ;;  %1902 = vmatmul.bf16.gmra.mxu3 %v1706_v15  ;;  %v3499_v1 = vld [vmem:[#allocation9 + $0x10] sm:$0xff]  ;;  %v1834_v13 = vpop.f32.mrf.mxu1 }
 0x3f1   : > { %v3738_v38 = vpop.eup %3737  ;;  %2000 = vmatpush.bf16.msrb.mxu2 %v3499_v1  ;;  %v1883_v54 = vpop.f32.mrf.mxu3 }
 0x3f2   : > { %v1548_v44 = vmul.f32 %v3738_v38, %v1508_v37  ;;  %v1511_v61 = vpop.xlane.xlu1 %1510  ;;  %v1627_v47 = vpack.c.bf16 %v1606_v6, %v1605_v34 }
 0x3f3   : > { %3739 = vrcp.f32 %v1511_v61 }
 0x3f4   : > { %v1564_v48 = vsub.f32 2.0, %v1548_v44  ;;  %1643 = vst [vmem:[%s4239_s22 + $0x50] sm:$0xff] %v1627_v47  ;;  %v1685_v60 = vunpack.c.l.b16 %v1627_v47  ;;  %v1686_v23 = vunpack.c.h.b16 %v1627_v47 }
 0x3f5   : > { %2001 = vmatpush.bf16.msrb.mxu2 %v3498_v29 }
 0x3f6   : > { %v1580_v8 = vmul.f32 %v3738_v38, %v1564_v48 }
 0x3f8   : > { %v1607_v41 = vmul.f32 %v4530_v36, %v1580_v8  ;;  %v1608_v0 = vmul.f32 %v4532_v58, %v1580_v8  ;;  %v1884_v8 = vadd.f32 %v1883_v54, %v1834_v13 }
 0x3f9   : > { %v3740_v9 = vpop.eup %3739  ;;  %2002 = vmatpush.bf16.msrb.mxu2 %v3497_v25  ;;  %v1885_v34 = vpop.f32.mrf.mxu3 }
 0x3fa   : > { %v1549_v14 = vmul.f32 %v3740_v9, %v1511_v61  ;;  %v1514_v26 = vpop.xlane.xlu2 %1513  ;;  %v1628_v39 = vpack.c.bf16 %v1608_v0, %v1607_v41  ;;  %v1836_v61 = vpop.f32.mrf.mxu1 }
 0x3fb   : > { %3741 = vrcp.f32 %v1514_v26  ;;  %v1886_v48 = vadd.f32 %v1885_v34, %v1836_v61 }
 0x3fc   : > { %v1565_v62 = vsub.f32 2.0, %v1549_v14  ;;  %1644 = vst [vmem:[%s4239_s22 + $0x58] sm:$0xff] %v1628_v39  ;;  %v1687_v19 = vunpack.c.l.b16 %v1628_v39  ;;  %v1688_v12 = vunpack.c.h.b16 %v1628_v39 }
 0x3fd   : > { %v1923_v41 = vpack.c.bf16 %v1886_v48, %v1884_v8 }
 0x3fe   : > { %v1581_v18 = vmul.f32 %v3740_v9, %v1565_v62  ;;  %v1707_v11 = vpack.c.b16 %v1687_v19, %v1685_v60  ;;  %v1708_v22 = vpack.c.b16 %v1688_v12, %v1686_v23 }
 0x400   : > { %v1609_v36 = vmul.f32 %v4541_v63, %v1581_v18  ;;  %v1610_v58 = vmul.f32 %v4543_v3, %v1581_v18  ;;  %1858 = vmatmul.bf16.gmra.mxu2 %v1707_v11  ;;  %1907 = vmatmul.bf16.gmra.mxu3 %v1708_v22 }
 0x401   : > { %v3742_v30 = vpop.eup %3741  ;;  %v1888_v47 = vpop.f32.mrf.mxu3 }
 0x402   : > { %v1550_v7 = vmul.f32 %v3742_v30, %v1514_v26  ;;  %v1517_v46 = vpop.xlane.xlu0 %1516  ;;  %v1629_v16 = vpack.c.bf16 %v1610_v58, %v1609_v36 }
 0x403   : > { %3743 = vrcp.f32 %v1517_v46 }
 0x404   : > { %v1566_v45 = vsub.f32 2.0, %v1550_v7  ;;  %1645 = vst [vmem:[%s4239_s22 + $0x60] sm:$0xff] %v1629_v16  ;;  %v1689_v28 = vunpack.c.l.b16 %v1629_v16  ;;  %v1690_v57 = vunpack.c.h.b16 %v1629_v16 }
 0x406   : > { %v1582_v56 = vmul.f32 %v3742_v30, %v1566_v45 }
 0x408   : > { %v1611_v51 = vmul.f32 %v4552_v59, %v1582_v56  ;;  %v1612_v24 = vmul.f32 %v4554_v52, %v1582_v56 }
 0x409   : > { %v3744_v63 = vpop.eup %3743  ;;  %v1890_v0 = vpop.f32.mrf.mxu3 }
 0x40a   : > { %v1551_v27 = vmul.f32 %v3744_v63, %v1517_v46  ;;  %v1520_v3 = vpop.xlane.xlu1 %1519  ;;  %v1630_v32 = vpack.c.bf16 %v1612_v24, %v1611_v51 }
 0x40b   : > { %3745 = vrcp.f32 %v1520_v3 }
 0x40c   : > { %v1567_v17 = vsub.f32 2.0, %v1551_v27  ;;  %1646 = vst [vmem:[%s4239_s22 + $0x68] sm:$0xff] %v1630_v32  ;;  %v1691_v35 = vunpack.c.l.b16 %v1630_v32  ;;  %v1692_v50 = vunpack.c.h.b16 %v1630_v32 }
 0x40e   : > { %v1583_v31 = vmul.f32 %v3744_v63, %v1567_v17  ;;  %v1709_v33 = vpack.c.b16 %v1691_v35, %v1689_v28  ;;  %v1710_v2 = vpack.c.b16 %v1692_v50, %v1690_v57 }
 0x410   : > { %v1613_v59 = vmul.f32 %v4563_v10, %v1583_v31  ;;  %v1614_v52 = vmul.f32 %v4565_v49, %v1583_v31  ;;  %1863 = vmatmul.bf16.gmra.mxu2 %v1709_v33  ;;  %1912 = vmatmul.bf16.gmra.mxu3 %v1710_v2 }
 0x411   : > { %v3746_v37 = vpop.eup %3745  ;;  %v1844_v1 = vpop.f32.mrf.mxu2 }
 0x412   : > { %v1552_v40 = vmul.f32 %v3746_v37, %v1520_v3  ;;  %v1631_v42 = vpack.c.bf16 %v1614_v52, %v1613_v59  ;;  %v1893_v9 = vpop.f32.mrf.mxu3 }
 0x413   : > { %v1894_v23 = vadd.f32 %v1893_v9, %v1844_v1 }
 0x414   : > { %v1568_v55 = vsub.f32 2.0, %v1552_v40  ;;  %1647 = vst [vmem:[%s4239_s22 + $0x70] sm:$0xff] %v1631_v42  ;;  %v1693_v10 = vunpack.c.l.b16 %v1631_v42  ;;  %v1694_v49 = vunpack.c.h.b16 %v1631_v42 }
 0x416   : > { %v1584_v21 = vmul.f32 %v3746_v37, %v1568_v55 }
 0x418   : > { %v1615_v20 = vmul.f32 %v4572_v4, %v1584_v21  ;;  %v1616_v43 = vmul.f32 %v4574_v5, %v1584_v21  ;;  %v1839_v4 = vpop.f32.mrf.mxu1 }
 0x419   : > { %v1889_v26 = vadd.f32 %v1888_v47, %v1839_v4  ;;  %v1846_v60 = vpop.f32.mrf.mxu2  ;;  %v990_v47 = vld [vmem:[%s4606_s28 + $0x20] sm:$0xff] }
 0x41a   : > { %v1632_v15 = vpack.c.bf16 %v1616_v43, %v1615_v20  ;;  %v1895_v62 = vpop.f32.mrf.mxu3  ;;  %v986_v20 = vld [vmem:[%s4606_s28] sm:$0xff] }
 0x41b   : > { %v1896_v19 = vadd.f32 %v1895_v62, %v1846_v60 }
 0x41c   : > { %1648 = vst [vmem:[%s4239_s22 + $0x78] sm:$0xff] %v1632_v15  ;;  %v1695_v6 = vunpack.c.l.b16 %v1632_v15  ;;  %v1696_v53 = vunpack.c.h.b16 %v1632_v15  ;;  %v987_v15 = vld [vmem:[%s4606_s28 + $0x8] sm:$0xff] }
 0x41d   : > { %v1925_v11 = vpack.c.bf16 %v1896_v19, %v1894_v23 }
 0x41e   : > { %v1711_v38 = vpack.c.b16 %v1695_v6, %v1693_v10  ;;  %v1712_v44 = vpack.c.b16 %v1696_v53, %v1694_v49  ;;  %v988_v6 = vld [vmem:[%s4606_s28 + $0x10] sm:$0xff] }
 0x420   : > { %1868 = vmatmul.bf16.gmra.mxu2 %v1711_v38  ;;  %1917 = vmatmul.bf16.gmra.mxu3 %v1712_v44  ;;  %v1841_v5 = vpop.f32.mrf.mxu1  ;;  %v989_v38 = vld [vmem:[%s4606_s28 + $0x18] sm:$0xff] }
 0x421   : > { %v1891_v14 = vadd.f32 %v1890_v0, %v1841_v5  ;;  %v1849_v12 = vpop.f32.mrf.mxu2  ;;  %v992_v5 = vld [vmem:[%s4606_s28 + $0x30] sm:$0xff] }
 0x422   : > { %v1898_v18 = vpop.f32.mrf.mxu3 }
 0x423   : > { %v1924_v39 = vpack.c.bf16 %v1891_v14, %v1889_v26  ;;  %v1899_v29 = vadd.f32 %v1898_v18, %v1849_v12  ;;  %v4082_v14 = vmov 128.0  }
 0x424   : > { %3747 = vrcp.f32 %v4082_v14  ;;  %v3507_v14 = vld [vmem:[#allocation12 + $0x10] sm:$0xff] }
 0x429   : > { %v1851_v22 = vpop.f32.mrf.mxu2 }
 0x42a   : > { %v1900_v36 = vpop.f32.mrf.mxu3  ;;  %v3748_v26 = vpop.eup %3747 }
 0x42b   : > { %v1901_v58 = vadd.f32 %v1900_v36, %v1851_v22  ;;  %vm2082_vm0 = vweird.f32 %v3748_v26 }
 0x42d   : > { %v1926_v30 = vpack.c.bf16 %v1901_v58, %v1899_v29 }
 0x430   : > { %2003 = vmatmul.bf16.vlgmr.msrb.gmra.mxu2 %v1923_v41  ;;  %v991_v41 = vld [vmem:[%s4606_s28 + $0x28] sm:$0xff] }
 0x440   : > { %2008 = vmatmul.bf16.gmra.mxu2 %v1924_v39  ;;  %v2078_v39 = vmul.f32 128.0, %v3748_v26 }
 0x442   : > { %v2079_v60 = vsub.f32 1.0, %v2078_v39 }
 0x444   : > { %v2080_v62 = vmul.f32 %v3748_v26, %v2079_v60 }
 0x446   : > { %v2081_v19 = vadd.f32 %v3748_v26, %v2080_v62  ;;  %v3505_v62 = vld [vmem:[#allocation12] sm:$0xff] }
 0x448   : > { %v4618_v12 = vsel %vm2082_vm0, %v3748_v26, %v2081_v19  ;;  %v3506_v26 = vld [vmem:[#allocation12 + $0x8] sm:$0xff] }
 0x450   : > { %2013 = vmatmul.bf16.gmra.mxu2 %v1925_v11 }
 0x460   : > { %2018 = vmatmul.bf16.gmra.mxu2 %v1926_v30 }
 0x473   : > { %v1854_v7 = vpop.f32.mrf.mxu2  ;;  %v1903_v46 = vpop.f32.mrf.mxu3 }
 0x474   : > { %v1904_v56 = vadd.f32 %v1903_v46, %v1854_v7  ;;  %v993_v7 = vld [vmem:[%s4606_s28 + $0x38] sm:$0xff] }
 0x47b   : > { %v1856_v16 = vpop.f32.mrf.mxu2  ;;  %v1905_v45 = vpop.f32.mrf.mxu3 }
 0x47c   : > { %v1906_v51 = vadd.f32 %v1905_v45, %v1856_v16 }
 0x47e   : > { %v1927_v24 = vpack.c.bf16 %v1906_v51, %v1904_v56 }
 0x480   : > { %2023 = vmatmul.bf16.gmra.mxu2 %v1927_v24 }
 0x483   : > { %v1859_v63 = vpop.f32.mrf.mxu2  ;;  %v1908_v27 = vpop.f32.mrf.mxu3 }
 0x484   : > { %v1909_v25 = vadd.f32 %v1908_v27, %v1859_v63  ;;  %v994_v63 = vld [vmem:[%s4606_s28 + $0x40] sm:$0xff] }
 0x48b   : > { %v1861_v3 = vpop.f32.mrf.mxu2  ;;  %v1910_v32 = vpop.f32.mrf.mxu3 }
 0x48c   : > { %v1911_v28 = vadd.f32 %v1910_v32, %v1861_v3 }
 0x48e   : > { %v1928_v17 = vpack.c.bf16 %v1911_v28, %v1909_v25 }
 0x490   : > { %2028 = vmatmul.bf16.gmra.mxu2 %v1928_v17  ;;  %v995_v17 = vld [vmem:[%s4606_s28 + $0x48] sm:$0xff] }
 0x493   : > { %v1864_v35 = vpop.f32.mrf.mxu2  ;;  %v1913_v57 = vpop.f32.mrf.mxu3 }
 0x494   : > { %v1914_v33 = vadd.f32 %v1913_v57, %v1864_v35 }
 0x49b   : > { %v1866_v50 = vpop.f32.mrf.mxu2  ;;  %v1915_v31 = vpop.f32.mrf.mxu3 }
 0x49c   : > { %v1916_v2 = vadd.f32 %v1915_v31, %v1866_v50 }
 0x49e   : > { %v1929_v59 = vpack.c.bf16 %v1916_v2, %v1914_v33 }
 0x4a0   : > { %2033 = vmatmul.bf16.gmra.mxu2 %v1929_v59  ;;  %v996_v59 = vld [vmem:[%s4606_s28 + $0x50] sm:$0xff] }
 0x4a3   : > { %v1869_v52 = vpop.f32.mrf.mxu2  ;;  %v1918_v37 = vpop.f32.mrf.mxu3 }
 0x4a4   : > { %v1919_v42 = vadd.f32 %v1918_v37, %v1869_v52 }
 0x4ab   : > { %v1871_v54 = vpop.f32.mrf.mxu2  ;;  %v1920_v40 = vpop.f32.mrf.mxu3 }
 0x4ac   : > { %v1921_v55 = vadd.f32 %v1920_v40, %v1871_v54 }
 0x4ae   : > { %v1930_v21 = vpack.c.bf16 %v1921_v55, %v1919_v42 }
 0x4b0   : > { %2038 = vmatmul.bf16.gmra.mxu2 %v1930_v21  ;;  %v997_v21 = vld [vmem:[%s4606_s28 + $0x58] sm:$0xff] }
 0x4b3   : > { %v2004_v43 = vpop.f32.mrf.mxu2 }
 0x4b4   : > { %v2005_v13 = vadd.f32 %v2004_v43, %v986_v20 }
 0x4b6   : > { %2045 = vadd.xlane.f32.xlu2 %v2005_v13 }
 0x4bb   : > { %v2006_v34 = vpop.f32.mrf.mxu2 }
 0x4bc   : > { %v2007_v10 = vadd.f32 %v2006_v34, %v987_v15 }
 0x4be   : > { %2047 = vadd.xlane.f32.xlu0 %v2007_v10 }
 0x4c3   : > { %v2009_v49 = vpop.f32.mrf.mxu2 }
 0x4c4   : > { %v2010_v53 = vadd.f32 %v2009_v49, %v988_v6  ;;  %v998_v6 = vld [vmem:[%s4606_s28 + $0x60] sm:$0xff] }
 0x4c6   : > { %2049 = vadd.xlane.f32.xlu1 %v2010_v53 }
 0x4cb   : > { %v2011_v44 = vpop.f32.mrf.mxu2 }
 0x4cc   : > { %v2012_v61 = vadd.f32 %v2011_v44, %v989_v38 }
 0x4ce   : > { %2051 = vadd.xlane.f32.xlu2 %v2012_v61 }
 0x4d3   : > { %v2014_v48 = vpop.f32.mrf.mxu2 }
 0x4d4   : > { %v2015_v8 = vadd.f32 %v2014_v48, %v990_v47  ;;  %v1000_v48 = vld [vmem:[%s4606_s28 + $0x70] sm:$0xff] }
 0x4d6   : > { %2053 = vadd.xlane.f32.xlu0 %v2015_v8 }
 0x4db   : > { %v2016_v4 = vpop.f32.mrf.mxu2 }
 0x4dc   : > { %v2017_v0 = vadd.f32 %v2016_v4, %v991_v41  ;;  %v3512_v4 = vld [vmem:[#allocation12 + $0x38] sm:$0xff] }
 0x4dd   : > { %2479 = vmatpush.bf16.msrb.mxu3 %v3512_v4 }
 0x4de   : > { %2055 = vadd.xlane.f32.xlu1 %v2017_v0 }
 0x4e3   : > { %v2019_v1 = vpop.f32.mrf.mxu2 }
 0x4e4   : > { %v4615_v9 = vadd.f32 %v2019_v1, %v992_v5  ;;  %v3510_v5 = vld [vmem:[#allocation12 + $0x28] sm:$0xff]  ;;  %v3509_v1 = vld [vmem:[#allocation12 + $0x20] sm:$0xff] }
 0x4e6   : > { %2057 = vadd.xlane.f32.xlu1 %v4615_v9 }
 0x4eb   : > { %v2021_v23 = vpop.f32.mrf.mxu2 }
 0x4ec   : > { %v4629_v16 = vadd.f32 %v2021_v23, %v993_v7 }
 0x503   : > { %v2024_v58 = vpop.f32.mrf.mxu2 }
 0x504   : > { %v4638_v3 = vadd.f32 %v2024_v58, %v994_v63 }
 0x50b   : > { %v2026_v56 = vpop.f32.mrf.mxu2 }
 0x50c   : > { %v4647_v50 = vadd.f32 %v2026_v56, %v995_v17 }
 0x513   : > { %v2029_v35 = vpop.f32.mrf.mxu2 }
 0x514   : > { %v4656_v54 = vadd.f32 %v2029_v35, %v996_v59 }
 0x51b   : > { %v2031_v37 = vpop.f32.mrf.mxu2 }
 0x51c   : > { %v4665_v43 = vadd.f32 %v2031_v37, %v997_v21  ;;  %v4703_v21 = vld [vmem:[#allocation10] sm:$0x1f] }
 0x523   : > { %v2034_v15 = vpop.f32.mrf.mxu2 }
 0x529   : > { %v2046_v18 = vpop.xlane.xlu2 %2045 }
 0x52a   : > { %v2084_v11 = vmul.f32 %v4618_v12, %v2046_v18 }
 0x52b   : > { %v2036_v44 = vpop.f32.mrf.mxu2 }
 0x52c   : > { %v4621_v22 = vsub.f32 %v2005_v13, %v2084_v11 }
 0x52e   : > { %v2116_v36 = vmul.f32 %v4621_v22, %v4621_v22 }
 0x530   : > { %2132 = vadd.xlane.f32.xlu2 %v2116_v36 }
 0x531   : > { %v2048_v29 = vpop.xlane.xlu0 %2047 }
 0x532   : > { %v2085_v30 = vmul.f32 %v4618_v12, %v2048_v29 }
 0x534   : > { %v4627_v46 = vsub.f32 %v2007_v10, %v2085_v30 }
 0x536   : > { %v2117_v45 = vmul.f32 %v4627_v46, %v4627_v46 }
 0x538   : > { %2134 = vadd.xlane.f32.xlu0 %v2117_v45  ;;  %2059 = vadd.xlane.f32.xlu2 %v4629_v16 }
 0x539   : > { %v2050_v51 = vpop.xlane.xlu1 %2049 }
 0x53a   : > { %v2086_v24 = vmul.f32 %v4618_v12, %v2050_v51 }
 0x53c   : > { %v4636_v27 = vsub.f32 %v2010_v53, %v2086_v24  ;;  %v4675_v53 = vadd.f32 %v2034_v15, %v998_v6  ;;  %v1001_v15 = vld [vmem:[%s4606_s28 + $0x78] sm:$0xff] }
 0x53e   : > { %v2118_v32 = vmul.f32 %v4636_v27, %v4636_v27 }
 0x540   : > { %2136 = vadd.xlane.f32.xlu0 %v2118_v32  ;;  %2061 = vadd.xlane.f32.xlu2 %v4638_v3 }
 0x541   : > { %v2052_v25 = vpop.xlane.xlu2 %2051 }
 0x542   : > { %v2087_v28 = vmul.f32 %v4618_v12, %v2052_v25 }
 0x544   : > { %v4645_v57 = vsub.f32 %v2012_v61, %v2087_v28  ;;  %v999_v61 = vld [vmem:[%s4606_s28 + $0x68] sm:$0xff]  ;;  %s3983_s28 = scalar_lea.hbm %s5335_s8, 256 }
 0x545   : > { %v4681_v47 = vadd.f32 %v2036_v44, %v999_v61  ;;  %p3985_p4 = scmp.lt.s32.totalorder %s3983_s28, %s3979_s26 }
 0x546   : > { %v2119_v31 = vmul.f32 %v4645_v57, %v4645_v57 }
 0x547   : > { %p3986_p7 = por %p3985_p4, %p3984_p3 }
 0x548   : > { %2063 = vadd.xlane.f32.xlu0 %v4647_v50  ;;  %2138 = vadd.xlane.f32.xlu1 %v2119_v31 }
 0x549   : > { %v2054_v33 = vpop.xlane.xlu0 %2053  ;;  %p3987_p8 = pnand %p3986_p7, %p3982_p2 }
 0x54a   : > { %v2088_v2 = vmul.f32 %v4618_v12, %v2054_v33 }
 0x54c   : > { %v4654_v52 = vsub.f32 %v2015_v8, %v2088_v2  ;;  %v2039_v8 = vpop.f32.mrf.mxu2 }
 0x54d   : > { %v4685_v41 = vadd.f32 %v2039_v8, %v1000_v48  ;;  %v4713_v48 = vperm.slane %v4703_v21, 0 }
 0x54e   : > { %v2120_v40 = vmul.f32 %v4654_v52, %v4654_v52 }
 0x550   : > { %2065 = vadd.xlane.f32.xlu0 %v4656_v54  ;;  %2140 = vadd.xlane.f32.xlu1 %v2120_v40 }
 0x551   : > { %v2056_v42 = vpop.xlane.xlu1 %2055 }
 0x552   : > { %v2089_v55 = vmul.f32 %v4618_v12, %v2056_v42 }
 0x554   : > { %v4663_v20 = vsub.f32 %v2017_v0, %v2089_v55  ;;  %v3511_v0 = vld [vmem:[#allocation12 + $0x30] sm:$0xff] }
 0x555   : > { %2480 = vmatpush.bf16.msrb.mxu3 %v3511_v0 }
 0x556   : > { %v2121_v13 = vmul.f32 %v4663_v20, %v4663_v20 }
 0x558   : > { %2142 = vadd.xlane.f32.xlu2 %v2121_v13  ;;  %2067 = vadd.xlane.f32.xlu1 %v4665_v43 }
 0x559   : > { %v2058_v34 = vpop.xlane.xlu1 %2057  ;;  %2481 = vmatpush.bf16.msrb.mxu3 %v3510_v5 }
 0x55a   : > { %v2090_v10 = vmul.f32 %v4618_v12, %v2058_v34  ;;  %v2041_v34 = vpop.f32.mrf.mxu2 }
 0x55b   : > { %v4715_v0 = vadd.f32 %v2041_v34, %v1001_v15 }
 0x55c   : > { %v4673_v49 = vsub.f32 %v4615_v9, %v2090_v10  ;;  %v3508_v9 = vld [vmem:[#allocation12 + $0x18] sm:$0xff] }
 0x55d   : > { %2482 = vmatpush.bf16.msrb.mxu3 %v3509_v1 }
 0x55e   : > { %v2122_v38 = vmul.f32 %v4673_v49, %v4673_v49 }
 0x560   : > { %2144 = vadd.xlane.f32.xlu2 %v2122_v38  ;;  %2069 = vadd.xlane.f32.xlu1 %v4675_v53 }
 0x561   : > { %2483 = vmatpush.bf16.msrb.mxu3 %v3508_v9 }
 0x565   : > { %2484 = vmatpush.bf16.msrb.mxu3 %v3507_v14  ;;  %v4723_v14 = vperm.slane %v4703_v21, 1 }
 0x568   : > { %2071 = vadd.xlane.f32.xlu2 %v4681_v47 }
 0x569   : > { %2485 = vmatpush.bf16.msrb.mxu3 %v3506_v26 }
 0x56d   : > { %2486 = vmatpush.bf16.msrb.mxu3 %v3505_v62 }
 0x570   : > { %2073 = vadd.xlane.f32.xlu2 %v4685_v41 }
 0x5a3   : > { %v2133_v39 = vpop.xlane.xlu2 %2132 }
 0x5a4   : > { %v2164_v60 = vmul.f32 %v2133_v39, %v4618_v12 }
 0x5a6   : > { %v2180_v19 = vadd.f32 1e-06, %v2164_v60 }
 0x5a8   : > { %3749 = vrsqrt.f32 %v2180_v19  ;;  %vm2202_vm2 = vweird.f32 %v2180_v19 }
 0x5ab   : > { %v2135_v23 = vpop.xlane.xlu0 %2134  ;;  %v2060_v18 = vpop.xlane.xlu2 %2059 }
 0x5ac   : > { %v2165_v11 = vmul.f32 %v2135_v23, %v4618_v12  ;;  %v2091_v36 = vmul.f32 %v4618_v12, %v2060_v18 }
 0x5ae   : > { %v3750_v58 = vpop.eup %3749  ;;  %v2181_v29 = vadd.f32 1e-06, %v2165_v11  ;;  %v4692_v30 = vsub.f32 %v4629_v16, %v2091_v36 }
 0x5af   : > { %v2197_v7 = vmul.f32 %v3750_v58, %v2180_v19  ;;  %vm2203_vm1 = vweird.f32 %v3750_v58 }
 0x5b0   : > { %3751 = vrsqrt.f32 %v2181_v29  ;;  %v2123_v45 = vmul.f32 %v4692_v30, %v4692_v30  ;;  %vm2204_vm3 = vmor %vm2202_vm2, %vm2203_vm1  ;;  %vm2212_vm5 = vweird.f32 %v2181_v29 }
 0x5b1   : > { %v2198_v56 = vmul.f32 %v3750_v58, %v2197_v7 }
 0x5b2   : > { %2146 = vadd.xlane.f32.xlu0 %v2123_v45 }
 0x5b3   : > { %v2199_v51 = vmul.f32 0.5, %v2198_v56  ;;  %v2137_v24 = vpop.xlane.xlu0 %2136  ;;  %v2062_v63 = vpop.xlane.xlu2 %2061 }
 0x5b4   : > { %v2166_v32 = vmul.f32 %v2137_v24, %v4618_v12  ;;  %v2092_v25 = vmul.f32 %v4618_v12, %v2062_v63 }
 0x5b5   : > { %v2200_v28 = vsub.f32 1.5, %v2199_v51 }
 0x5b6   : > { %v3752_v17 = vpop.eup %3751  ;;  %v2182_v35 = vadd.f32 1e-06, %v2166_v32  ;;  %v4699_v16 = vsub.f32 %v4638_v3, %v2092_v25 }
 0x5b7   : > { %v2201_v31 = vmul.f32 %v3750_v58, %v2200_v28  ;;  %v2207_v33 = vmul.f32 %v3752_v17, %v2181_v29  ;;  %vm2213_vm4 = vweird.f32 %v3752_v17 }
 0x5b8   : > { %3753 = vrsqrt.f32 %v2182_v35  ;;  %v2124_v2 = vmul.f32 %v4699_v16, %v4699_v16  ;;  %vm2214_vm6 = vmor %vm2212_vm5, %vm2213_vm4  ;;  %vm2222_vm8 = vweird.f32 %v2182_v35 }
 0x5b9   : > { %v2208_v59 = vmul.f32 %v3752_v17, %v2207_v33  ;;  %v2205_v37 = vsel %vm2204_vm3, %v3750_v58, %v2201_v31 }
 0x5ba   : > { %2148 = vadd.xlane.f32.xlu0 %v2124_v2  ;;  %v2356_v38 = vmul.f32 %v2205_v37, %v4621_v22 }
 0x5bb   : > { %v2209_v40 = vmul.f32 0.5, %v2208_v59  ;;  %v2064_v42 = vpop.xlane.xlu0 %2063  ;;  %v2139_v55 = vpop.xlane.xlu1 %2138 }
 0x5bc   : > { %v2093_v3 = vmul.f32 %v4618_v12, %v2064_v42  ;;  %v2167_v13 = vmul.f32 %v2139_v55, %v4618_v12 }
 0x5bd   : > { %v2210_v10 = vsub.f32 1.5, %v2209_v40 }
 0x5be   : > { %v3754_v6 = vpop.eup %3753  ;;  %v4710_v44 = vsub.f32 %v4647_v50, %v2093_v3  ;;  %v2183_v61 = vadd.f32 1e-06, %v2167_v13  ;;  %v2373_v50 = vmul.f32 %v4713_v48, %v2356_v38 }
 0x5bf   : > { %v2211_v8 = vmul.f32 %v3752_v17, %v2210_v10  ;;  %v2217_v4 = vmul.f32 %v3754_v6, %v2182_v35  ;;  %vm2223_vm7 = vweird.f32 %v3754_v6 }
 0x5c0   : > { %3755 = vrsqrt.f32 %v2183_v61  ;;  %v2125_v5 = vmul.f32 %v4710_v44, %v4710_v44  ;;  %v2390_v58 = vadd.f32 %v4723_v14, %v2373_v50  ;;  %vm2224_vm9 = vmor %vm2222_vm8, %vm2223_vm7  ;;  %vm2232_vm11 = vweird.f32 %v2183_v61 }
 0x5c1   : > { %v2215_v1 = vsel %vm2214_vm6, %v3752_v17, %v2211_v8  ;;  %v2218_v9 = vmul.f32 %v3754_v6, %v2217_v4 }
 0x5c2   : > { %v2357_v22 = vmul.f32 %v2215_v1, %v4627_v46  ;;  %2150 = vadd.xlane.f32.xlu1 %v2125_v5  ;;  %2075 = vadd.xlane.f32.xlu0 %v4715_v0 }
 0x5c3   : > { %v2219_v26 = vmul.f32 0.5, %v2218_v9  ;;  %v2066_v39 = vpop.xlane.xlu0 %2065  ;;  %v2141_v60 = vpop.xlane.xlu1 %2140 }
 0x5c4   : > { %v2094_v62 = vmul.f32 %v4618_v12, %v2066_v39  ;;  %v2168_v19 = vmul.f32 %v2141_v60, %v4618_v12  ;;  %v2374_v23 = vmul.f32 %v4713_v48, %v2357_v22 }
 0x5c5   : > { %v2220_v18 = vsub.f32 1.5, %v2219_v26 }
 0x5c6   : > { %v3756_v11 = vpop.eup %3755  ;;  %v4729_v46 = vsub.f32 %v4656_v54, %v2094_v62  ;;  %v2184_v36 = vadd.f32 1e-06, %v2168_v19  ;;  %v2391_v29 = vadd.f32 %v4723_v14, %v2374_v23 }
 0x5c7   : > { %v2221_v7 = vmul.f32 %v3754_v6, %v2220_v18  ;;  %v2227_v45 = vmul.f32 %v3756_v11, %v2183_v61  ;;  %vm2233_vm10 = vweird.f32 %v3756_v11 }
 0x5c8   : > { %3757 = vrsqrt.f32 %v2184_v36  ;;  %v2126_v56 = vmul.f32 %v4729_v46, %v4729_v46  ;;  %v2406_v51 = vpack.c.bf16 %v2391_v29, %v2390_v58  ;;  %vm2234_vm12 = vmor %vm2232_vm11, %vm2233_vm10  ;;  %vm2242_vm14 = vweird.f32 %v2184_v36 }
 0x5c9   : > { %v2228_v24 = vmul.f32 %v3756_v11, %v2227_v45  ;;  %v2225_v25 = vsel %vm2224_vm9, %v3754_v6, %v2221_v7 }
 0x5ca   : > { %2152 = vadd.xlane.f32.xlu1 %v2126_v56  ;;  %2487 = vmatmul.bf16.vlgmr.msrb.gmra.mxu3 %v2406_v51  ;;  %v2358_v35 = vmul.f32 %v2225_v25, %v4636_v27 }
 0x5cb   : > { %v2229_v54 = vmul.f32 0.5, %v2228_v24  ;;  %v2068_v63 = vpop.xlane.xlu1 %2067  ;;  %v2143_v32 = vpop.xlane.xlu2 %2142 }
 0x5cc   : > { %v2095_v28 = vmul.f32 %v4618_v12, %v2068_v63  ;;  %v2169_v17 = vmul.f32 %v2143_v32, %v4618_v12  ;;  %v2375_v15 = vmul.f32 %v4713_v48, %v2358_v35 }
 0x5cd   : > { %v2230_v31 = vsub.f32 1.5, %v2229_v54 }
 0x5ce   : > { %v3758_v33 = vpop.eup %3757  ;;  %v4738_v2 = vsub.f32 %v4665_v43, %v2095_v28  ;;  %v2185_v59 = vadd.f32 1e-06, %v2169_v17  ;;  %v2392_v4 = vadd.f32 %v4723_v14, %v2375_v15 }
 0x5cf   : > { %v2231_v37 = vmul.f32 %v3756_v11, %v2230_v31  ;;  %v2237_v40 = vmul.f32 %v3758_v33, %v2184_v36  ;;  %vm2243_vm13 = vweird.f32 %v3758_v33 }
 0x5d0   : > { %3759 = vrsqrt.f32 %v2185_v59  ;;  %v2127_v42 = vmul.f32 %v4738_v2, %v4738_v2  ;;  %vm2244_vm15 = vmor %vm2242_vm14, %vm2243_vm13  ;;  %vm2252_vm1 = vweird.f32 %v2185_v59 }
 0x5d1   : > { %v2238_v55 = vmul.f32 %v3758_v33, %v2237_v40  ;;  %v2235_v3 = vsel %vm2234_vm12, %v3756_v11, %v2231_v37 }
 0x5d2   : > { %2154 = vadd.xlane.f32.xlu2 %v2127_v42  ;;  %v2359_v13 = vmul.f32 %v2235_v3, %v4645_v57 }
 0x5d3   : > { %v2239_v43 = vmul.f32 0.5, %v2238_v55  ;;  %v2070_v34 = vpop.xlane.xlu1 %2069  ;;  %v2145_v10 = vpop.xlane.xlu2 %2144 }
 0x5d4   : > { %v2096_v27 = vmul.f32 %v4618_v12, %v2070_v34  ;;  %v2376_v6 = vmul.f32 %v4713_v48, %v2359_v13 }
 0x5d5   : > { %v2240_v38 = vsub.f32 1.5, %v2239_v43 }
 0x5d6   : > { %v3760_v61 = vpop.eup %3759  ;;  %v4748_v8 = vsub.f32 %v4675_v53, %v2096_v27  ;;  %v2393_v5 = vadd.f32 %v4723_v14, %v2376_v6 }
 0x5d7   : > { %v2241_v1 = vmul.f32 %v3758_v33, %v2240_v38  ;;  %v2247_v57 = vmul.f32 %v3760_v61, %v2185_v59  ;;  %vm2253_vm0 = vweird.f32 %v3760_v61 }
 0x5d8   : > { %v2407_v9 = vpack.c.bf16 %v2393_v5, %v2392_v4  ;;  %v2128_v22 = vmul.f32 %v4748_v8, %v4748_v8  ;;  %vm2254_vm2 = vmor %vm2252_vm1, %vm2253_vm0 }
 0x5d9   : > { %v2248_v50 = vmul.f32 %v3760_v61, %v2247_v57  ;;  %v2245_v53 = vsel %vm2244_vm15, %v3758_v33, %v2241_v1 }
 0x5da   : > { %2492 = vmatmul.bf16.gmra.mxu3 %v2407_v9  ;;  %2156 = vadd.xlane.f32.xlu0 %v2128_v22  ;;  %v2360_v23 = vmul.f32 %v2245_v53, %v4654_v52 }
 0x5db   : > { %v2249_v26 = vmul.f32 0.5, %v2248_v50  ;;  %v2072_v39 = vpop.xlane.xlu2 %2071 }
 0x5dc   : > { %v2097_v60 = vmul.f32 %v4618_v12, %v2072_v39  ;;  %v2377_v29 = vmul.f32 %v4713_v48, %v2360_v23 }
 0x5dd   : > { %v2250_v62 = vsub.f32 1.5, %v2249_v26 }
 0x5de   : > { %v4756_v19 = vsub.f32 %v4681_v47, %v2097_v60  ;;  %v2394_v52 = vadd.f32 %v4723_v14, %v2377_v29 }
 0x5df   : > { %v2251_v18 = vmul.f32 %v3760_v61, %v2250_v62 }
 0x5e0   : > { %v2129_v11 = vmul.f32 %v4756_v19, %v4756_v19 }
 0x5e1   : > { %v2255_v36 = vsel %vm2254_vm2, %v3760_v61, %v2251_v18 }
 0x5e2   : > { %2158 = vadd.xlane.f32.xlu1 %v2129_v11  ;;  %v2361_v58 = vmul.f32 %v2255_v36, %v4663_v20  ;;  %v2170_v20 = vmul.f32 %v2145_v10, %v4618_v12 }
 0x5e3   : > { %v2074_v7 = vpop.xlane.xlu2 %2073 }
 0x5e4   : > { %v2098_v45 = vmul.f32 %v4618_v12, %v2074_v7  ;;  %v2378_v47 = vmul.f32 %v4713_v48, %v2361_v58  ;;  %v2186_v63 = vadd.f32 1e-06, %v2170_v20 }
 0x5e6   : > { %v4766_v56 = vsub.f32 %v4685_v41, %v2098_v45  ;;  %v2395_v51 = vadd.f32 %v4723_v14, %v2378_v47  ;;  %3761 = vrsqrt.f32 %v2186_v63  ;;  %vm2262_vm4 = vweird.f32 %v2186_v63 }
 0x5e8   : > { %v2408_v24 = vpack.c.bf16 %v2395_v51, %v2394_v52  ;;  %v2130_v54 = vmul.f32 %v4766_v56, %v4766_v56 }
 0x5ea   : > { %2497 = vmatmul.bf16.gmra.mxu3 %v2408_v24  ;;  %2160 = vadd.xlane.f32.xlu2 %v2130_v54 }
 0x5ec   : > { %v3762_v32 = vpop.eup %3761 }
 0x5ed   : > { %v2257_v25 = vmul.f32 %v3762_v32, %v2186_v63  ;;  %vm2263_vm3 = vweird.f32 %v3762_v32 }
 0x5ee   : > { %vm2264_vm5 = vmor %vm2262_vm4, %vm2263_vm3 }
 0x5ef   : > { %v2258_v28 = vmul.f32 %v3762_v32, %v2257_v25 }
 0x5f1   : > { %v2259_v33 = vmul.f32 0.5, %v2258_v28 }
 0x5f3   : > { %v2260_v59 = vsub.f32 1.5, %v2259_v33 }
 0x5f5   : > { %v2261_v55 = vmul.f32 %v3762_v32, %v2260_v59 }
 0x5f7   : > { %v2265_v10 = vsel %vm2264_vm5, %v3762_v32, %v2261_v55 }
 0x5f8   : > { %v2362_v1 = vmul.f32 %v2265_v10, %v4673_v49 }
 0x5fa   : > { %v2379_v53 = vmul.f32 %v4713_v48, %v2362_v1 }
 0x5fc   : > { %v2396_v36 = vadd.f32 %v4723_v14, %v2379_v53 }
 0x625   : > { %v2147_v17 = vpop.xlane.xlu0 %2146 }
 0x626   : > { %v2171_v41 = vmul.f32 %v2147_v17, %v4618_v12 }
 0x628   : > { %v2187_v31 = vadd.f32 1e-06, %v2171_v41 }
 0x62a   : > { %3763 = vrsqrt.f32 %v2187_v31  ;;  %vm2272_vm7 = vweird.f32 %v2187_v31 }
 0x62d   : > { %v2149_v35 = vpop.xlane.xlu0 %2148 }
 0x62e   : > { %v2172_v37 = vmul.f32 %v2149_v35, %v4618_v12 }
 0x630   : > { %v3764_v40 = vpop.eup %3763  ;;  %v2188_v42 = vadd.f32 1e-06, %v2172_v37 }
 0x631   : > { %v2267_v3 = vmul.f32 %v3764_v40, %v2187_v31  ;;  %vm2273_vm6 = vweird.f32 %v3764_v40 }
 0x632   : > { %3765 = vrsqrt.f32 %v2188_v42  ;;  %vm2274_vm8 = vmor %vm2272_vm7, %vm2273_vm6  ;;  %vm2282_vm10 = vweird.f32 %v2188_v42 }
 0x633   : > { %v2268_v13 = vmul.f32 %v3764_v40, %v2267_v3 }
 0x635   : > { %v2269_v15 = vmul.f32 0.5, %v2268_v13  ;;  %v2151_v43 = vpop.xlane.xlu1 %2150  ;;  %v2076_v34 = vpop.xlane.xlu0 %2075 }
 0x636   : > { %v2173_v27 = vmul.f32 %v2151_v43, %v4618_v12  ;;  %v2099_v6 = vmul.f32 %v4618_v12, %v2076_v34 }
 0x637   : > { %v2270_v38 = vsub.f32 1.5, %v2269_v15 }
 0x638   : > { %v3766_v61 = vpop.eup %3765  ;;  %v2189_v4 = vadd.f32 1e-06, %v2173_v27  ;;  %v4778_v5 = vsub.f32 %v4715_v0, %v2099_v6 }
 0x639   : > { %v2271_v57 = vmul.f32 %v3764_v40, %v2270_v38  ;;  %v2277_v9 = vmul.f32 %v3766_v61, %v2188_v42  ;;  %vm2283_vm9 = vweird.f32 %v3766_v61 }
 0x63a   : > { %3767 = vrsqrt.f32 %v2189_v4  ;;  %v2131_v22 = vmul.f32 %v4778_v5, %v4778_v5  ;;  %vm2284_vm11 = vmor %vm2282_vm10, %vm2283_vm9  ;;  %vm2292_vm13 = vweird.f32 %v2189_v4 }
 0x63b   : > { %v2278_v50 = vmul.f32 %v3766_v61, %v2277_v9  ;;  %v2275_v26 = vsel %vm2274_vm8, %v3764_v40, %v2271_v57 }
 0x63c   : > { %2162 = vadd.xlane.f32.xlu0 %v2131_v22  ;;  %v2363_v39 = vmul.f32 %v2275_v26, %v4692_v30 }
 0x63d   : > { %v2279_v60 = vmul.f32 0.5, %v2278_v50  ;;  %v2153_v0 = vpop.xlane.xlu1 %2152 }
 0x63e   : > { %v2174_v62 = vmul.f32 %v2153_v0, %v4618_v12  ;;  %v2380_v49 = vmul.f32 %v4713_v48, %v2363_v39 }
 0x63f   : > { %v2280_v23 = vsub.f32 1.5, %v2279_v60 }
 0x640   : > { %v3768_v18 = vpop.eup %3767  ;;  %v2190_v11 = vadd.f32 1e-06, %v2174_v62  ;;  %v2397_v58 = vadd.f32 %v4723_v14, %v2380_v49 }
 0x641   : > { %v2281_v29 = vmul.f32 %v3766_v61, %v2280_v23  ;;  %v2287_v7 = vmul.f32 %v3768_v18, %v2189_v4  ;;  %vm2293_vm12 = vweird.f32 %v3768_v18 }
 0x642   : > { %3769 = vrsqrt.f32 %v2190_v11  ;;  %v2409_v30 = vpack.c.bf16 %v2397_v58, %v2396_v36  ;;  %vm2294_vm14 = vmor %vm2292_vm13, %vm2293_vm12  ;;  %vm2302_vm0 = vweird.f32 %v2190_v11 }
 0x643   : > { %v2288_v45 = vmul.f32 %v3768_v18, %v2287_v7  ;;  %v2285_v47 = vsel %vm2284_vm11, %v3766_v61, %v2281_v29 }
 0x644   : > { %2502 = vmatmul.bf16.gmra.mxu3 %v2409_v30  ;;  %v2364_v63 = vmul.f32 %v2285_v47, %v4699_v16 }
 0x645   : > { %v2289_v52 = vmul.f32 0.5, %v2288_v45  ;;  %v2155_v51 = vpop.xlane.xlu2 %2154 }
 0x646   : > { %v2175_v24 = vmul.f32 %v2155_v51, %v4618_v12  ;;  %v2381_v33 = vmul.f32 %v4713_v48, %v2364_v63 }
 0x647   : > { %v2290_v54 = vsub.f32 1.5, %v2289_v52 }
 0x648   : > { %v3770_v20 = vpop.eup %3769  ;;  %v2191_v32 = vadd.f32 1e-06, %v2175_v24  ;;  %v2398_v3 = vadd.f32 %v4723_v14, %v2381_v33 }
 0x649   : > { %v2291_v25 = vmul.f32 %v3768_v18, %v2290_v54  ;;  %v2297_v28 = vmul.f32 %v3770_v20, %v2190_v11  ;;  %vm2303_vm15 = vweird.f32 %v3770_v20 }
 0x64a   : > { %3771 = vrsqrt.f32 %v2191_v32  ;;  %vm2304_vm1 = vmor %vm2302_vm0, %vm2303_vm15  ;;  %vm2312_vm3 = vweird.f32 %v2191_v32 }
 0x64b   : > { %v2295_v17 = vsel %vm2294_vm14, %v3768_v18, %v2291_v25  ;;  %v2298_v41 = vmul.f32 %v3770_v20, %v2297_v28 }
 0x64c   : > { %v2365_v31 = vmul.f32 %v2295_v17, %v4710_v44 }
 0x64d   : > { %v2299_v59 = vmul.f32 0.5, %v2298_v41  ;;  %v2157_v35 = vpop.xlane.xlu0 %2156 }
 0x64e   : > { %v2176_v37 = vmul.f32 %v2157_v35, %v4618_v12  ;;  %v2382_v40 = vmul.f32 %v4713_v48, %v2365_v31 }
 0x64f   : > { %v2300_v42 = vsub.f32 1.5, %v2299_v59 }
 0x650   : > { %v3772_v16 = vpop.eup %3771  ;;  %v2192_v55 = vadd.f32 1e-06, %v2176_v37  ;;  %v2399_v13 = vadd.f32 %v4723_v14, %v2382_v40 }
 0x651   : > { %v2301_v15 = vmul.f32 %v3770_v20, %v2300_v42  ;;  %v2307_v43 = vmul.f32 %v3772_v16, %v2191_v32  ;;  %vm2313_vm2 = vweird.f32 %v3772_v16  ;;  %v4810_v32 = vpop.f32.mrf.mxu3 }
 0x652   : > { %3773 = vrsqrt.f32 %v2192_v55  ;;  %v2410_v44 = vpack.c.bf16 %v2399_v13, %v2398_v3  ;;  %vm2314_vm4 = vmor %vm2312_vm3, %vm2313_vm2  ;;  %vm2322_vm6 = vweird.f32 %v2192_v55 }
 0x653   : > { %v2308_v34 = vmul.f32 %v3772_v16, %v2307_v43  ;;  %v2305_v10 = vsel %vm2304_vm1, %v3770_v20, %v2301_v15 }
 0x654   : > { %2507 = vmatmul.bf16.gmra.mxu3 %v2410_v44  ;;  %v2366_v1 = vmul.f32 %v2305_v10, %v4729_v46 }
 0x655   : > { %v2309_v27 = vmul.f32 0.5, %v2308_v34  ;;  %v2159_v6 = vpop.xlane.xlu1 %2158 }
 0x656   : > { %v2177_v38 = vmul.f32 %v2159_v6, %v4618_v12  ;;  %v2383_v53 = vmul.f32 %v4713_v48, %v2366_v1 }
 0x657   : > { %v2310_v61 = vsub.f32 1.5, %v2309_v27 }
 0x658   : > { %v3774_v4 = vpop.eup %3773  ;;  %v2193_v57 = vadd.f32 1e-06, %v2177_v38  ;;  %v2400_v23 = vadd.f32 %v4723_v14, %v2383_v53 }
 0x659   : > { %v2311_v9 = vmul.f32 %v3772_v16, %v2310_v61  ;;  %v2317_v22 = vmul.f32 %v3774_v4, %v2192_v55  ;;  %vm2323_vm5 = vweird.f32 %v3774_v4  ;;  %v4812_v25 = vpop.f32.mrf.mxu3 }
 0x65a   : > { %3775 = vrsqrt.f32 %v2193_v57  ;;  %vm2324_vm7 = vmor %vm2322_vm6, %vm2323_vm5  ;;  %vm2332_vm9 = vweird.f32 %v2193_v57 }
 0x65b   : > { %v2315_v50 = vsel %vm2314_vm4, %v3772_v16, %v2311_v9  ;;  %v2318_v26 = vmul.f32 %v3774_v4, %v2317_v22 }
 0x65c   : > { %v2367_v39 = vmul.f32 %v2315_v50, %v4738_v2 }
 0x65d   : > { %v2319_v60 = vmul.f32 0.5, %v2318_v26 }
 0x65e   : > { %v2384_v0 = vmul.f32 %v4713_v48, %v2367_v39 }
 0x65f   : > { %v2320_v62 = vsub.f32 1.5, %v2319_v60 }
 0x660   : > { %v3776_v49 = vpop.eup %3775  ;;  %v2401_v46 = vadd.f32 %v4723_v14, %v2384_v0 }
 0x661   : > { %v2321_v18 = vmul.f32 %v3774_v4, %v2320_v62  ;;  %v2327_v11 = vmul.f32 %v3776_v49, %v2193_v57  ;;  %vm2333_vm8 = vweird.f32 %v3776_v49  ;;  %v2493_v41 = vpop.f32.mrf.mxu3  ;;  %v4827_v62 = vperm.slane %v4703_v21, 2 }
 0x662   : > { %v2411_v36 = vpack.c.bf16 %v2401_v46, %v2400_v23  ;;  %vm2334_vm10 = vmor %vm2332_vm9, %vm2333_vm8 }
 0x663   : > { %v2328_v58 = vmul.f32 %v3776_v49, %v2327_v11  ;;  %v2325_v2 = vsel %vm2324_vm7, %v3774_v4, %v2321_v18 }
 0x664   : > { %2512 = vmatmul.bf16.gmra.mxu3 %v2411_v36  ;;  %v2368_v30 = vmul.f32 %v2325_v2, %v4748_v8  ;;  %v2161_v8 = vpop.xlane.xlu2 %2160 }
 0x665   : > { %v2329_v29 = vmul.f32 0.5, %v2328_v58  ;;  %v2178_v28 = vmul.f32 %v2161_v8, %v4618_v12  ;;  %v4854_v58 = vadd.f32 %v2493_v41, %v4827_v62 }
 0x666   : > { %v2385_v51 = vmul.f32 %v4713_v48, %v2368_v30 }
 0x667   : > { %v2330_v7 = vsub.f32 1.5, %v2329_v29  ;;  %v2194_v17 = vadd.f32 1e-06, %v2178_v28  ;;  %v2530_v2 = vmax.f32 %v4854_v58, 0.0 }
 0x668   : > { %v2402_v54 = vadd.f32 %v4723_v14, %v2385_v51 }
 0x669   : > { %v2331_v45 = vmul.f32 %v3776_v49, %v2330_v7  ;;  %3777 = vrsqrt.f32 %v2194_v17  ;;  %v4815_v33 = vpop.f32.mrf.mxu3  ;;  %vm2342_vm12 = vweird.f32 %v2194_v17 }
 0x66b   : > { %v2335_v47 = vsel %vm2334_vm10, %v3776_v49, %v2331_v45 }
 0x66c   : > { %v2369_v52 = vmul.f32 %v2335_v47, %v4756_v19 }
 0x66e   : > { %v2386_v24 = vmul.f32 %v4713_v48, %v2369_v52 }
 0x66f   : > { %v3778_v19 = vpop.eup %3777 }
 0x670   : > { %v2403_v20 = vadd.f32 %v4723_v14, %v2386_v24  ;;  %v2337_v31 = vmul.f32 %v3778_v19, %v2194_v17  ;;  %vm2343_vm11 = vweird.f32 %v3778_v19 }
 0x671   : > { %v4818_v16 = vpop.f32.mrf.mxu3  ;;  %vm2344_vm13 = vmor %vm2342_vm12, %vm2343_vm11 }
 0x672   : > { %v2412_v63 = vpack.c.bf16 %v2403_v20, %v2402_v54  ;;  %v2338_v59 = vmul.f32 %v3778_v19, %v2337_v31 }
 0x674   : > { %2517 = vmatmul.bf16.gmra.mxu3 %v2412_v63  ;;  %v2339_v42 = vmul.f32 0.5, %v2338_v59  ;;  %v4878_v59 = vadd.f32 %v4815_v33, %v4827_v62 }
 0x676   : > { %v2340_v55 = vsub.f32 1.5, %v2339_v42 }
 0x678   : > { %v2341_v13 = vmul.f32 %v3778_v19, %v2340_v55 }
 0x679   : > { %v2500_v34 = vpop.f32.mrf.mxu3 }
 0x67a   : > { %v2345_v44 = vsel %vm2344_vm13, %v3778_v19, %v2341_v13  ;;  %v4848_v11 = vadd.f32 %v2500_v34, %v4827_v62 }
 0x67b   : > { %v2370_v6 = vmul.f32 %v2345_v44, %v4766_v56 }
 0x67c   : > { %v2533_v36 = vmax.f32 %v4848_v11, 0.0 }
 0x67d   : > { %v2387_v1 = vmul.f32 %v4713_v48, %v2370_v6 }
 0x67f   : > { %v2404_v22 = vadd.f32 %v4723_v14, %v2387_v1 }
 0x6af   : > { %v2163_v35 = vpop.xlane.xlu0 %2162 }
 0x6b0   : > { %v2179_v37 = vmul.f32 %v2163_v35, %v4618_v12  ;;  %v2499_v35 = vadd.f32 %v4818_v16, %v4827_v62  ;;  %v4892_v16 = vadd.f32 %v4810_v32, %v4827_v62 }
 0x6b2   : > { %v2195_v40 = vadd.f32 1e-06, %v2179_v37  ;;  %v2531_v37 = vmax.f32 %v4878_v59, 0.0 }
 0x6b4   : > { %3779 = vrsqrt.f32 %v2195_v40  ;;  %vm2352_vm15 = vweird.f32 %v2195_v40 }
 0x6ba   : > { %v3780_v3 = vpop.eup %3779 }
 0x6bb   : > { %v2347_v15 = vmul.f32 %v3780_v3, %v2195_v40  ;;  %vm2353_vm14 = vweird.f32 %v3780_v3  ;;  %v2532_v40 = vmax.f32 %v2499_v35, 0.0 }
 0x6bc   : > { %vm2354_vm0 = vmor %vm2352_vm15, %vm2353_vm14 }
 0x6bd   : > { %v2348_v43 = vmul.f32 %v3780_v3, %v2347_v15 }
 0x6bf   : > { %v2349_v10 = vmul.f32 0.5, %v2348_v43 }
 0x6c1   : > { %v2350_v27 = vsub.f32 1.5, %v2349_v10 }
 0x6c3   : > { %v2351_v38 = vmul.f32 %v3780_v3, %v2350_v27 }
 0x6c5   : > { %v2355_v61 = vsel %vm2354_vm0, %v3780_v3, %v2351_v38  ;;  %v2528_v38 = vmax.f32 %v4892_v16, 0.0 }
 0x6c6   : > { %v2371_v4 = vmul.f32 %v2355_v61, %v4778_v5 }
 0x6c7   : > { %v2503_v57 = vpop.f32.mrf.mxu3 }
 0x6c8   : > { %v2388_v9 = vmul.f32 %v4713_v48, %v2371_v4  ;;  %v4842_v46 = vadd.f32 %v2503_v57, %v4827_v62 }
 0x6ca   : > { %v2405_v50 = vadd.f32 %v4723_v14, %v2388_v9  ;;  %v2534_v18 = vmax.f32 %v4842_v46, 0.0 }
 0x6cc   : > { %v2413_v26 = vpack.c.bf16 %v2405_v50, %v2404_v22 }
 0x6ce   : > { %2522 = vmatmul.bf16.gmra.mxu3 %v2413_v26 }
 0x6cf   : > { %v2505_v39 = vpop.f32.mrf.mxu3 }
 0x6d0   : > { %v4870_v17 = vadd.f32 %v2505_v39, %v4827_v62 }
 0x6d2   : > { %v2535_v19 = vmax.f32 %v4870_v17, 0.0 }
 0x6d7   : > { %v2508_v53 = vpop.f32.mrf.mxu3 }
 0x6d8   : > { %v4863_v20 = vadd.f32 %v2508_v53, %v4827_v62 }
 0x6da   : > { %v2536_v8 = vmax.f32 %v4863_v20, 0.0 }
 0x6df   : > { %v2510_v56 = vpop.f32.mrf.mxu3 }
 0x6e0   : > { %v2511_v41 = vadd.f32 %v2510_v56, %v4827_v62 }
 0x6e2   : > { %v2537_v31 = vmax.f32 %v2511_v41, 0.0 }
 0x6e7   : > { %v2513_v60 = vpop.f32.mrf.mxu3 }
 0x6e8   : > { %v2514_v63 = vadd.f32 %v2513_v60, %v4827_v62 }
 0x6ea   : > { %v2538_v28 = vmax.f32 %v2514_v63, 0.0 }
 0x6ef   : > { %v2515_v0 = vpop.f32.mrf.mxu3 }
 0x6f0   : > { %v4836_v14 = vadd.f32 %v2515_v0, %v4827_v62 }
 0x6f2   : > { %v2539_v23 = vmax.f32 %v4836_v14, 0.0 }
 0x6f7   : > { %v2518_v5 = vpop.f32.mrf.mxu3 }
 0x6f8   : > { %v4830_v49 = vadd.f32 %v2518_v5, %v4827_v62 }
 0x6fa   : > { %v2540_v48 = vmax.f32 %v4830_v49, 0.0  ;;  %v4929_v49 = vadd.f32 %v4812_v25, %v4827_v62 }
 0x6fc   : > { %2568 = vadd.xlane.f32.xlu0 %v2540_v48 }
 0x6ff   : > { %v2520_v29 = vpop.f32.mrf.mxu3 }
 0x700   : > { %v2521_v47 = vadd.f32 %v2520_v29, %v4827_v62 }
 0x702   : > { %v2541_v24 = vmax.f32 %v2521_v47, 0.0 }
 0x704   : > { %2566 = vadd.xlane.f32.xlu0 %v2539_v23 }
 0x70c   : > { %2556 = vadd.xlane.f32.xlu0 %v2534_v18 }
 0x714   : > { %2554 = vadd.xlane.f32.xlu0 %v2533_v36 }
 0x71c   : > { %2548 = vadd.xlane.f32.xlu0 %v2530_v2 }
 0x751   : > { %v2523_v7 = vpop.f32.mrf.mxu3 }
 0x752   : > { %v2524_v30 = vadd.f32 %v2523_v7, %v4827_v62 }
 0x754   : > { %v2542_v45 = vmax.f32 %v2524_v30, 0.0 }
 0x756   : > { %2572 = vadd.xlane.f32.xlu1 %v2542_v45 }
 0x759   : > { %v2525_v52 = vpop.f32.mrf.mxu3 }
 0x75a   : > { %v2526_v51 = vadd.f32 %v2525_v52, %v4827_v62 }
 0x75c   : > { %v2543_v54 = vmax.f32 %v2526_v51, 0.0 }
 0x75e   : > { %2574 = vadd.xlane.f32.xlu2 %v2543_v54  ;;  %2570 = vadd.xlane.f32.xlu1 %v2541_v24 }
 0x766   : > { %2564 = vadd.xlane.f32.xlu2 %v2538_v28  ;;  %2560 = vadd.xlane.f32.xlu1 %v2536_v8 }
 0x76e   : > { %2562 = vadd.xlane.f32.xlu2 %v2537_v31  ;;  %2558 = vadd.xlane.f32.xlu1 %v2535_v19 }
 0x76f   : > { %v2569_v42 = vpop.xlane.xlu0 %2568 }
 0x770   : > { %v2588_v61 = vmul.f32 %v2569_v42, %v4618_v12 }
 0x772   : > { %v4911_v50 = vsub.f32 %v2540_v48, %v2588_v61 }
 0x774   : > { %v2620_v60 = vmul.f32 %v4911_v50, %v4911_v50 }
 0x776   : > { %2552 = vadd.xlane.f32.xlu2 %v2532_v40  ;;  %2550 = vadd.xlane.f32.xlu1 %v2531_v37 }
 0x777   : > { %v2567_v15 = vpop.xlane.xlu0 %2566 }
 0x778   : > { %v2587_v4 = vmul.f32 %v2567_v15, %v4618_v12 }
 0x77a   : > { %v4915_v26 = vsub.f32 %v2539_v23, %v2587_v4 }
 0x77c   : > { %v2619_v0 = vmul.f32 %v4915_v26, %v4915_v26 }
 0x77f   : > { %v2557_v57 = vpop.xlane.xlu0 %2556 }
 0x780   : > { %v2582_v56 = vmul.f32 %v2557_v57, %v4618_v12 }
 0x782   : > { %v4933_v14 = vsub.f32 %v2534_v18, %v2582_v56 }
 0x784   : > { %v2614_v25 = vmul.f32 %v4933_v14, %v4933_v14 }
 0x787   : > { %v2555_v7 = vpop.xlane.xlu0 %2554 }
 0x788   : > { %v2581_v47 = vmul.f32 %v2555_v7, %v4618_v12 }
 0x78a   : > { %v4949_v18 = vsub.f32 %v2533_v36, %v2581_v47 }
 0x78c   : > { %v2613_v41 = vmul.f32 %v4949_v18, %v4949_v18 }
 0x7c9   : > { %v2573_v55 = vpop.xlane.xlu1 %2572 }
 0x7ca   : > { %v2590_v3 = vmul.f32 %v2573_v55, %v4618_v12 }
 0x7cc   : > { %v4886_v13 = vsub.f32 %v2542_v45, %v2590_v3  ;;  %v2529_v45 = vmax.f32 %v4929_v49, 0.0 }
 0x7ce   : > { %v2622_v33 = vmul.f32 %v4886_v13, %v4886_v13 }
 0x7d0   : > { %2652 = vadd.xlane.f32.xlu1 %v2622_v33 }
 0x7d1   : > { %v2575_v43 = vpop.xlane.xlu2 %2574  ;;  %v2571_v44 = vpop.xlane.xlu1 %2570 }
 0x7d2   : > { %v2591_v34 = vmul.f32 %v2575_v43, %v4618_v12  ;;  %v2589_v10 = vmul.f32 %v2571_v44, %v4618_v12 }
 0x7d4   : > { %v4896_v27 = vsub.f32 %v2543_v54, %v2591_v34  ;;  %v4898_v6 = vsub.f32 %v2541_v24, %v2589_v10 }
 0x7d6   : > { %v2623_v32 = vmul.f32 %v4896_v27, %v4896_v27  ;;  %v2621_v1 = vmul.f32 %v4898_v6, %v4898_v6 }
 0x7d8   : > { %2654 = vadd.xlane.f32.xlu2 %v2623_v32  ;;  %2544 = vadd.xlane.f32.xlu1 %v2528_v38 }
 0x7d9   : > { %2650 = vadd.xlane.f32.xlu0 %v2621_v1  ;;  %v2565_v9 = vpop.xlane.xlu2 %2564  ;;  %v2561_v22 = vpop.xlane.xlu1 %2560 }
 0x7da   : > { %v2586_v39 = vmul.f32 %v2565_v9, %v4618_v12  ;;  %v2584_v52 = vmul.f32 %v2561_v22, %v4618_v12 }
 0x7dc   : > { %v4918_v53 = vsub.f32 %v2538_v28, %v2586_v39  ;;  %v4953_v51 = vsub.f32 %v2536_v8, %v2584_v52  ;;  %v2549_v8 = vpop.xlane.xlu0 %2548 }
 0x7de   : > { %v2618_v5 = vmul.f32 %v4918_v53, %v4918_v53  ;;  %v2616_v11 = vmul.f32 %v4953_v51, %v4953_v51 }
 0x7e0   : > { %2648 = vadd.xlane.f32.xlu2 %v2620_v60  ;;  %2646 = vadd.xlane.f32.xlu1 %v2619_v0 }
 0x7e1   : > { %2644 = vadd.xlane.f32.xlu0 %v2618_v5  ;;  %v2563_v48 = vpop.xlane.xlu2 %2562  ;;  %v2559_v29 = vpop.xlane.xlu1 %2558 }
 0x7e2   : > { %v2585_v23 = vmul.f32 %v2563_v48, %v4618_v12  ;;  %v2583_v28 = vmul.f32 %v2559_v29, %v4618_v12 }
 0x7e4   : > { %v4936_v30 = vsub.f32 %v2537_v31, %v2585_v23  ;;  %v4968_v20 = vsub.f32 %v2535_v19, %v2583_v28 }
 0x7e6   : > { %v2617_v62 = vmul.f32 %v4936_v30, %v4936_v30  ;;  %v2615_v42 = vmul.f32 %v4968_v20, %v4968_v20 }
 0x7e8   : > { %2546 = vadd.xlane.f32.xlu2 %v2529_v45  ;;  %2636 = vadd.xlane.f32.xlu1 %v2614_v25 }
 0x7e9   : > { %2642 = vadd.xlane.f32.xlu0 %v2617_v62  ;;  %v2553_v46 = vpop.xlane.xlu2 %2552  ;;  %v2551_v63 = vpop.xlane.xlu1 %2550 }
 0x7ea   : > { %v2580_v24 = vmul.f32 %v2553_v46, %v4618_v12  ;;  %v2579_v36 = vmul.f32 %v2551_v63, %v4618_v12 }
 0x7ec   : > { %v4956_v54 = vsub.f32 %v2532_v40, %v2580_v24  ;;  %v4972_v35 = vsub.f32 %v2531_v37, %v2579_v36  ;;  %v2578_v40 = vmul.f32 %v2549_v8, %v4618_v12 }
 0x7ee   : > { %v2612_v31 = vmul.f32 %v4956_v54, %v4956_v54  ;;  %v2611_v55 = vmul.f32 %v4972_v35, %v4972_v35  ;;  %v4981_v17 = vsub.f32 %v2530_v2, %v2578_v40 }
 0x7f0   : > { %2634 = vadd.xlane.f32.xlu1 %v2613_v41  ;;  %2640 = vadd.xlane.f32.xlu2 %v2616_v11  ;;  %v2610_v19 = vmul.f32 %v4981_v17, %v4981_v17 }
 0x7f1   : > { %2632 = vadd.xlane.f32.xlu0 %v2612_v31 }
 0x7f8   : > { %2638 = vadd.xlane.f32.xlu2 %v2615_v42 }
 0x7f9   : > { %2630 = vadd.xlane.f32.xlu0 %v2611_v55 }
 0x800   : > { %2628 = vadd.xlane.f32.xlu2 %v2610_v19  ;;  %v5033_v19 = vperm.slane %v4703_v21, 3 }
 0x843   : > { %v2653_v59 = vpop.xlane.xlu1 %2652 }
 0x844   : > { %v2670_v37 = vmul.f32 %v2653_v59, %v4618_v12 }
 0x846   : > { %v2686_v3 = vadd.f32 1e-06, %v2670_v37 }
 0x848   : > { %3781 = vrsqrt.f32 %v2686_v3  ;;  %vm2834_vm2 = vweird.f32 %v2686_v3 }
 0x84b   : > { %v2655_v15 = vpop.xlane.xlu2 %2654  ;;  %v2545_v33 = vpop.xlane.xlu1 %2544 }
 0x84c   : > { %v2671_v43 = vmul.f32 %v2655_v15, %v4618_v12  ;;  %v2651_v44 = vpop.xlane.xlu0 %2650  ;;  %v2576_v34 = vmul.f32 %v2545_v33, %v4618_v12  ;;  %v5045_v15 = vperm.slane %v4703_v21, 4 }
 0x84d   : > { %v2669_v58 = vmul.f32 %v2651_v44, %v4618_v12 }
 0x84e   : > { %v3782_v2 = vpop.eup %3781  ;;  %v4989_v10 = vadd.f32 1e-06, %v2671_v43  ;;  %v4993_v61 = vsub.f32 %v2528_v38, %v2576_v34 }
 0x84f   : > { %v2829_v4 = vmul.f32 %v3782_v2, %v2686_v3  ;;  %v4995_v32 = vadd.f32 1e-06, %v2669_v58  ;;  %vm2835_vm1 = vweird.f32 %v3782_v2 }
 0x850   : > { %3783 = vrsqrt.f32 %v4989_v10  ;;  %v2608_v1 = vmul.f32 %v4993_v61, %v4993_v61  ;;  %vm5023_vm3 = vmor %vm2834_vm2, %vm2835_vm1  ;;  %vm2844_vm5 = vweird.f32 %v4989_v10 }
 0x851   : > { %v2830_v57 = vmul.f32 %v3782_v2, %v2829_v4  ;;  %3785 = vrsqrt.f32 %v4995_v32  ;;  %vm2824_vm6 = vweird.f32 %v4995_v32 }
 0x852   : > { %2624 = vadd.xlane.f32.xlu1 %v2608_v1 }
 0x853   : > { %v2831_v9 = vmul.f32 0.5, %v2830_v57  ;;  %v2649_v22 = vpop.xlane.xlu2 %2648  ;;  %v2647_v39 = vpop.xlane.xlu1 %2646 }
 0x854   : > { %v2668_v56 = vmul.f32 %v2649_v22, %v4618_v12  ;;  %v2645_v16 = vpop.xlane.xlu0 %2644  ;;  %v2667_v38 = vmul.f32 %v2647_v39, %v4618_v12 }
 0x855   : > { %v2832_v60 = vsub.f32 1.5, %v2831_v9  ;;  %v2666_v0 = vmul.f32 %v2645_v16, %v4618_v12 }
 0x856   : > { %v5004_v5 = vpop.eup %3783  ;;  %v5006_v48 = vadd.f32 1e-06, %v2668_v56  ;;  %v5008_v23 = vadd.f32 1e-06, %v2667_v38 }
 0x857   : > { %v5010_v29 = vpop.eup %3785  ;;  %v2839_v7 = vmul.f32 %v5004_v5, %v4989_v10  ;;  %v5014_v47 = vadd.f32 1e-06, %v2666_v0  ;;  %v2833_v52 = vmul.f32 %v3782_v2, %v2832_v60  ;;  %vm2845_vm4 = vweird.f32 %v5004_v5 }
 0x858   : > { %v2819_v25 = vmul.f32 %v5010_v29, %v4995_v32  ;;  %3787 = vrsqrt.f32 %v5006_v48  ;;  %vm5068_vm7 = vmor %vm2844_vm5, %vm2845_vm4  ;;  %vm2825_vm8 = vweird.f32 %v5010_v29  ;;  %vm2814_vm9 = vweird.f32 %v5006_v48 }
 0x859   : > { %v2840_v62 = vmul.f32 %v5004_v5, %v2839_v7  ;;  %3789 = vrsqrt.f32 %v5014_v47  ;;  %v2837_v8 = vsel %vm5023_vm3, %v3782_v2, %v2833_v52  ;;  %vm5104_vm11 = vmor %vm2824_vm6, %vm2825_vm8  ;;  %vm2794_vm12 = vweird.f32 %v5014_v47 }
 0x85a   : > { %v2820_v46 = vmul.f32 %v5010_v29, %v2819_v25  ;;  %3791 = vrsqrt.f32 %v5008_v23  ;;  %v2862_v58 = vmul.f32 %v2837_v8, %v4886_v13  ;;  %vm2804_vm1 = vweird.f32 %v5008_v23 }
 0x85b   : > { %v2841_v63 = vmul.f32 0.5, %v2840_v62  ;;  %v2547_v28 = vpop.xlane.xlu2 %2546  ;;  %v2637_v41 = vpop.xlane.xlu1 %2636 }
 0x85c   : > { %v2577_v31 = vmul.f32 %v2547_v28, %v4618_v12  ;;  %v2643_v11 = vpop.xlane.xlu0 %2642  ;;  %v2662_v36 = vmul.f32 %v2637_v41, %v4618_v12  ;;  %v2821_v42 = vmul.f32 0.5, %v2820_v46  ;;  %v2879_v16 = vmul.f32 %v5033_v19, %v2862_v58 }
 0x85d   : > { %v2842_v40 = vsub.f32 1.5, %v2841_v63  ;;  %v2665_v55 = vmul.f32 %v2643_v11, %v4618_v12 }
 0x85e   : > { %v5035_v59 = vpop.eup %3787  ;;  %v5040_v37 = vsub.f32 %v2529_v45, %v2577_v31  ;;  %v5042_v3 = vadd.f32 1e-06, %v2662_v36  ;;  %v2822_v49 = vsub.f32 1.5, %v2821_v42 }
 0x85f   : > { %v5047_v33 = vpop.eup %3789  ;;  %v2843_v43 = vmul.f32 %v5004_v5, %v2842_v40  ;;  %v2809_v44 = vmul.f32 %v5035_v59, %v5006_v48  ;;  %v5052_v34 = vadd.f32 1e-06, %v2665_v55  ;;  %vm2815_vm10 = vweird.f32 %v5035_v59 }
 0x860   : > { %v5055_v2 = vpop.eup %3791  ;;  %v2789_v21 = vmul.f32 %v5047_v33, %v5014_v47  ;;  %3793 = vrsqrt.f32 %v5042_v3  ;;  %v2609_v1 = vmul.f32 %v5040_v37, %v5040_v37  ;;  %v2823_v25 = vmul.f32 %v5010_v29, %v2822_v49  ;;  %vm2816_vm15 = vmor %vm2814_vm9, %vm2815_vm10 }
 0x861   : > { %v2810_v45 = vmul.f32 %v5035_v59, %v2809_v44  ;;  %v2799_v4 = vmul.f32 %v5055_v2, %v5008_v23  ;;  %3795 = vrsqrt.f32 %v5052_v34  ;;  %v2847_v56 = vsel %vm5068_vm7, %v5004_v5, %v2843_v43 }
 0x862   : > { %v2790_v10 = vmul.f32 %v5047_v33, %v2789_v21  ;;  %2626 = vadd.xlane.f32.xlu2 %v2609_v1  ;;  %v2863_v52 = vmul.f32 %v2847_v56, %v4896_v27  ;;  %vm2795_vm13 = vweird.f32 %v5047_v33  ;;  %vm2805_vm14 = vweird.f32 %v5055_v2 }
 0x863   : > { %v2811_v57 = vmul.f32 0.5, %v2810_v45  ;;  %v2800_v9 = vmul.f32 %v5055_v2, %v2799_v4  ;;  %v2641_v22 = vpop.xlane.xlu2 %2640  ;;  %v2635_v39 = vpop.xlane.xlu1 %2634  ;;  %v2896_v43 = vadd.f32 %v5045_v15, %v2879_v16  ;;  %v2827_v32 = vsel %vm5104_vm11, %v5010_v29, %v2823_v25  ;;  %vm5139_vm0 = vmor %vm2794_vm12, %vm2795_vm13 }
 0x864   : > { %v2791_v38 = vmul.f32 0.5, %v2790_v10  ;;  %v2633_v60 = vpop.xlane.xlu0 %2632  ;;  %v2664_v0 = vmul.f32 %v2641_v22, %v4618_v12  ;;  %v2661_v7 = vmul.f32 %v2635_v39, %v4618_v12  ;;  %v2880_v8 = vmul.f32 %v5033_v19, %v2863_v52  ;;  %vm5152_vm2 = vmor %vm2804_vm1, %vm2805_vm14 }
 0x865   : > { %v2812_v62 = vsub.f32 1.5, %v2811_v57  ;;  %v2801_v46 = vmul.f32 0.5, %v2800_v9  ;;  %v2660_v24 = vmul.f32 %v2633_v60, %v4618_v12  ;;  %v2861_v57 = vmul.f32 %v2827_v32, %v4898_v6 }
 0x866   : > { %v5087_v63 = vpop.eup %3793  ;;  %v2792_v5 = vsub.f32 1.5, %v2791_v38  ;;  %v5090_v28 = vadd.f32 1e-06, %v2664_v0  ;;  %v5092_v41 = vadd.f32 1e-06, %v2661_v7  ;;  %v2897_v45 = vadd.f32 %v5045_v15, %v2880_v8 }
 0x867   : > { %v5094_v31 = vpop.eup %3795  ;;  %v2813_v11 = vmul.f32 %v5035_v59, %v2812_v62  ;;  %v2802_v27 = vsub.f32 1.5, %v2801_v46  ;;  %v2749_v36 = vmul.f32 %v5087_v63, %v5042_v3  ;;  %v5112_v55 = vadd.f32 1e-06, %v2660_v24 }
 0x868   : > { %v2779_v42 = vmul.f32 %v5094_v31, %v5052_v34  ;;  %3797 = vrsqrt.f32 %v5090_v28  ;;  %v2793_v44 = vmul.f32 %v5047_v33, %v2792_v5  ;;  %v2906_v22 = vpack.c.bf16 %v2897_v45, %v2896_v43 }
 0x869   : > { %v2803_v58 = vmul.f32 %v5055_v2, %v2802_v27  ;;  %3799 = vrsqrt.f32 %v5112_v55  ;;  %v2750_v49 = vmul.f32 %v5087_v63, %v2749_v36  ;;  %v2817_v4 = vsel %vm2816_vm15, %v5035_v59, %v2813_v11 }
 0x86a   : > { %v2780_v21 = vmul.f32 %v5094_v31, %v2779_v42  ;;  %3801 = vrsqrt.f32 %v5092_v41  ;;  %v2860_v1 = vmul.f32 %v2817_v4, %v4911_v50  ;;  %v2797_v50 = vsel %vm5139_vm0, %v5047_v33, %v2793_v44  ;;  %2909 = vmatpush.bf16.xpose.msrb.mxu0 %v2906_v22 }
 0x86b   : > { %v2639_v29 = vpop.xlane.xlu2 %2638  ;;  %v2751_v56 = vmul.f32 0.5, %v2750_v49  ;;  %v2878_v23 = vmul.f32 %v5033_v19, %v2861_v57  ;;  %v2807_v7 = vsel %vm5152_vm2, %v5055_v2, %v2803_v58  ;;  %vm2784_vm3 = vweird.f32 %v5052_v34 }
 0x86c   : > { %v2781_v13 = vmul.f32 0.5, %v2780_v21  ;;  %v2663_v48 = vmul.f32 %v2639_v29, %v4618_v12  ;;  %v2631_v10 = vpop.xlane.xlu0 %2630  ;;  %v2877_v38 = vmul.f32 %v5033_v19, %v2860_v1  ;;  %v2858_v25 = vmul.f32 %v2797_v50, %v4918_v53 }
 0x86d   : > { %v2659_v39 = vmul.f32 %v2631_v10, %v4618_v12  ;;  %vm2785_vm4 = vweird.f32 %v5094_v31  ;;  %v2895_v2 = vadd.f32 %v5045_v15, %v2878_v23  ;;  %v2859_v27 = vmul.f32 %v2807_v7, %v4915_v26 }
 0x86e   : > { %v5145_v59 = vadd.f32 1e-06, %v2663_v48  ;;  %v3798_v6 = vpop.eup %3797  ;;  %v2782_v0 = vsub.f32 1.5, %v2781_v13  ;;  %v2894_v5 = vadd.f32 %v5045_v15, %v2877_v38  ;;  %v2752_v36 = vsub.f32 1.5, %v2751_v56  ;;  %vm5192_vm6 = vmor %vm2784_vm3, %vm2785_vm4 }
 0x86f   : > { %v5156_v16 = vadd.f32 1e-06, %v2659_v39  ;;  %v5160_v60 = vpop.eup %3799  ;;  %v2769_v33 = vmul.f32 %v3798_v6, %v5090_v28  ;;  %vm2775_vm5 = vweird.f32 %v3798_v6  ;;  %v2875_v43 = vmul.f32 %v5033_v19, %v2858_v25 }
 0x870   : > { %3803 = vrsqrt.f32 %v5145_v59  ;;  %v5167_v52 = vpop.eup %3801  ;;  %v2729_v62 = vmul.f32 %v5160_v60, %v5112_v55  ;;  %v2783_v53 = vmul.f32 %v5094_v31, %v2782_v0  ;;  %v2905_v42 = vpack.c.bf16 %v2895_v2, %v2894_v5 }
 0x871   : > { %v2770_v46 = vmul.f32 %v3798_v6, %v2769_v33  ;;  %v2739_v24 = vmul.f32 %v5167_v52, %v5092_v41  ;;  %3805 = vrsqrt.f32 %v5156_v16  ;;  %v2876_v32 = vmul.f32 %v5033_v19, %v2859_v27 }
 0x872   : > { %v2730_v58 = vmul.f32 %v5160_v60, %v2729_v62  ;;  %2910 = vmatpush.bf16.xpose.msrb.mxu0 %v2905_v42  ;;  %vm2755_vm7 = vweird.f32 %v5087_v63  ;;  %vm2774_vm8 = vweird.f32 %v5090_v28  ;;  %v2787_v13 = vsel %vm5192_vm6, %v5094_v31, %v2783_v53 }
 0x873   : > { %v2629_v11 = vpop.xlane.xlu2 %2628  ;;  %v2771_v8 = vmul.f32 0.5, %v2770_v46  ;;  %v2740_v49 = vmul.f32 %v5167_v52, %v2739_v24  ;;  %vm2776_vm9 = vmor %vm2774_vm8, %vm2775_vm5  ;;  %v2892_v10 = vadd.f32 %v5045_v15, %v2875_v43  ;;  %v2893_v1 = vadd.f32 %v5045_v15, %v2876_v32 }
 0x874   : > { %v2658_v40 = vmul.f32 %v2629_v11, %v4618_v12  ;;  %v2753_v57 = vmul.f32 %v5087_v63, %v2752_v36  ;;  %v2731_v9 = vmul.f32 0.5, %v2730_v58  ;;  %v2857_v31 = vmul.f32 %v2787_v13, %v4936_v30 }
 0x875   : > { %v2772_v21 = vsub.f32 1.5, %v2771_v8  ;;  %v2741_v22 = vmul.f32 0.5, %v2740_v49  ;;  %vm2754_vm10 = vweird.f32 %v5042_v3  ;;  %v2904_v23 = vpack.c.bf16 %v2893_v1, %v2892_v10 }
 0x876   : > { %v3804_v44 = vpop.eup %3803  ;;  %v5186_v45 = vadd.f32 1e-06, %v2658_v40  ;;  %vm5216_vm12 = vmor %vm2754_vm10, %vm2755_vm7  ;;  %v2732_v0 = vsub.f32 1.5, %v2731_v9  ;;  %vm2764_vm13 = vweird.f32 %v5145_v59  ;;  %vm2735_vm14 = vweird.f32 %v5160_v60 }
 0x877   : > { %v2759_v29 = vmul.f32 %v3804_v44, %v5145_v59  ;;  %v2773_v4 = vmul.f32 %v3798_v6, %v2772_v21  ;;  %v5202_v48 = vpop.eup %3805  ;;  %vm2765_vm11 = vweird.f32 %v3804_v44  ;;  %v2742_v30 = vsub.f32 1.5, %v2741_v22 }
 0x878   : > { %3807 = vrsqrt.f32 %v5186_v45  ;;  %v2719_v47 = vmul.f32 %v5202_v48, %v5156_v16  ;;  %v2757_v3 = vsel %vm5216_vm12, %v5087_v63, %v2753_v57  ;;  %vm2766_vm15 = vmor %vm2764_vm13, %vm2765_vm11  ;;  %vm2745_vm0 = vweird.f32 %v5167_v52 }
 0x879   : > { %v2760_v34 = vmul.f32 %v3804_v44, %v2759_v29  ;;  %v2777_v28 = vsel %vm2776_vm9, %v3798_v6, %v2773_v4  ;;  %v2854_v5 = vmul.f32 %v2757_v3, %v4933_v14  ;;  %v2733_v59 = vmul.f32 %v5160_v60, %v2732_v0 }
 0x87a   : > { %v2856_v50 = vmul.f32 %v2777_v28, %v4953_v51  ;;  %v2874_v51 = vmul.f32 %v5033_v19, %v2857_v31  ;;  %2911 = vmatpush.bf16.xpose.msrb.mxu0 %v2904_v23  ;;  %v2720_v62 = vmul.f32 %v5202_v48, %v2719_v47  ;;  %v2743_v2 = vmul.f32 %v5167_v52, %v2742_v30 }
 0x87b   : > { %v2761_v39 = vmul.f32 0.5, %v2760_v34  ;;  %vm2734_vm1 = vweird.f32 %v5112_v55  ;;  %vm2744_vm3 = vweird.f32 %v5092_v41  ;;  %v2871_v14 = vmul.f32 %v5033_v19, %v2854_v5 }
 0x87c   : > { %v2873_v6 = vmul.f32 %v5033_v19, %v2856_v50  ;;  %v2891_v24 = vadd.f32 %v5045_v15, %v2874_v51  ;;  %vm2736_vm2 = vmor %vm2734_vm1, %vm2735_vm14  ;;  %v2721_v36 = vmul.f32 0.5, %v2720_v62  ;;  %vm2725_vm6 = vweird.f32 %v5202_v48 }
 0x87d   : > { %v2762_v38 = vsub.f32 1.5, %v2761_v39  ;;  %vm2746_vm4 = vmor %vm2744_vm3, %vm2745_vm0  ;;  %v2737_v43 = vsel %vm2736_vm2, %v5160_v60, %v2733_v59  ;;  %v2888_v41 = vadd.f32 %v5045_v15, %v2871_v14  ;;  %vm2714_vm7 = vweird.f32 %v5186_v45 }
 0x87e   : > { %v3808_v33 = vpop.eup %3807  ;;  %v2890_v25 = vadd.f32 %v5045_v15, %v2873_v6  ;;  %v2722_v32 = vsub.f32 1.5, %v2721_v36  ;;  %vm2724_vm9 = vweird.f32 %v5156_v16 }
 0x87f   : > { %v2763_v7 = vmul.f32 %v3804_v44, %v2762_v38  ;;  %v2709_v46 = vmul.f32 %v3808_v33, %v5186_v45  ;;  %vm2715_vm5 = vweird.f32 %v3808_v33  ;;  %vm2726_vm10 = vmor %vm2724_vm9, %vm2725_vm6 }
 0x880   : > { %v2903_v53 = vpack.c.bf16 %v2891_v24, %v2890_v25  ;;  %v2723_v26 = vmul.f32 %v5202_v48, %v2722_v32  ;;  %vm2716_vm8 = vmor %vm2714_vm7, %vm2715_vm5 }
 0x881   : > { %v2767_v63 = vsel %vm2766_vm15, %v3804_v44, %v2763_v7  ;;  %v2710_v11 = vmul.f32 %v3808_v33, %v2709_v46  ;;  %v2852_v44 = vmul.f32 %v2737_v43, %v4956_v54 }
 0x882   : > { %v2855_v27 = vmul.f32 %v2767_v63, %v4968_v20  ;;  %v2747_v20 = vsel %vm2746_vm4, %v5167_v52, %v2743_v2  ;;  %2912 = vmatpush.bf16.xpose.msrb.mxu0 %v2903_v53 }
 0x883   : > { %v2711_v8 = vmul.f32 0.5, %v2710_v11  ;;  %v2853_v58 = vmul.f32 %v2747_v20, %v4949_v18  ;;  %v2869_v60 = vmul.f32 %v5033_v19, %v2852_v44  ;;  %v2727_v18 = vsel %vm2726_vm10, %v5202_v48, %v2723_v26 }
 0x884   : > { %v2872_v40 = vmul.f32 %v5033_v19, %v2855_v27  ;;  %v2851_v45 = vmul.f32 %v2727_v18, %v4972_v35 }
 0x885   : > { %v2712_v42 = vsub.f32 1.5, %v2711_v8  ;;  %v2870_v52 = vmul.f32 %v5033_v19, %v2853_v58  ;;  %v2886_v54 = vadd.f32 %v5045_v15, %v2869_v60 }
 0x886   : > { %v2889_v55 = vadd.f32 %v5045_v15, %v2872_v40  ;;  %v2868_v1 = vmul.f32 %v5033_v19, %v2851_v45 }
 0x887   : > { %v2713_v21 = vmul.f32 %v3808_v33, %v2712_v42  ;;  %v2887_v4 = vadd.f32 %v5045_v15, %v2870_v52 }
 0x888   : > { %v2902_v49 = vpack.c.bf16 %v2889_v55, %v2888_v41  ;;  %v2885_v57 = vadd.f32 %v5045_v15, %v2868_v1 }
 0x889   : > { %v2717_v29 = vsel %vm2716_vm8, %v3808_v33, %v2713_v21  ;;  %v2901_v34 = vpack.c.bf16 %v2887_v4, %v2886_v54 }
 0x88a   : > { %2913 = vmatpush.bf16.xpose.msrb.mxu0 %v2902_v49  ;;  %v2850_v13 = vmul.f32 %v2717_v29, %v4981_v17 }
 0x88c   : > { %v2867_v10 = vmul.f32 %v5033_v19, %v2850_v13 }
 0x88e   : > { %v2884_v16 = vadd.f32 %v5045_v15, %v2867_v10 }
 0x890   : > { %v2900_v9 = vpack.c.bf16 %v2885_v57, %v2884_v16 }
 0x892   : > { %2914 = vmatpush.bf16.xpose.msrb.mxu0 %v2901_v34 }
 0x89a   : > { %2915 = vmatpush.bf16.xpose.msrb.mxu0 %v2900_v9 }
 0x8c5   : > { %v2625_v48 = vpop.xlane.xlu1 %2624 }
 0x8c6   : > { %v2656_v22 = vmul.f32 %v2625_v48, %v4618_v12 }
 0x8c8   : > { %v2672_v28 = vadd.f32 1e-06, %v2656_v22 }
 0x8ca   : > { %3809 = vrsqrt.f32 %v2672_v28  ;;  %vm2694_vm12 = vweird.f32 %v2672_v28 }
 0x8d0   : > { %v3810_v17 = vpop.eup %3809 }
 0x8d1   : > { %v2689_v39 = vmul.f32 %v3810_v17, %v2672_v28  ;;  %vm2695_vm11 = vweird.f32 %v3810_v17 }
 0x8d2   : > { %vm2696_vm13 = vmor %vm2694_vm12, %vm2695_vm11 }
 0x8d3   : > { %v2690_v35 = vmul.f32 %v3810_v17, %v2689_v39 }
 0x8d5   : > { %v2627_v50 = vpop.xlane.xlu2 %2626  ;;  %v2691_v56 = vmul.f32 0.5, %v2690_v35 }
 0x8d6   : > { %v2657_v31 = vmul.f32 %v2627_v50, %v4618_v12 }
 0x8d7   : > { %v2692_v38 = vsub.f32 1.5, %v2691_v56 }
 0x8d8   : > { %v2673_v47 = vadd.f32 1e-06, %v2657_v31 }
 0x8d9   : > { %v2693_v6 = vmul.f32 %v3810_v17, %v2692_v38 }
 0x8da   : > { %3811 = vrsqrt.f32 %v2673_v47  ;;  %vm2704_vm15 = vweird.f32 %v2673_v47 }
 0x8db   : > { %v2697_v3 = vsel %vm2696_vm13, %v3810_v17, %v2693_v6 }
 0x8dc   : > { %v2848_v7 = vmul.f32 %v2697_v3, %v4993_v61  ;;  %v2898_v61 = vld [vmem:[%s5332_s5] sm:$0x1] }
 0x8de   : > { %v2865_v46 = vmul.f32 %v5033_v19, %v2848_v7 }
 0x8e0   : > { %v3812_v23 = vpop.eup %3811  ;;  %v2882_v63 = vadd.f32 %v5045_v15, %v2865_v46 }
 0x8e1   : > { %v2699_v51 = vmul.f32 %v3812_v23, %v2673_v47  ;;  %vm2705_vm14 = vweird.f32 %v3812_v23 }
 0x8e2   : > { %vm2706_vm0 = vmor %vm2704_vm15, %vm2705_vm14 }
 0x8e3   : > { %v2700_v0 = vmul.f32 %v3812_v23, %v2699_v51 }
 0x8e5   : > { %v2701_v30 = vmul.f32 0.5, %v2700_v0 }
 0x8e7   : > { %v2702_v33 = vsub.f32 1.5, %v2701_v30 }
 0x8e9   : > { %v2703_v25 = vmul.f32 %v3812_v23, %v2702_v33 }
 0x8eb   : > { %v2707_v12 = vsel %vm2706_vm0, %v3812_v23, %v2703_v25 }
 0x8ec   : > { %v2849_v62 = vmul.f32 %v2707_v12, %v5040_v37 }
 0x8ee   : > { %v2866_v24 = vmul.f32 %v5033_v19, %v2849_v62 }
 0x8f0   : > { %v2883_v5 = vadd.f32 %v5045_v15, %v2866_v24 }
 0x8f2   : > { %v2899_v59 = vpack.c.bf16 %v2883_v5, %v2882_v63 }
 0x8f4   : > { %2916 = vmatpush.bf16.xpose.msrb.mxu0 %v2899_v59 }
 0x8fb   : > { %2917 = vmatmul.bf16.vlgmr.msrb.gmra.mxu0 %v2898_v61 }
 0x8fc   : > { %3990 = shalt.err (!%p3987_p8)
}
 0x8fd   : > { %s4083_s22 = smov 128   ;;  %s4084_s25 = smov 8  }
 0x8fe   : > { %3568 = dma.vmem_to_hbm [thread:$0]  (%p4171_p5), %s2955_s1, 2048, %s2957_s20, %s2928_s3, %s4083_s22, %s4083_s22, %s4084_s25  }
 0x8ff   : > { %s2907_s19 = sld [smem:[#allocation3]]  ;;  %s2937_s21 = scalar_lea.hbm %s5334_s7, %s4154_s6 }
 0x900   : > { %s2939_s18 = sshll.u32 %s368_s24, 4  ;;  %s2941_s26 = sshll.u32 %s2937_s21, 4  ;;  %s2940_s18 = int_to_ptr.vmem [resolvable:$true] %s2939_s18  ;;  %s2942_s26 = int_to_ptr.hbm [resolvable:$true] %s2941_s26 }
 0x901   : > { %s2924_s23 = scalar_lea.sflag [#allocation6], %s4235_s15  ;;  %s4005_s28 = sshra.s32 %s2942_s26, 4  ;;  %s4006_s28 = int_to_ptr.hbm [resolvable:$true] %s4005_s28 }
 0x902   : > { %s4007_s20 = scalar_lea.hbm %s4006_s28, 1  ;;  %s4011_s3 = scalar_lea.hbm %s5334_s7, 2 }
 0x903   : > { %p4008_p9 = scmp.ne.s32.totalorder %s4006_s28, %s4007_s20  ;;  %p4012_p12 = scmp.lt.s32.totalorder %s4006_s28, %s5334_s7 }
 0x904   : > { %p4013_p13 = scmp.lt.s32.totalorder %s4011_s3, %s4007_s20 }
 0x905   : > { %v2908_v19 = vstv %s2907_s19  ;;  %p4009_p10 = pnand %p4008_p9, %p4171_p5 }
 0x906   : > { %p4014_p0 = por %p4013_p13, %p4012_p12 }
 0x907   : > { %p4010_p11 = pneg %p4009_p10 }
 0x909   : > { %p4015_p1 = pnand %p4014_p0, %p4010_p11 }
 0x978   : > { %v2918_v37 = vpop.f32.mrf.mxu0 }
 0x979   : > { %v2919_v15 = vadd.f32 %v2918_v37, %v2908_v19 }
 0x97b   : > { %2922 = vst [vmem:[%s368_s24] sm:$0x1] %v2919_v15 }
 0x97c   : > { %4018 = shalt.err (!%p4015_p1)
}
 0x97d   : > { %3567 = dma.vmem_to_hbm [thread:$0]  (%p4171_p5), %s2940_s18, 16, %s2942_s26, %s2924_s23  }
 0x980   : > { %v2920_v2 = vpop.f32.mrf.mxu0 }
 0x981 PF: > { %p3604_p2 = scmp.ge.s32.totalorder %s4069_s10, 2  ;;  %s2971_s15 = sand.u32 1, %s4057_s29  }
 0x982   : > { %s2972_s24 = scalar_lea.sflag [#allocation6], %s2971_s15 }
 0x983   : > { %p3588_p3 = pnand %p3604_p2, %p4175_p6 }
 0x985   : > { %p3589_p4 = pneg %p3588_p3 }
 0x987   : > { %4048 = dma.done.wait (%p3589_p4), %s2972_s24, 16  }
 0x988   : > { %4050 = vsyncadd (%p3589_p4), %s2972_s24, 4294967280  ;;  %s2981_s22 = scalar_lea.sflag [#allocation15], %s2971_s15 }
 0x989   : > { %4052 = dma.done.wait (%p3589_p4), %s2981_s22, 2048  }
 0x98a   : > { %4054 = vsyncadd (%p3589_p4), %s2981_s22, 4294965248  ;;  %s5359_s16 = sld [smem:[#allocation21_spill]]  ;;  %p26_p5 = scmp.ge.s32.totalorder %s4158_s12, 4  }
 0x98b   : > { %s5360_s29 = smov %s4061_s30  ;;  %s5361_s30 = smov %s4065_s9 }
 0x98c   : > { %s5363_s10 = smov %s4158_s12  ;;  %28 = sbr.rel (!%p26_p5) target bundleno = 12 (0xc), region = 124 }
 0x990   : > { %s5362_s9 = smov %s5359_s16 }
 0x991   :  { %2987 = vsyncpa [#allocation5], 1 }
 0x992   :  { %2989 = vsyncpa [#allocation5 + $0x1], 1 }
 0x993   :  { %2990 = vsyncpa [#allocation8], 1 }
 0x994   :  { %2991 = vsyncpa [#allocation11], 1 }
 0x995   :  { %2992 = vsyncpa [#allocation6], 1 }
 0x996   :  { %2994 = vsyncpa [#allocation6 + $0x1], 1 }
 0x997   :  { %2995 = vsyncpa [#allocation15], 1 }
 0x998   :  { %2997 = vsyncpa [#allocation15 + $0x1], 1 }

</bundles_post_ra>
